<compile_context>
chip_gen: v5e
topology: v5e:2x2
jax: 0.10.0
libtpu: 0.0.40
codegen_flags: <defaults>
</compile_context>

<pallas_src>
import jax
import jax.numpy as jnp
from jax.experimental import pallas as pl
from jax.experimental.pallas import tpu as pltpu

EPS = 1e-5  # PyTorch InstanceNorm2d default eps


def make_resblock_kernel(Nb, C, H, W, K, P):
    HW = H * W
    S = P * W + P  # max |flat shift| over all conv taps
    taps = [(kh * K + kw, kh - P, kw - P) for kh in range(K) for kw in range(K)]

    def inorm_relu(v, gamma, beta):
        # fused single-pass instance-norm stats over the flattened spatial (lane) axis
        mean = jnp.mean(v, axis=-1, keepdims=True)              # (C, 1)
        mean_sq = jnp.mean(v * v, axis=-1, keepdims=True)       # (C, 1)
        var = jnp.maximum(mean_sq - mean * mean, 0.0)
        y = (v - mean) * jax.lax.rsqrt(var + EPS)
        y = y * gamma + beta                                    # affine
        return jnp.maximum(y, 0.0)                              # ReLU

    def kernel(x_ref, m_ref,
               w1_ref, b1_ref, g1_ref, be1_ref,
               w2_ref, b2_ref, g2_ref, be2_ref,
               o_ref, pad_ref):
        # Zero the tiny flat padded scratch once per grid step; only the interior
        # [S : S+HW] is ever rewritten, so the S-wide borders stay zero for every conv.
        pad_ref[...] = jnp.zeros((C, HW + 2 * S), jnp.float32)

        def conv(v, w_ref_, bias):
            pad_ref[:, S:S + HW] = v                            # interior only
            acc = jnp.zeros((C, HW), jnp.float32)
            for t, dh, dw in taps:
                s = dh * W + dw
                if (dh, dw) == (0, 0):
                    z = v                                       # center tap: no shift/mask
                else:
                    z = pad_ref[:, S + s:S + s + HW] * m_ref[t]  # shifted window, row-bleed masked
                # one small contraction over input channels per tap -> (C_out, HW)
                acc = acc + jnp.dot(w_ref_[t], z, preferred_element_type=jnp.float32)
            return acc + bias                                   # bias: (C, 1)

        g1, be1 = g1_ref[...], be1_ref[...]
        g2, be2 = g2_ref[...], be2_ref[...]
        b1, b2 = b1_ref[...], b2_ref[...]

        for n in range(Nb):                                     # small static unroll over batch block
            xi = x_ref[n].astype(jnp.float32)                   # (C, HW), lane-dense
            y = inorm_relu(xi, g1, be1)
            y = conv(y, w1_ref, b1)
            y = inorm_relu(y, g2, be2)
            y = conv(y, w2_ref, b2)
            o_ref[n] = (y + xi).astype(o_ref.dtype)             # residual add, unmasked lane-dense store

    return kernel


def _tap_masks(H, W, K, P):
    """Per-tap validity masks for shifts on the flattened (H*W) axis. Shape (K*K, 1, H*W)."""
    h = jnp.arange(H)[:, None]
    w = jnp.arange(W)[None, :]
    ms = []
    for kh in range(K):
        for kw in range(K):
            dh, dw = kh - P, kw - P
            valid = (h + dh >= 0) & (h + dh < H) & (w + dw >= 0) & (w + dw < W)
            ms.append(valid.astype(jnp.float32).reshape(1, H * W))
    return jnp.stack(ms, axis=0)


def _pick_batch_block(N, cap=8):
    nb = 1
    for d in range(1, min(N, cap) + 1):
        if N % d == 0:
            nb = d
    return nb


def res_block_2d(x, params, kernel_size, padding):
    """x: (N, C, H, W) float32; params: dict of weights (see main)."""
    N, C, H, W = x.shape
    K, P = kernel_size, padding
    assert 2 * P == K - 1, "residual add requires resolution-preserving padding"

    HW = H * W
    Nb = _pick_batch_block(N)   # batch items per grid step (coarser blocks, fewer DMA steps)
    S = P * W + P

    # conv weights (C_out, C_in, K, K) -> (K*K, C_out, C_in): one (C_out, C_in) matrix per tap.
    def prep_w(w):
        return jnp.transpose(w, (2, 3, 0, 1)).reshape(K * K, C, C)

    w1r, w2r = prep_w(params["w1"]), prep_w(params["w2"])
    b1 = params["b1"].reshape(C, 1)
    b2 = params["b2"].reshape(C, 1)
    g1 = params["g1"].reshape(C, 1)
    be1 = params["be1"].reshape(C, 1)
    g2 = params["g2"].reshape(C, 1)
    be2 = params["be2"].reshape(C, 1)
    masks = _tap_masks(H, W, K, P)

    x_flat = x.reshape(N, C, HW)    # lane-dense view: last axis = H*W (multiple of 128 here)

    def full(shp):
        return pl.BlockSpec(shp, lambda b, _s=shp: (0,) * len(_s))

    out = pl.pallas_call(
        make_resblock_kernel(Nb, C, H, W, K, P),
        out_shape=jax.ShapeDtypeStruct((N, C, HW), x.dtype),
        grid_spec=pltpu.PrefetchScalarGridSpec(
            num_scalar_prefetch=0,
            grid=(N // Nb,),
            in_specs=[
                pl.BlockSpec((Nb, C, HW), lambda b: (b, 0, 0)),   # x (lane-dense)
                full((K * K, 1, HW)),                             # tap masks
                full((K * K, C, C)),                              # w1 (per-tap matrices)
                full((C, 1)),                                     # b1
                full((C, 1)),                                     # gamma1
                full((C, 1)),                                     # beta1
                full((K * K, C, C)),                              # w2
                full((C, 1)),                                     # b2
                full((C, 1)),                                     # gamma2
                full((C, 1)),                                     # beta2
            ],
            out_specs=pl.BlockSpec((Nb, C, HW), lambda b: (b, 0, 0)),
            # tiny flat padded scratch (C, HW + 2S) ~ few KiB; interior rewritten per conv
            scratch_shapes=[pltpu.VMEM((C, HW + 2 * S), jnp.float32)],
        ),
        # batch axis is independent across steps -> "parallel" (sharded across TCs on v7x,
        # no-op on v5e/v6e).  Blocks here are tiny, so the default VMEM limit is plenty;
        # raise vmem_limit_bytes only if Nb/H/W are scaled up.
        compiler_params=pltpu.CompilerParams(dimension_semantics=("parallel",)),
    )(x_flat, masks, w1r, b1, g1, be1, w2r, b2, g2, be2)

    return out.reshape(N, C, H, W)


def reference(x, params, kernel_size, padding):
    """Pure-JAX reference matching PyTorch semantics (for self-check)."""
    C = x.shape[1]
    P = padding

    def inorm(v, g, b):
        m = v.mean(axis=(2, 3), keepdims=True)
        var = ((v - m) ** 2).mean(axis=(2, 3), keepdims=True)
        return (v - m) / jnp.sqrt(var + EPS) * g.reshape(1, C, 1, 1) + b.reshape(1, C, 1, 1)

    def conv(v, w, b):
        y = jax.lax.conv_general_dilated(
            v, w, window_strides=(1, 1), padding=[(P, P), (P, P)],
            dimension_numbers=("NCHW", "OIHW", "NCHW"))
        return y + b.reshape(1, C, 1, 1)

    out = jax.nn.relu(inorm(x, params["g1"], params["be1"]))
    out = conv(out, params["w1"], params["b1"])
    out = jax.nn.relu(inorm(out, params["g2"], params["be2"]))
    out = conv(out, params["w2"], params["b2"])
    return out + x


if __name__ == "__main__":
    N, C, H, W = 2, 4, 16, 16
    K, P = 3, 1  # kernel_size=3, padding=1 (resolution-preserving, as ResBlock2d requires)

    key = jax.random.PRNGKey(0)
    ks = jax.random.split(key, 8)
    bound = 1.0 / (C * K * K) ** 0.5
    params = {
        "w1": jax.random.uniform(ks[0], (C, C, K, K), jnp.float32, -bound, bound),
        "b1": jax.random.uniform(ks[1], (C,), jnp.float32, -bound, bound),
        "w2": jax.random.uniform(ks[2], (C, C, K, K), jnp.float32, -bound, bound),
        "b2": jax.random.uniform(ks[3], (C,), jnp.float32, -bound, bound),
        # InstanceNorm affine params (non-trivial to exercise the affine path)
        "g1": 1.0 + 0.1 * jax.random.normal(ks[4], (C,), jnp.float32),
        "be1": 0.1 * jax.random.normal(ks[5], (C,), jnp.float32),
        "g2": 1.0 + 0.1 * jax.random.normal(ks[6], (C,), jnp.float32),
        "be2": 0.1 * jax.random.normal(ks[7], (C,), jnp.float32),
    }

    x = jax.random.normal(jax.random.PRNGKey(42), (N, C, H, W), jnp.float32)

    out = res_block_2d(x, params, kernel_size=K, padding=P)
    out = jax.block_until_ready(out)

    ref = jax.block_until_ready(reference(x, params, kernel_size=K, padding=P))
    assert out.shape == (N, C, H, W)
    assert jnp.allclose(out, ref, atol=1e-4, rtol=1e-4), float(jnp.max(jnp.abs(out - ref)))

    print("KERNEL_OK")
</pallas_src>

<mosaic_0001>
module attributes {stable_mosaic.version = 11 : i64} {
  func.func @kernel(%arg0: i32, %arg1: memref<2x4x256xf32, #tpu.memory_space<vmem>>, %arg2: memref<9x1x256xf32, #tpu.memory_space<vmem>>, %arg3: memref<9x4x4xf32, #tpu.memory_space<vmem>>, %arg4: memref<4x1xf32, #tpu.memory_space<vmem>>, %arg5: memref<4x1xf32, #tpu.memory_space<vmem>>, %arg6: memref<4x1xf32, #tpu.memory_space<vmem>>, %arg7: memref<9x4x4xf32, #tpu.memory_space<vmem>>, %arg8: memref<4x1xf32, #tpu.memory_space<vmem>>, %arg9: memref<4x1xf32, #tpu.memory_space<vmem>>, %arg10: memref<4x1xf32, #tpu.memory_space<vmem>>, %arg11: memref<2x4x256xf32, #tpu.memory_space<vmem>>, %arg12: memref<4x290xf32, #tpu.memory_space<vmem>>) attributes {dimension_semantics = [#tpu.dimension_semantics<parallel>], iteration_bounds = array<i64: 1>, scalar_prefetch = 0 : i64, scratch_operands = 1 : i64, tpu.core_type = #tpu.core_type<tc>, window_params = [{transform_indices = @transform_0, window_bounds = array<i64: 2, 4, 256>}, {pipeline_mode = #tpu.pipeline_mode<synchronous>, transform_indices = @transform_1, window_bounds = array<i64: 9, 1, 256>}, {pipeline_mode = #tpu.pipeline_mode<synchronous>, transform_indices = @transform_2, window_bounds = array<i64: 9, 4, 4>}, {pipeline_mode = #tpu.pipeline_mode<synchronous>, transform_indices = @transform_3, window_bounds = array<i64: 4, 1>}, {pipeline_mode = #tpu.pipeline_mode<synchronous>, transform_indices = @transform_4, window_bounds = array<i64: 4, 1>}, {pipeline_mode = #tpu.pipeline_mode<synchronous>, transform_indices = @transform_5, window_bounds = array<i64: 4, 1>}, {pipeline_mode = #tpu.pipeline_mode<synchronous>, transform_indices = @transform_6, window_bounds = array<i64: 9, 4, 4>}, {pipeline_mode = #tpu.pipeline_mode<synchronous>, transform_indices = @transform_7, window_bounds = array<i64: 4, 1>}, {pipeline_mode = #tpu.pipeline_mode<synchronous>, transform_indices = @transform_8, window_bounds = array<i64: 4, 1>}, {pipeline_mode = #tpu.pipeline_mode<synchronous>, transform_indices = @transform_9, window_bounds = array<i64: 4, 1>}, {transform_indices = @transform_10, window_bounds = array<i64: 2, 4, 256>}]} {
    %cst = arith.constant 0.000000e+00 : f32
    %0 = vector.broadcast %cst : f32 to vector<4x290xf32>
    %c0 = arith.constant 0 : index
    %c0_0 = arith.constant 0 : index
    %1 = vector.load %arg12[%c0, %c0_0] : memref<4x290xf32, #tpu.memory_space<vmem>>, vector<4x290xf32>
    tpu.vector_store %arg12[%c0, %c0_0], %0 {strides = array<i32>} : memref<4x290xf32, #tpu.memory_space<vmem>>, vector<4x290xf32>,
    %c0_1 = arith.constant 0 : index
    %c0_2 = arith.constant 0 : index
    %2 = vector.load %arg5[%c0_1, %c0_2] : memref<4x1xf32, #tpu.memory_space<vmem>>, vector<4x1xf32>
    %c0_3 = arith.constant 0 : index
    %c0_4 = arith.constant 0 : index
    %3 = vector.load %arg6[%c0_3, %c0_4] : memref<4x1xf32, #tpu.memory_space<vmem>>, vector<4x1xf32>
    %c0_5 = arith.constant 0 : index
    %c0_6 = arith.constant 0 : index
    %4 = vector.load %arg9[%c0_5, %c0_6] : memref<4x1xf32, #tpu.memory_space<vmem>>, vector<4x1xf32>
    %c0_7 = arith.constant 0 : index
    %c0_8 = arith.constant 0 : index
    %5 = vector.load %arg10[%c0_7, %c0_8] : memref<4x1xf32, #tpu.memory_space<vmem>>, vector<4x1xf32>
    %c0_9 = arith.constant 0 : index
    %c0_10 = arith.constant 0 : index
    %6 = vector.load %arg4[%c0_9, %c0_10] : memref<4x1xf32, #tpu.memory_space<vmem>>, vector<4x1xf32>
    %c0_11 = arith.constant 0 : index
    %c0_12 = arith.constant 0 : index
    %7 = vector.load %arg8[%c0_11, %c0_12] : memref<4x1xf32, #tpu.memory_space<vmem>>, vector<4x1xf32>
    %c0_13 = arith.constant 0 : index
    %c0_14 = arith.constant 0 : index
    %c0_15 = arith.constant 0 : index
    %8 = vector.load %arg1[%c0_13, %c0_14, %c0_15] : memref<2x4x256xf32, #tpu.memory_space<vmem>>, vector<1x4x256xf32>
    %9 = vector.shape_cast %8 : vector<1x4x256xf32> to vector<4x256xf32>
    %cst_16 = arith.constant dense<0.000000e+00> : vector<4xf32>
    %10 = vector.multi_reduction <add>, %9, %cst_16 [1] : vector<4x256xf32> to vector<4xf32>
    %11 = vector.shape_cast %10 : vector<4xf32> to vector<4x1xf32>
    %cst_17 = arith.constant 2.560000e+02 : f32
    %12 = vector.broadcast %cst_17 : f32 to vector<4x1xf32>
    %13 = arith.divf %11, %12 : vector<4x1xf32>
    %14 = arith.mulf %9, %9 : vector<4x256xf32>
    %cst_18 = arith.constant dense<0.000000e+00> : vector<4xf32>
    %15 = vector.multi_reduction <add>, %14, %cst_18 [1] : vector<4x256xf32> to vector<4xf32>
    %16 = vector.shape_cast %15 : vector<4xf32> to vector<4x1xf32>
    %cst_19 = arith.constant 2.560000e+02 : f32
    %17 = vector.broadcast %cst_19 : f32 to vector<4x1xf32>
    %18 = arith.divf %16, %17 : vector<4x1xf32>
    %19 = arith.mulf %13, %13 : vector<4x1xf32>
    %20 = arith.subf %18, %19 : vector<4x1xf32>
    %cst_20 = arith.constant 0.000000e+00 : f32
    %21 = vector.broadcast %cst_20 : f32 to vector<4x1xf32>
    %22 = arith.maximumf %20, %21 : vector<4x1xf32>
    %23 = vector.broadcast %13 : vector<4x1xf32> to vector<4x256xf32>
    %24 = arith.subf %9, %23 : vector<4x256xf32>
    %cst_21 = arith.constant 9.99999974E-6 : f32
    %25 = vector.broadcast %cst_21 : f32 to vector<4x1xf32>
    %26 = arith.addf %22, %25 : vector<4x1xf32>
    %27 = math.rsqrt %26 : vector<4x1xf32>
    %28 = vector.broadcast %27 : vector<4x1xf32> to vector<4x256xf32>
    %29 = arith.mulf %24, %28 : vector<4x256xf32>
    %30 = vector.broadcast %2 : vector<4x1xf32> to vector<4x256xf32>
    %31 = arith.mulf %29, %30 : vector<4x256xf32>
    %32 = vector.broadcast %3 : vector<4x1xf32> to vector<4x256xf32>
    %33 = arith.addf %31, %32 : vector<4x256xf32>
    %cst_22 = arith.constant 0.000000e+00 : f32
    %34 = vector.broadcast %cst_22 : f32 to vector<4x256xf32>
    %35 = arith.maximumf %33, %34 : vector<4x256xf32>
    %c0_23 = arith.constant 0 : index
    %c17 = arith.constant 17 : index
    %36 = vector.load %arg12[%c0_23, %c17] : memref<4x290xf32, #tpu.memory_space<vmem>>, vector<4x256xf32>
    tpu.vector_store %arg12[%c0_23, %c17], %35 {strides = array<i32>} : memref<4x290xf32, #tpu.memory_space<vmem>>, vector<4x256xf32>,
    %cst_24 = arith.constant 0.000000e+00 : f32
    %37 = vector.broadcast %cst_24 : f32 to vector<4x256xf32>
    %c0_25 = arith.constant 0 : index
    %c0_26 = arith.constant 0 : index
    %38 = vector.load %arg12[%c0_25, %c0_26] : memref<4x290xf32, #tpu.memory_space<vmem>>, vector<4x256xf32>
    %c0_27 = arith.constant 0 : index
    %c0_28 = arith.constant 0 : index
    %c0_29 = arith.constant 0 : index
    %39 = vector.load %arg2[%c0_27, %c0_28, %c0_29] : memref<9x1x256xf32, #tpu.memory_space<vmem>>, vector<1x1x256xf32>
    %40 = vector.shape_cast %39 : vector<1x1x256xf32> to vector<1x256xf32>
    %41 = vector.broadcast %40 : vector<1x256xf32> to vector<4x256xf32>
    %42 = arith.mulf %38, %41 : vector<4x256xf32>
    %c0_30 = arith.constant 0 : index
    %c0_31 = arith.constant 0 : index
    %c0_32 = arith.constant 0 : index
    %43 = vector.load %arg3[%c0_30, %c0_31, %c0_32] : memref<9x4x4xf32, #tpu.memory_space<vmem>>, vector<1x4x4xf32>
    %44 = vector.shape_cast %43 : vector<1x4x4xf32> to vector<4x4xf32>
    %cst_33 = arith.constant dense<0.000000e+00> : vector<4x256xf32>
    %45 = tpu.matmul %44, %42, %cst_33 {dimension_numbers = #tpu.dot_dimension_numbers<[1], [0], [0], [1], [0, 0, 1, 1], [], []>} : vector<4x4xf32>, vector<4x256xf32>, vector<4x256xf32> -> vector<4x256xf32>
    %46 = arith.addf %37, %45 : vector<4x256xf32>
    %c0_34 = arith.constant 0 : index
    %c1 = arith.constant 1 : index
    %47 = vector.load %arg12[%c0_34, %c1] : memref<4x290xf32, #tpu.memory_space<vmem>>, vector<4x256xf32>
    %c1_35 = arith.constant 1 : index
    %c0_36 = arith.constant 0 : index
    %c0_37 = arith.constant 0 : index
    %48 = vector.load %arg2[%c1_35, %c0_36, %c0_37] : memref<9x1x256xf32, #tpu.memory_space<vmem>>, vector<1x1x256xf32>
    %49 = vector.shape_cast %48 : vector<1x1x256xf32> to vector<1x256xf32>
    %50 = vector.broadcast %49 : vector<1x256xf32> to vector<4x256xf32>
    %51 = arith.mulf %47, %50 : vector<4x256xf32>
    %c1_38 = arith.constant 1 : index
    %c0_39 = arith.constant 0 : index
    %c0_40 = arith.constant 0 : index
    %52 = vector.load %arg3[%c1_38, %c0_39, %c0_40] : memref<9x4x4xf32, #tpu.memory_space<vmem>>, vector<1x4x4xf32>
    %53 = vector.shape_cast %52 : vector<1x4x4xf32> to vector<4x4xf32>
    %cst_41 = arith.constant dense<0.000000e+00> : vector<4x256xf32>
    %54 = tpu.matmul %53, %51, %cst_41 {dimension_numbers = #tpu.dot_dimension_numbers<[1], [0], [0], [1], [0, 0, 1, 1], [], []>} : vector<4x4xf32>, vector<4x256xf32>, vector<4x256xf32> -> vector<4x256xf32>
    %55 = arith.addf %46, %54 : vector<4x256xf32>
    %c0_42 = arith.constant 0 : index
    %c2 = arith.constant 2 : index
    %56 = vector.load %arg12[%c0_42, %c2] : memref<4x290xf32, #tpu.memory_space<vmem>>, vector<4x256xf32>
    %c2_43 = arith.constant 2 : index
    %c0_44 = arith.constant 0 : index
    %c0_45 = arith.constant 0 : index
    %57 = vector.load %arg2[%c2_43, %c0_44, %c0_45] : memref<9x1x256xf32, #tpu.memory_space<vmem>>, vector<1x1x256xf32>
    %58 = vector.shape_cast %57 : vector<1x1x256xf32> to vector<1x256xf32>
    %59 = vector.broadcast %58 : vector<1x256xf32> to vector<4x256xf32>
    %60 = arith.mulf %56, %59 : vector<4x256xf32>
    %c2_46 = arith.constant 2 : index
    %c0_47 = arith.constant 0 : index
    %c0_48 = arith.constant 0 : index
    %61 = vector.load %arg3[%c2_46, %c0_47, %c0_48] : memref<9x4x4xf32, #tpu.memory_space<vmem>>, vector<1x4x4xf32>
    %62 = vector.shape_cast %61 : vector<1x4x4xf32> to vector<4x4xf32>
    %cst_49 = arith.constant dense<0.000000e+00> : vector<4x256xf32>
    %63 = tpu.matmul %62, %60, %cst_49 {dimension_numbers = #tpu.dot_dimension_numbers<[1], [0], [0], [1], [0, 0, 1, 1], [], []>} : vector<4x4xf32>, vector<4x256xf32>, vector<4x256xf32> -> vector<4x256xf32>
    %64 = arith.addf %55, %63 : vector<4x256xf32>
    %c0_50 = arith.constant 0 : index
    %c16 = arith.constant 16 : index
    %65 = vector.load %arg12[%c0_50, %c16] : memref<4x290xf32, #tpu.memory_space<vmem>>, vector<4x256xf32>
    %c3 = arith.constant 3 : index
    %c0_51 = arith.constant 0 : index
    %c0_52 = arith.constant 0 : index
    %66 = vector.load %arg2[%c3, %c0_51, %c0_52] : memref<9x1x256xf32, #tpu.memory_space<vmem>>, vector<1x1x256xf32>
    %67 = vector.shape_cast %66 : vector<1x1x256xf32> to vector<1x256xf32>
    %68 = vector.broadcast %67 : vector<1x256xf32> to vector<4x256xf32>
    %69 = arith.mulf %65, %68 : vector<4x256xf32>
    %c3_53 = arith.constant 3 : index
    %c0_54 = arith.constant 0 : index
    %c0_55 = arith.constant 0 : index
    %70 = vector.load %arg3[%c3_53, %c0_54, %c0_55] : memref<9x4x4xf32, #tpu.memory_space<vmem>>, vector<1x4x4xf32>
    %71 = vector.shape_cast %70 : vector<1x4x4xf32> to vector<4x4xf32>
    %cst_56 = arith.constant dense<0.000000e+00> : vector<4x256xf32>
    %72 = tpu.matmul %71, %69, %cst_56 {dimension_numbers = #tpu.dot_dimension_numbers<[1], [0], [0], [1], [0, 0, 1, 1], [], []>} : vector<4x4xf32>, vector<4x256xf32>, vector<4x256xf32> -> vector<4x256xf32>
    %73 = arith.addf %64, %72 : vector<4x256xf32>
    %c4 = arith.constant 4 : index
    %c0_57 = arith.constant 0 : index
    %c0_58 = arith.constant 0 : index
    %74 = vector.load %arg3[%c4, %c0_57, %c0_58] : memref<9x4x4xf32, #tpu.memory_space<vmem>>, vector<1x4x4xf32>
    %75 = vector.shape_cast %74 : vector<1x4x4xf32> to vector<4x4xf32>
    %cst_59 = arith.constant dense<0.000000e+00> : vector<4x256xf32>
    %76 = tpu.matmul %75, %35, %cst_59 {dimension_numbers = #tpu.dot_dimension_numbers<[1], [0], [0], [1], [0, 0, 1, 1], [], []>} : vector<4x4xf32>, vector<4x256xf32>, vector<4x256xf32> -> vector<4x256xf32>
    %77 = arith.addf %73, %76 : vector<4x256xf32>
    %c0_60 = arith.constant 0 : index
    %c18 = arith.constant 18 : index
    %78 = vector.load %arg12[%c0_60, %c18] : memref<4x290xf32, #tpu.memory_space<vmem>>, vector<4x256xf32>
    %c5 = arith.constant 5 : index
    %c0_61 = arith.constant 0 : index
    %c0_62 = arith.constant 0 : index
    %79 = vector.load %arg2[%c5, %c0_61, %c0_62] : memref<9x1x256xf32, #tpu.memory_space<vmem>>, vector<1x1x256xf32>
    %80 = vector.shape_cast %79 : vector<1x1x256xf32> to vector<1x256xf32>
    %81 = vector.broadcast %80 : vector<1x256xf32> to vector<4x256xf32>
    %82 = arith.mulf %78, %81 : vector<4x256xf32>
    %c5_63 = arith.constant 5 : index
    %c0_64 = arith.constant 0 : index
    %c0_65 = arith.constant 0 : index
    %83 = vector.load %arg3[%c5_63, %c0_64, %c0_65] : memref<9x4x4xf32, #tpu.memory_space<vmem>>, vector<1x4x4xf32>
    %84 = vector.shape_cast %83 : vector<1x4x4xf32> to vector<4x4xf32>
    %cst_66 = arith.constant dense<0.000000e+00> : vector<4x256xf32>
    %85 = tpu.matmul %84, %82, %cst_66 {dimension_numbers = #tpu.dot_dimension_numbers<[1], [0], [0], [1], [0, 0, 1, 1], [], []>} : vector<4x4xf32>, vector<4x256xf32>, vector<4x256xf32> -> vector<4x256xf32>
    %86 = arith.addf %77, %85 : vector<4x256xf32>
    %c0_67 = arith.constant 0 : index
    %c32 = arith.constant 32 : index
    %87 = vector.load %arg12[%c0_67, %c32] : memref<4x290xf32, #tpu.memory_space<vmem>>, vector<4x256xf32>
    %c6 = arith.constant 6 : index
    %c0_68 = arith.constant 0 : index
    %c0_69 = arith.constant 0 : index
    %88 = vector.load %arg2[%c6, %c0_68, %c0_69] : memref<9x1x256xf32, #tpu.memory_space<vmem>>, vector<1x1x256xf32>
    %89 = vector.shape_cast %88 : vector<1x1x256xf32> to vector<1x256xf32>
    %90 = vector.broadcast %89 : vector<1x256xf32> to vector<4x256xf32>
    %91 = arith.mulf %87, %90 : vector<4x256xf32>
    %c6_70 = arith.constant 6 : index
    %c0_71 = arith.constant 0 : index
    %c0_72 = arith.constant 0 : index
    %92 = vector.load %arg3[%c6_70, %c0_71, %c0_72] : memref<9x4x4xf32, #tpu.memory_space<vmem>>, vector<1x4x4xf32>
    %93 = vector.shape_cast %92 : vector<1x4x4xf32> to vector<4x4xf32>
    %cst_73 = arith.constant dense<0.000000e+00> : vector<4x256xf32>
    %94 = tpu.matmul %93, %91, %cst_73 {dimension_numbers = #tpu.dot_dimension_numbers<[1], [0], [0], [1], [0, 0, 1, 1], [], []>} : vector<4x4xf32>, vector<4x256xf32>, vector<4x256xf32> -> vector<4x256xf32>
    %95 = arith.addf %86, %94 : vector<4x256xf32>
    %c0_74 = arith.constant 0 : index
    %c33 = arith.constant 33 : index
    %96 = vector.load %arg12[%c0_74, %c33] : memref<4x290xf32, #tpu.memory_space<vmem>>, vector<4x256xf32>
    %c7 = arith.constant 7 : index
    %c0_75 = arith.constant 0 : index
    %c0_76 = arith.constant 0 : index
    %97 = vector.load %arg2[%c7, %c0_75, %c0_76] : memref<9x1x256xf32, #tpu.memory_space<vmem>>, vector<1x1x256xf32>
    %98 = vector.shape_cast %97 : vector<1x1x256xf32> to vector<1x256xf32>
    %99 = vector.broadcast %98 : vector<1x256xf32> to vector<4x256xf32>
    %100 = arith.mulf %96, %99 : vector<4x256xf32>
    %c7_77 = arith.constant 7 : index
    %c0_78 = arith.constant 0 : index
    %c0_79 = arith.constant 0 : index
    %101 = vector.load %arg3[%c7_77, %c0_78, %c0_79] : memref<9x4x4xf32, #tpu.memory_space<vmem>>, vector<1x4x4xf32>
    %102 = vector.shape_cast %101 : vector<1x4x4xf32> to vector<4x4xf32>
    %cst_80 = arith.constant dense<0.000000e+00> : vector<4x256xf32>
    %103 = tpu.matmul %102, %100, %cst_80 {dimension_numbers = #tpu.dot_dimension_numbers<[1], [0], [0], [1], [0, 0, 1, 1], [], []>} : vector<4x4xf32>, vector<4x256xf32>, vector<4x256xf32> -> vector<4x256xf32>
    %104 = arith.addf %95, %103 : vector<4x256xf32>
    %c0_81 = arith.constant 0 : index
    %c34 = arith.constant 34 : index
    %105 = vector.load %arg12[%c0_81, %c34] : memref<4x290xf32, #tpu.memory_space<vmem>>, vector<4x256xf32>
    %c8 = arith.constant 8 : index
    %c0_82 = arith.constant 0 : index
    %c0_83 = arith.constant 0 : index
    %106 = vector.load %arg2[%c8, %c0_82, %c0_83] : memref<9x1x256xf32, #tpu.memory_space<vmem>>, vector<1x1x256xf32>
    %107 = vector.shape_cast %106 : vector<1x1x256xf32> to vector<1x256xf32>
    %108 = vector.broadcast %107 : vector<1x256xf32> to vector<4x256xf32>
    %109 = arith.mulf %105, %108 : vector<4x256xf32>
    %c8_84 = arith.constant 8 : index
    %c0_85 = arith.constant 0 : index
    %c0_86 = arith.constant 0 : index
    %110 = vector.load %arg3[%c8_84, %c0_85, %c0_86] : memref<9x4x4xf32, #tpu.memory_space<vmem>>, vector<1x4x4xf32>
    %111 = vector.shape_cast %110 : vector<1x4x4xf32> to vector<4x4xf32>
    %cst_87 = arith.constant dense<0.000000e+00> : vector<4x256xf32>
    %112 = tpu.matmul %111, %109, %cst_87 {dimension_numbers = #tpu.dot_dimension_numbers<[1], [0], [0], [1], [0, 0, 1, 1], [], []>} : vector<4x4xf32>, vector<4x256xf32>, vector<4x256xf32> -> vector<4x256xf32>
    %113 = arith.addf %104, %112 : vector<4x256xf32>
    %114 = vector.broadcast %6 : vector<4x1xf32> to vector<4x256xf32>
    %115 = arith.addf %113, %114 : vector<4x256xf32>
    %cst_88 = arith.constant dense<0.000000e+00> : vector<4xf32>
    %116 = vector.multi_reduction <add>, %115, %cst_88 [1] : vector<4x256xf32> to vector<4xf32>
    %117 = vector.shape_cast %116 : vector<4xf32> to vector<4x1xf32>
    %cst_89 = arith.constant 2.560000e+02 : f32
    %118 = vector.broadcast %cst_89 : f32 to vector<4x1xf32>
    %119 = arith.divf %117, %118 : vector<4x1xf32>
    %120 = arith.mulf %115, %115 : vector<4x256xf32>
    %cst_90 = arith.constant dense<0.000000e+00> : vector<4xf32>
    %121 = vector.multi_reduction <add>, %120, %cst_90 [1] : vector<4x256xf32> to vector<4xf32>
    %122 = vector.shape_cast %121 : vector<4xf32> to vector<4x1xf32>
    %cst_91 = arith.constant 2.560000e+02 : f32
    %123 = vector.broadcast %cst_91 : f32 to vector<4x1xf32>
    %124 = arith.divf %122, %123 : vector<4x1xf32>
    %125 = arith.mulf %119, %119 : vector<4x1xf32>
    %126 = arith.subf %124, %125 : vector<4x1xf32>
    %cst_92 = arith.constant 0.000000e+00 : f32
    %127 = vector.broadcast %cst_92 : f32 to vector<4x1xf32>
    %128 = arith.maximumf %126, %127 : vector<4x1xf32>
    %129 = vector.broadcast %119 : vector<4x1xf32> to vector<4x256xf32>
    %130 = arith.subf %115, %129 : vector<4x256xf32>
    %cst_93 = arith.constant 9.99999974E-6 : f32
    %131 = vector.broadcast %cst_93 : f32 to vector<4x1xf32>
    %132 = arith.addf %128, %131 : vector<4x1xf32>
    %133 = math.rsqrt %132 : vector<4x1xf32>
    %134 = vector.broadcast %133 : vector<4x1xf32> to vector<4x256xf32>
    %135 = arith.mulf %130, %134 : vector<4x256xf32>
    %136 = vector.broadcast %4 : vector<4x1xf32> to vector<4x256xf32>
    %137 = arith.mulf %135, %136 : vector<4x256xf32>
    %138 = vector.broadcast %5 : vector<4x1xf32> to vector<4x256xf32>
    %139 = arith.addf %137, %138 : vector<4x256xf32>
    %cst_94 = arith.constant 0.000000e+00 : f32
    %140 = vector.broadcast %cst_94 : f32 to vector<4x256xf32>
    %141 = arith.maximumf %139, %140 : vector<4x256xf32>
    %c0_95 = arith.constant 0 : index
    %c17_96 = arith.constant 17 : index
    %142 = vector.load %arg12[%c0_95, %c17_96] : memref<4x290xf32, #tpu.memory_space<vmem>>, vector<4x256xf32>
    tpu.vector_store %arg12[%c0_95, %c17_96], %141 {strides = array<i32>} : memref<4x290xf32, #tpu.memory_space<vmem>>, vector<4x256xf32>,
    %cst_97 = arith.constant 0.000000e+00 : f32
    %143 = vector.broadcast %cst_97 : f32 to vector<4x256xf32>
    %c0_98 = arith.constant 0 : index
    %c0_99 = arith.constant 0 : index
    %144 = vector.load %arg12[%c0_98, %c0_99] : memref<4x290xf32, #tpu.memory_space<vmem>>, vector<4x256xf32>
    %c0_100 = arith.constant 0 : index
    %c0_101 = arith.constant 0 : index
    %c0_102 = arith.constant 0 : index
    %145 = vector.load %arg2[%c0_100, %c0_101, %c0_102] : memref<9x1x256xf32, #tpu.memory_space<vmem>>, vector<1x1x256xf32>
    %146 = vector.shape_cast %145 : vector<1x1x256xf32> to vector<1x256xf32>
    %147 = vector.broadcast %146 : vector<1x256xf32> to vector<4x256xf32>
    %148 = arith.mulf %144, %147 : vector<4x256xf32>
    %c0_103 = arith.constant 0 : index
    %c0_104 = arith.constant 0 : index
    %c0_105 = arith.constant 0 : index
    %149 = vector.load %arg7[%c0_103, %c0_104, %c0_105] : memref<9x4x4xf32, #tpu.memory_space<vmem>>, vector<1x4x4xf32>
    %150 = vector.shape_cast %149 : vector<1x4x4xf32> to vector<4x4xf32>
    %cst_106 = arith.constant dense<0.000000e+00> : vector<4x256xf32>
    %151 = tpu.matmul %150, %148, %cst_106 {dimension_numbers = #tpu.dot_dimension_numbers<[1], [0], [0], [1], [0, 0, 1, 1], [], []>} : vector<4x4xf32>, vector<4x256xf32>, vector<4x256xf32> -> vector<4x256xf32>
    %152 = arith.addf %143, %151 : vector<4x256xf32>
    %c0_107 = arith.constant 0 : index
    %c1_108 = arith.constant 1 : index
    %153 = vector.load %arg12[%c0_107, %c1_108] : memref<4x290xf32, #tpu.memory_space<vmem>>, vector<4x256xf32>
    %c1_109 = arith.constant 1 : index
    %c0_110 = arith.constant 0 : index
    %c0_111 = arith.constant 0 : index
    %154 = vector.load %arg2[%c1_109, %c0_110, %c0_111] : memref<9x1x256xf32, #tpu.memory_space<vmem>>, vector<1x1x256xf32>
    %155 = vector.shape_cast %154 : vector<1x1x256xf32> to vector<1x256xf32>
    %156 = vector.broadcast %155 : vector<1x256xf32> to vector<4x256xf32>
    %157 = arith.mulf %153, %156 : vector<4x256xf32>
    %c1_112 = arith.constant 1 : index
    %c0_113 = arith.constant 0 : index
    %c0_114 = arith.constant 0 : index
    %158 = vector.load %arg7[%c1_112, %c0_113, %c0_114] : memref<9x4x4xf32, #tpu.memory_space<vmem>>, vector<1x4x4xf32>
    %159 = vector.shape_cast %158 : vector<1x4x4xf32> to vector<4x4xf32>
    %cst_115 = arith.constant dense<0.000000e+00> : vector<4x256xf32>
    %160 = tpu.matmul %159, %157, %cst_115 {dimension_numbers = #tpu.dot_dimension_numbers<[1], [0], [0], [1], [0, 0, 1, 1], [], []>} : vector<4x4xf32>, vector<4x256xf32>, vector<4x256xf32> -> vector<4x256xf32>
    %161 = arith.addf %152, %160 : vector<4x256xf32>
    %c0_116 = arith.constant 0 : index
    %c2_117 = arith.constant 2 : index
    %162 = vector.load %arg12[%c0_116, %c2_117] : memref<4x290xf32, #tpu.memory_space<vmem>>, vector<4x256xf32>
    %c2_118 = arith.constant 2 : index
    %c0_119 = arith.constant 0 : index
    %c0_120 = arith.constant 0 : index
    %163 = vector.load %arg2[%c2_118, %c0_119, %c0_120] : memref<9x1x256xf32, #tpu.memory_space<vmem>>, vector<1x1x256xf32>
    %164 = vector.shape_cast %163 : vector<1x1x256xf32> to vector<1x256xf32>
    %165 = vector.broadcast %164 : vector<1x256xf32> to vector<4x256xf32>
    %166 = arith.mulf %162, %165 : vector<4x256xf32>
    %c2_121 = arith.constant 2 : index
    %c0_122 = arith.constant 0 : index
    %c0_123 = arith.constant 0 : index
    %167 = vector.load %arg7[%c2_121, %c0_122, %c0_123] : memref<9x4x4xf32, #tpu.memory_space<vmem>>, vector<1x4x4xf32>
    %168 = vector.shape_cast %167 : vector<1x4x4xf32> to vector<4x4xf32>
    %cst_124 = arith.constant dense<0.000000e+00> : vector<4x256xf32>
    %169 = tpu.matmul %168, %166, %cst_124 {dimension_numbers = #tpu.dot_dimension_numbers<[1], [0], [0], [1], [0, 0, 1, 1], [], []>} : vector<4x4xf32>, vector<4x256xf32>, vector<4x256xf32> -> vector<4x256xf32>
    %170 = arith.addf %161, %169 : vector<4x256xf32>
    %c0_125 = arith.constant 0 : index
    %c16_126 = arith.constant 16 : index
    %171 = vector.load %arg12[%c0_125, %c16_126] : memref<4x290xf32, #tpu.memory_space<vmem>>, vector<4x256xf32>
    %c3_127 = arith.constant 3 : index
    %c0_128 = arith.constant 0 : index
    %c0_129 = arith.constant 0 : index
    %172 = vector.load %arg2[%c3_127, %c0_128, %c0_129] : memref<9x1x256xf32, #tpu.memory_space<vmem>>, vector<1x1x256xf32>
    %173 = vector.shape_cast %172 : vector<1x1x256xf32> to vector<1x256xf32>
    %174 = vector.broadcast %173 : vector<1x256xf32> to vector<4x256xf32>
    %175 = arith.mulf %171, %174 : vector<4x256xf32>
    %c3_130 = arith.constant 3 : index
    %c0_131 = arith.constant 0 : index
    %c0_132 = arith.constant 0 : index
    %176 = vector.load %arg7[%c3_130, %c0_131, %c0_132] : memref<9x4x4xf32, #tpu.memory_space<vmem>>, vector<1x4x4xf32>
    %177 = vector.shape_cast %176 : vector<1x4x4xf32> to vector<4x4xf32>
    %cst_133 = arith.constant dense<0.000000e+00> : vector<4x256xf32>
    %178 = tpu.matmul %177, %175, %cst_133 {dimension_numbers = #tpu.dot_dimension_numbers<[1], [0], [0], [1], [0, 0, 1, 1], [], []>} : vector<4x4xf32>, vector<4x256xf32>, vector<4x256xf32> -> vector<4x256xf32>
    %179 = arith.addf %170, %178 : vector<4x256xf32>
    %c4_134 = arith.constant 4 : index
    %c0_135 = arith.constant 0 : index
    %c0_136 = arith.constant 0 : index
    %180 = vector.load %arg7[%c4_134, %c0_135, %c0_136] : memref<9x4x4xf32, #tpu.memory_space<vmem>>, vector<1x4x4xf32>
    %181 = vector.shape_cast %180 : vector<1x4x4xf32> to vector<4x4xf32>
    %cst_137 = arith.constant dense<0.000000e+00> : vector<4x256xf32>
    %182 = tpu.matmul %181, %141, %cst_137 {dimension_numbers = #tpu.dot_dimension_numbers<[1], [0], [0], [1], [0, 0, 1, 1], [], []>} : vector<4x4xf32>, vector<4x256xf32>, vector<4x256xf32> -> vector<4x256xf32>
    %183 = arith.addf %179, %182 : vector<4x256xf32>
    %c0_138 = arith.constant 0 : index
    %c18_139 = arith.constant 18 : index
    %184 = vector.load %arg12[%c0_138, %c18_139] : memref<4x290xf32, #tpu.memory_space<vmem>>, vector<4x256xf32>
    %c5_140 = arith.constant 5 : index
    %c0_141 = arith.constant 0 : index
    %c0_142 = arith.constant 0 : index
    %185 = vector.load %arg2[%c5_140, %c0_141, %c0_142] : memref<9x1x256xf32, #tpu.memory_space<vmem>>, vector<1x1x256xf32>
    %186 = vector.shape_cast %185 : vector<1x1x256xf32> to vector<1x256xf32>
    %187 = vector.broadcast %186 : vector<1x256xf32> to vector<4x256xf32>
    %188 = arith.mulf %184, %187 : vector<4x256xf32>
    %c5_143 = arith.constant 5 : index
    %c0_144 = arith.constant 0 : index
    %c0_145 = arith.constant 0 : index
    %189 = vector.load %arg7[%c5_143, %c0_144, %c0_145] : memref<9x4x4xf32, #tpu.memory_space<vmem>>, vector<1x4x4xf32>
    %190 = vector.shape_cast %189 : vector<1x4x4xf32> to vector<4x4xf32>
    %cst_146 = arith.constant dense<0.000000e+00> : vector<4x256xf32>
    %191 = tpu.matmul %190, %188, %cst_146 {dimension_numbers = #tpu.dot_dimension_numbers<[1], [0], [0], [1], [0, 0, 1, 1], [], []>} : vector<4x4xf32>, vector<4x256xf32>, vector<4x256xf32> -> vector<4x256xf32>
    %192 = arith.addf %183, %191 : vector<4x256xf32>
    %c0_147 = arith.constant 0 : index
    %c32_148 = arith.constant 32 : index
    %193 = vector.load %arg12[%c0_147, %c32_148] : memref<4x290xf32, #tpu.memory_space<vmem>>, vector<4x256xf32>
    %c6_149 = arith.constant 6 : index
    %c0_150 = arith.constant 0 : index
    %c0_151 = arith.constant 0 : index
    %194 = vector.load %arg2[%c6_149, %c0_150, %c0_151] : memref<9x1x256xf32, #tpu.memory_space<vmem>>, vector<1x1x256xf32>
    %195 = vector.shape_cast %194 : vector<1x1x256xf32> to vector<1x256xf32>
    %196 = vector.broadcast %195 : vector<1x256xf32> to vector<4x256xf32>
    %197 = arith.mulf %193, %196 : vector<4x256xf32>
    %c6_152 = arith.constant 6 : index
    %c0_153 = arith.constant 0 : index
    %c0_154 = arith.constant 0 : index
    %198 = vector.load %arg7[%c6_152, %c0_153, %c0_154] : memref<9x4x4xf32, #tpu.memory_space<vmem>>, vector<1x4x4xf32>
    %199 = vector.shape_cast %198 : vector<1x4x4xf32> to vector<4x4xf32>
    %cst_155 = arith.constant dense<0.000000e+00> : vector<4x256xf32>
    %200 = tpu.matmul %199, %197, %cst_155 {dimension_numbers = #tpu.dot_dimension_numbers<[1], [0], [0], [1], [0, 0, 1, 1], [], []>} : vector<4x4xf32>, vector<4x256xf32>, vector<4x256xf32> -> vector<4x256xf32>
    %201 = arith.addf %192, %200 : vector<4x256xf32>
    %c0_156 = arith.constant 0 : index
    %c33_157 = arith.constant 33 : index
    %202 = vector.load %arg12[%c0_156, %c33_157] : memref<4x290xf32, #tpu.memory_space<vmem>>, vector<4x256xf32>
    %c7_158 = arith.constant 7 : index
    %c0_159 = arith.constant 0 : index
    %c0_160 = arith.constant 0 : index
    %203 = vector.load %arg2[%c7_158, %c0_159, %c0_160] : memref<9x1x256xf32, #tpu.memory_space<vmem>>, vector<1x1x256xf32>
    %204 = vector.shape_cast %203 : vector<1x1x256xf32> to vector<1x256xf32>
    %205 = vector.broadcast %204 : vector<1x256xf32> to vector<4x256xf32>
    %206 = arith.mulf %202, %205 : vector<4x256xf32>
    %c7_161 = arith.constant 7 : index
    %c0_162 = arith.constant 0 : index
    %c0_163 = arith.constant 0 : index
    %207 = vector.load %arg7[%c7_161, %c0_162, %c0_163] : memref<9x4x4xf32, #tpu.memory_space<vmem>>, vector<1x4x4xf32>
    %208 = vector.shape_cast %207 : vector<1x4x4xf32> to vector<4x4xf32>
    %cst_164 = arith.constant dense<0.000000e+00> : vector<4x256xf32>
    %209 = tpu.matmul %208, %206, %cst_164 {dimension_numbers = #tpu.dot_dimension_numbers<[1], [0], [0], [1], [0, 0, 1, 1], [], []>} : vector<4x4xf32>, vector<4x256xf32>, vector<4x256xf32> -> vector<4x256xf32>
    %210 = arith.addf %201, %209 : vector<4x256xf32>
    %c0_165 = arith.constant 0 : index
    %c34_166 = arith.constant 34 : index
    %211 = vector.load %arg12[%c0_165, %c34_166] : memref<4x290xf32, #tpu.memory_space<vmem>>, vector<4x256xf32>
    %c8_167 = arith.constant 8 : index
    %c0_168 = arith.constant 0 : index
    %c0_169 = arith.constant 0 : index
    %212 = vector.load %arg2[%c8_167, %c0_168, %c0_169] : memref<9x1x256xf32, #tpu.memory_space<vmem>>, vector<1x1x256xf32>
    %213 = vector.shape_cast %212 : vector<1x1x256xf32> to vector<1x256xf32>
    %214 = vector.broadcast %213 : vector<1x256xf32> to vector<4x256xf32>
    %215 = arith.mulf %211, %214 : vector<4x256xf32>
    %c8_170 = arith.constant 8 : index
    %c0_171 = arith.constant 0 : index
    %c0_172 = arith.constant 0 : index
    %216 = vector.load %arg7[%c8_170, %c0_171, %c0_172] : memref<9x4x4xf32, #tpu.memory_space<vmem>>, vector<1x4x4xf32>
    %217 = vector.shape_cast %216 : vector<1x4x4xf32> to vector<4x4xf32>
    %cst_173 = arith.constant dense<0.000000e+00> : vector<4x256xf32>
    %218 = tpu.matmul %217, %215, %cst_173 {dimension_numbers = #tpu.dot_dimension_numbers<[1], [0], [0], [1], [0, 0, 1, 1], [], []>} : vector<4x4xf32>, vector<4x256xf32>, vector<4x256xf32> -> vector<4x256xf32>
    %219 = arith.addf %210, %218 : vector<4x256xf32>
    %220 = vector.broadcast %7 : vector<4x1xf32> to vector<4x256xf32>
    %221 = arith.addf %219, %220 : vector<4x256xf32>
    %222 = arith.addf %221, %9 : vector<4x256xf32>
    %c0_174 = arith.constant 0 : index
    %c0_175 = arith.constant 0 : index
    %c0_176 = arith.constant 0 : index
    %223 = vector.load %arg11[%c0_174, %c0_175, %c0_176] : memref<2x4x256xf32, #tpu.memory_space<vmem>>, vector<1x4x256xf32>
    %224 = vector.shape_cast %223 : vector<1x4x256xf32> to vector<4x256xf32>
    %225 = vector.shape_cast %222 : vector<4x256xf32> to vector<1x4x256xf32>
    tpu.vector_store %arg11[%c0_174, %c0_175, %c0_176], %225 {strides = array<i32>} : memref<2x4x256xf32, #tpu.memory_space<vmem>>, vector<1x4x256xf32>,
    %c1_177 = arith.constant 1 : index
    %c0_178 = arith.constant 0 : index
    %c0_179 = arith.constant 0 : index
    %226 = vector.load %arg1[%c1_177, %c0_178, %c0_179] : memref<2x4x256xf32, #tpu.memory_space<vmem>>, vector<1x4x256xf32>
    %227 = vector.shape_cast %226 : vector<1x4x256xf32> to vector<4x256xf32>
    %cst_180 = arith.constant dense<0.000000e+00> : vector<4xf32>
    %228 = vector.multi_reduction <add>, %227, %cst_180 [1] : vector<4x256xf32> to vector<4xf32>
    %229 = vector.shape_cast %228 : vector<4xf32> to vector<4x1xf32>
    %cst_181 = arith.constant 2.560000e+02 : f32
    %230 = vector.broadcast %cst_181 : f32 to vector<4x1xf32>
    %231 = arith.divf %229, %230 : vector<4x1xf32>
    %232 = arith.mulf %227, %227 : vector<4x256xf32>
    %cst_182 = arith.constant dense<0.000000e+00> : vector<4xf32>
    %233 = vector.multi_reduction <add>, %232, %cst_182 [1] : vector<4x256xf32> to vector<4xf32>
    %234 = vector.shape_cast %233 : vector<4xf32> to vector<4x1xf32>
    %cst_183 = arith.constant 2.560000e+02 : f32
    %235 = vector.broadcast %cst_183 : f32 to vector<4x1xf32>
    %236 = arith.divf %234, %235 : vector<4x1xf32>
    %237 = arith.mulf %231, %231 : vector<4x1xf32>
    %238 = arith.subf %236, %237 : vector<4x1xf32>
    %cst_184 = arith.constant 0.000000e+00 : f32
    %239 = vector.broadcast %cst_184 : f32 to vector<4x1xf32>
    %240 = arith.maximumf %238, %239 : vector<4x1xf32>
    %241 = vector.broadcast %231 : vector<4x1xf32> to vector<4x256xf32>
    %242 = arith.subf %227, %241 : vector<4x256xf32>
    %cst_185 = arith.constant 9.99999974E-6 : f32
    %243 = vector.broadcast %cst_185 : f32 to vector<4x1xf32>
    %244 = arith.addf %240, %243 : vector<4x1xf32>
    %245 = math.rsqrt %244 : vector<4x1xf32>
    %246 = vector.broadcast %245 : vector<4x1xf32> to vector<4x256xf32>
    %247 = arith.mulf %242, %246 : vector<4x256xf32>
    %248 = vector.broadcast %2 : vector<4x1xf32> to vector<4x256xf32>
    %249 = arith.mulf %247, %248 : vector<4x256xf32>
    %250 = vector.broadcast %3 : vector<4x1xf32> to vector<4x256xf32>
    %251 = arith.addf %249, %250 : vector<4x256xf32>
    %cst_186 = arith.constant 0.000000e+00 : f32
    %252 = vector.broadcast %cst_186 : f32 to vector<4x256xf32>
    %253 = arith.maximumf %251, %252 : vector<4x256xf32>
    %c0_187 = arith.constant 0 : index
    %c17_188 = arith.constant 17 : index
    %254 = vector.load %arg12[%c0_187, %c17_188] : memref<4x290xf32, #tpu.memory_space<vmem>>, vector<4x256xf32>
    tpu.vector_store %arg12[%c0_187, %c17_188], %253 {strides = array<i32>} : memref<4x290xf32, #tpu.memory_space<vmem>>, vector<4x256xf32>,
    %cst_189 = arith.constant 0.000000e+00 : f32
    %255 = vector.broadcast %cst_189 : f32 to vector<4x256xf32>
    %c0_190 = arith.constant 0 : index
    %c0_191 = arith.constant 0 : index
    %256 = vector.load %arg12[%c0_190, %c0_191] : memref<4x290xf32, #tpu.memory_space<vmem>>, vector<4x256xf32>
    %c0_192 = arith.constant 0 : index
    %c0_193 = arith.constant 0 : index
    %c0_194 = arith.constant 0 : index
    %257 = vector.load %arg2[%c0_192, %c0_193, %c0_194] : memref<9x1x256xf32, #tpu.memory_space<vmem>>, vector<1x1x256xf32>
    %258 = vector.shape_cast %257 : vector<1x1x256xf32> to vector<1x256xf32>
    %259 = vector.broadcast %258 : vector<1x256xf32> to vector<4x256xf32>
    %260 = arith.mulf %256, %259 : vector<4x256xf32>
    %c0_195 = arith.constant 0 : index
    %c0_196 = arith.constant 0 : index
    %c0_197 = arith.constant 0 : index
    %261 = vector.load %arg3[%c0_195, %c0_196, %c0_197] : memref<9x4x4xf32, #tpu.memory_space<vmem>>, vector<1x4x4xf32>
    %262 = vector.shape_cast %261 : vector<1x4x4xf32> to vector<4x4xf32>
    %cst_198 = arith.constant dense<0.000000e+00> : vector<4x256xf32>
    %263 = tpu.matmul %262, %260, %cst_198 {dimension_numbers = #tpu.dot_dimension_numbers<[1], [0], [0], [1], [0, 0, 1, 1], [], []>} : vector<4x4xf32>, vector<4x256xf32>, vector<4x256xf32> -> vector<4x256xf32>
    %264 = arith.addf %255, %263 : vector<4x256xf32>
    %c0_199 = arith.constant 0 : index
    %c1_200 = arith.constant 1 : index
    %265 = vector.load %arg12[%c0_199, %c1_200] : memref<4x290xf32, #tpu.memory_space<vmem>>, vector<4x256xf32>
    %c1_201 = arith.constant 1 : index
    %c0_202 = arith.constant 0 : index
    %c0_203 = arith.constant 0 : index
    %266 = vector.load %arg2[%c1_201, %c0_202, %c0_203] : memref<9x1x256xf32, #tpu.memory_space<vmem>>, vector<1x1x256xf32>
    %267 = vector.shape_cast %266 : vector<1x1x256xf32> to vector<1x256xf32>
    %268 = vector.broadcast %267 : vector<1x256xf32> to vector<4x256xf32>
    %269 = arith.mulf %265, %268 : vector<4x256xf32>
    %c1_204 = arith.constant 1 : index
    %c0_205 = arith.constant 0 : index
    %c0_206 = arith.constant 0 : index
    %270 = vector.load %arg3[%c1_204, %c0_205, %c0_206] : memref<9x4x4xf32, #tpu.memory_space<vmem>>, vector<1x4x4xf32>
    %271 = vector.shape_cast %270 : vector<1x4x4xf32> to vector<4x4xf32>
    %cst_207 = arith.constant dense<0.000000e+00> : vector<4x256xf32>
    %272 = tpu.matmul %271, %269, %cst_207 {dimension_numbers = #tpu.dot_dimension_numbers<[1], [0], [0], [1], [0, 0, 1, 1], [], []>} : vector<4x4xf32>, vector<4x256xf32>, vector<4x256xf32> -> vector<4x256xf32>
    %273 = arith.addf %264, %272 : vector<4x256xf32>
    %c0_208 = arith.constant 0 : index
    %c2_209 = arith.constant 2 : index
    %274 = vector.load %arg12[%c0_208, %c2_209] : memref<4x290xf32, #tpu.memory_space<vmem>>, vector<4x256xf32>
    %c2_210 = arith.constant 2 : index
    %c0_211 = arith.constant 0 : index
    %c0_212 = arith.constant 0 : index
    %275 = vector.load %arg2[%c2_210, %c0_211, %c0_212] : memref<9x1x256xf32, #tpu.memory_space<vmem>>, vector<1x1x256xf32>
    %276 = vector.shape_cast %275 : vector<1x1x256xf32> to vector<1x256xf32>
    %277 = vector.broadcast %276 : vector<1x256xf32> to vector<4x256xf32>
    %278 = arith.mulf %274, %277 : vector<4x256xf32>
    %c2_213 = arith.constant 2 : index
    %c0_214 = arith.constant 0 : index
    %c0_215 = arith.constant 0 : index
    %279 = vector.load %arg3[%c2_213, %c0_214, %c0_215] : memref<9x4x4xf32, #tpu.memory_space<vmem>>, vector<1x4x4xf32>
    %280 = vector.shape_cast %279 : vector<1x4x4xf32> to vector<4x4xf32>
    %cst_216 = arith.constant dense<0.000000e+00> : vector<4x256xf32>
    %281 = tpu.matmul %280, %278, %cst_216 {dimension_numbers = #tpu.dot_dimension_numbers<[1], [0], [0], [1], [0, 0, 1, 1], [], []>} : vector<4x4xf32>, vector<4x256xf32>, vector<4x256xf32> -> vector<4x256xf32>
    %282 = arith.addf %273, %281 : vector<4x256xf32>
    %c0_217 = arith.constant 0 : index
    %c16_218 = arith.constant 16 : index
    %283 = vector.load %arg12[%c0_217, %c16_218] : memref<4x290xf32, #tpu.memory_space<vmem>>, vector<4x256xf32>
    %c3_219 = arith.constant 3 : index
    %c0_220 = arith.constant 0 : index
    %c0_221 = arith.constant 0 : index
    %284 = vector.load %arg2[%c3_219, %c0_220, %c0_221] : memref<9x1x256xf32, #tpu.memory_space<vmem>>, vector<1x1x256xf32>
    %285 = vector.shape_cast %284 : vector<1x1x256xf32> to vector<1x256xf32>
    %286 = vector.broadcast %285 : vector<1x256xf32> to vector<4x256xf32>
    %287 = arith.mulf %283, %286 : vector<4x256xf32>
    %c3_222 = arith.constant 3 : index
    %c0_223 = arith.constant 0 : index
    %c0_224 = arith.constant 0 : index
    %288 = vector.load %arg3[%c3_222, %c0_223, %c0_224] : memref<9x4x4xf32, #tpu.memory_space<vmem>>, vector<1x4x4xf32>
    %289 = vector.shape_cast %288 : vector<1x4x4xf32> to vector<4x4xf32>
    %cst_225 = arith.constant dense<0.000000e+00> : vector<4x256xf32>
    %290 = tpu.matmul %289, %287, %cst_225 {dimension_numbers = #tpu.dot_dimension_numbers<[1], [0], [0], [1], [0, 0, 1, 1], [], []>} : vector<4x4xf32>, vector<4x256xf32>, vector<4x256xf32> -> vector<4x256xf32>
    %291 = arith.addf %282, %290 : vector<4x256xf32>
    %c4_226 = arith.constant 4 : index
    %c0_227 = arith.constant 0 : index
    %c0_228 = arith.constant 0 : index
    %292 = vector.load %arg3[%c4_226, %c0_227, %c0_228] : memref<9x4x4xf32, #tpu.memory_space<vmem>>, vector<1x4x4xf32>
    %293 = vector.shape_cast %292 : vector<1x4x4xf32> to vector<4x4xf32>
    %cst_229 = arith.constant dense<0.000000e+00> : vector<4x256xf32>
    %294 = tpu.matmul %293, %253, %cst_229 {dimension_numbers = #tpu.dot_dimension_numbers<[1], [0], [0], [1], [0, 0, 1, 1], [], []>} : vector<4x4xf32>, vector<4x256xf32>, vector<4x256xf32> -> vector<4x256xf32>
    %295 = arith.addf %291, %294 : vector<4x256xf32>
    %c0_230 = arith.constant 0 : index
    %c18_231 = arith.constant 18 : index
    %296 = vector.load %arg12[%c0_230, %c18_231] : memref<4x290xf32, #tpu.memory_space<vmem>>, vector<4x256xf32>
    %c5_232 = arith.constant 5 : index
    %c0_233 = arith.constant 0 : index
    %c0_234 = arith.constant 0 : index
    %297 = vector.load %arg2[%c5_232, %c0_233, %c0_234] : memref<9x1x256xf32, #tpu.memory_space<vmem>>, vector<1x1x256xf32>
    %298 = vector.shape_cast %297 : vector<1x1x256xf32> to vector<1x256xf32>
    %299 = vector.broadcast %298 : vector<1x256xf32> to vector<4x256xf32>
    %300 = arith.mulf %296, %299 : vector<4x256xf32>
    %c5_235 = arith.constant 5 : index
    %c0_236 = arith.constant 0 : index
    %c0_237 = arith.constant 0 : index
    %301 = vector.load %arg3[%c5_235, %c0_236, %c0_237] : memref<9x4x4xf32, #tpu.memory_space<vmem>>, vector<1x4x4xf32>
    %302 = vector.shape_cast %301 : vector<1x4x4xf32> to vector<4x4xf32>
    %cst_238 = arith.constant dense<0.000000e+00> : vector<4x256xf32>
    %303 = tpu.matmul %302, %300, %cst_238 {dimension_numbers = #tpu.dot_dimension_numbers<[1], [0], [0], [1], [0, 0, 1, 1], [], []>} : vector<4x4xf32>, vector<4x256xf32>, vector<4x256xf32> -> vector<4x256xf32>
    %304 = arith.addf %295, %303 : vector<4x256xf32>
    %c0_239 = arith.constant 0 : index
    %c32_240 = arith.constant 32 : index
    %305 = vector.load %arg12[%c0_239, %c32_240] : memref<4x290xf32, #tpu.memory_space<vmem>>, vector<4x256xf32>
    %c6_241 = arith.constant 6 : index
    %c0_242 = arith.constant 0 : index
    %c0_243 = arith.constant 0 : index
    %306 = vector.load %arg2[%c6_241, %c0_242, %c0_243] : memref<9x1x256xf32, #tpu.memory_space<vmem>>, vector<1x1x256xf32>
    %307 = vector.shape_cast %306 : vector<1x1x256xf32> to vector<1x256xf32>
    %308 = vector.broadcast %307 : vector<1x256xf32> to vector<4x256xf32>
    %309 = arith.mulf %305, %308 : vector<4x256xf32>
    %c6_244 = arith.constant 6 : index
    %c0_245 = arith.constant 0 : index
    %c0_246 = arith.constant 0 : index
    %310 = vector.load %arg3[%c6_244, %c0_245, %c0_246] : memref<9x4x4xf32, #tpu.memory_space<vmem>>, vector<1x4x4xf32>
    %311 = vector.shape_cast %310 : vector<1x4x4xf32> to vector<4x4xf32>
    %cst_247 = arith.constant dense<0.000000e+00> : vector<4x256xf32>
    %312 = tpu.matmul %311, %309, %cst_247 {dimension_numbers = #tpu.dot_dimension_numbers<[1], [0], [0], [1], [0, 0, 1, 1], [], []>} : vector<4x4xf32>, vector<4x256xf32>, vector<4x256xf32> -> vector<4x256xf32>
    %313 = arith.addf %304, %312 : vector<4x256xf32>
    %c0_248 = arith.constant 0 : index
    %c33_249 = arith.constant 33 : index
    %314 = vector.load %arg12[%c0_248, %c33_249] : memref<4x290xf32, #tpu.memory_space<vmem>>, vector<4x256xf32>
    %c7_250 = arith.constant 7 : index
    %c0_251 = arith.constant 0 : index
    %c0_252 = arith.constant 0 : index
    %315 = vector.load %arg2[%c7_250, %c0_251, %c0_252] : memref<9x1x256xf32, #tpu.memory_space<vmem>>, vector<1x1x256xf32>
    %316 = vector.shape_cast %315 : vector<1x1x256xf32> to vector<1x256xf32>
    %317 = vector.broadcast %316 : vector<1x256xf32> to vector<4x256xf32>
    %318 = arith.mulf %314, %317 : vector<4x256xf32>
    %c7_253 = arith.constant 7 : index
    %c0_254 = arith.constant 0 : index
    %c0_255 = arith.constant 0 : index
    %319 = vector.load %arg3[%c7_253, %c0_254, %c0_255] : memref<9x4x4xf32, #tpu.memory_space<vmem>>, vector<1x4x4xf32>
    %320 = vector.shape_cast %319 : vector<1x4x4xf32> to vector<4x4xf32>
    %cst_256 = arith.constant dense<0.000000e+00> : vector<4x256xf32>
    %321 = tpu.matmul %320, %318, %cst_256 {dimension_numbers = #tpu.dot_dimension_numbers<[1], [0], [0], [1], [0, 0, 1, 1], [], []>} : vector<4x4xf32>, vector<4x256xf32>, vector<4x256xf32> -> vector<4x256xf32>
    %322 = arith.addf %313, %321 : vector<4x256xf32>
    %c0_257 = arith.constant 0 : index
    %c34_258 = arith.constant 34 : index
    %323 = vector.load %arg12[%c0_257, %c34_258] : memref<4x290xf32, #tpu.memory_space<vmem>>, vector<4x256xf32>
    %c8_259 = arith.constant 8 : index
    %c0_260 = arith.constant 0 : index
    %c0_261 = arith.constant 0 : index
    %324 = vector.load %arg2[%c8_259, %c0_260, %c0_261] : memref<9x1x256xf32, #tpu.memory_space<vmem>>, vector<1x1x256xf32>
    %325 = vector.shape_cast %324 : vector<1x1x256xf32> to vector<1x256xf32>
    %326 = vector.broadcast %325 : vector<1x256xf32> to vector<4x256xf32>
    %327 = arith.mulf %323, %326 : vector<4x256xf32>
    %c8_262 = arith.constant 8 : index
    %c0_263 = arith.constant 0 : index
    %c0_264 = arith.constant 0 : index
    %328 = vector.load %arg3[%c8_262, %c0_263, %c0_264] : memref<9x4x4xf32, #tpu.memory_space<vmem>>, vector<1x4x4xf32>
    %329 = vector.shape_cast %328 : vector<1x4x4xf32> to vector<4x4xf32>
    %cst_265 = arith.constant dense<0.000000e+00> : vector<4x256xf32>
    %330 = tpu.matmul %329, %327, %cst_265 {dimension_numbers = #tpu.dot_dimension_numbers<[1], [0], [0], [1], [0, 0, 1, 1], [], []>} : vector<4x4xf32>, vector<4x256xf32>, vector<4x256xf32> -> vector<4x256xf32>
    %331 = arith.addf %322, %330 : vector<4x256xf32>
    %332 = vector.broadcast %6 : vector<4x1xf32> to vector<4x256xf32>
    %333 = arith.addf %331, %332 : vector<4x256xf32>
    %cst_266 = arith.constant dense<0.000000e+00> : vector<4xf32>
    %334 = vector.multi_reduction <add>, %333, %cst_266 [1] : vector<4x256xf32> to vector<4xf32>
    %335 = vector.shape_cast %334 : vector<4xf32> to vector<4x1xf32>
    %cst_267 = arith.constant 2.560000e+02 : f32
    %336 = vector.broadcast %cst_267 : f32 to vector<4x1xf32>
    %337 = arith.divf %335, %336 : vector<4x1xf32>
    %338 = arith.mulf %333, %333 : vector<4x256xf32>
    %cst_268 = arith.constant dense<0.000000e+00> : vector<4xf32>
    %339 = vector.multi_reduction <add>, %338, %cst_268 [1] : vector<4x256xf32> to vector<4xf32>
    %340 = vector.shape_cast %339 : vector<4xf32> to vector<4x1xf32>
    %cst_269 = arith.constant 2.560000e+02 : f32
    %341 = vector.broadcast %cst_269 : f32 to vector<4x1xf32>
    %342 = arith.divf %340, %341 : vector<4x1xf32>
    %343 = arith.mulf %337, %337 : vector<4x1xf32>
    %344 = arith.subf %342, %343 : vector<4x1xf32>
    %cst_270 = arith.constant 0.000000e+00 : f32
    %345 = vector.broadcast %cst_270 : f32 to vector<4x1xf32>
    %346 = arith.maximumf %344, %345 : vector<4x1xf32>
    %347 = vector.broadcast %337 : vector<4x1xf32> to vector<4x256xf32>
    %348 = arith.subf %333, %347 : vector<4x256xf32>
    %cst_271 = arith.constant 9.99999974E-6 : f32
    %349 = vector.broadcast %cst_271 : f32 to vector<4x1xf32>
    %350 = arith.addf %346, %349 : vector<4x1xf32>
    %351 = math.rsqrt %350 : vector<4x1xf32>
    %352 = vector.broadcast %351 : vector<4x1xf32> to vector<4x256xf32>
    %353 = arith.mulf %348, %352 : vector<4x256xf32>
    %354 = vector.broadcast %4 : vector<4x1xf32> to vector<4x256xf32>
    %355 = arith.mulf %353, %354 : vector<4x256xf32>
    %356 = vector.broadcast %5 : vector<4x1xf32> to vector<4x256xf32>
    %357 = arith.addf %355, %356 : vector<4x256xf32>
    %cst_272 = arith.constant 0.000000e+00 : f32
    %358 = vector.broadcast %cst_272 : f32 to vector<4x256xf32>
    %359 = arith.maximumf %357, %358 : vector<4x256xf32>
    %c0_273 = arith.constant 0 : index
    %c17_274 = arith.constant 17 : index
    %360 = vector.load %arg12[%c0_273, %c17_274] : memref<4x290xf32, #tpu.memory_space<vmem>>, vector<4x256xf32>
    tpu.vector_store %arg12[%c0_273, %c17_274], %359 {strides = array<i32>} : memref<4x290xf32, #tpu.memory_space<vmem>>, vector<4x256xf32>,
    %cst_275 = arith.constant 0.000000e+00 : f32
    %361 = vector.broadcast %cst_275 : f32 to vector<4x256xf32>
    %c0_276 = arith.constant 0 : index
    %c0_277 = arith.constant 0 : index
    %362 = vector.load %arg12[%c0_276, %c0_277] : memref<4x290xf32, #tpu.memory_space<vmem>>, vector<4x256xf32>
    %c0_278 = arith.constant 0 : index
    %c0_279 = arith.constant 0 : index
    %c0_280 = arith.constant 0 : index
    %363 = vector.load %arg2[%c0_278, %c0_279, %c0_280] : memref<9x1x256xf32, #tpu.memory_space<vmem>>, vector<1x1x256xf32>
    %364 = vector.shape_cast %363 : vector<1x1x256xf32> to vector<1x256xf32>
    %365 = vector.broadcast %364 : vector<1x256xf32> to vector<4x256xf32>
    %366 = arith.mulf %362, %365 : vector<4x256xf32>
    %c0_281 = arith.constant 0 : index
    %c0_282 = arith.constant 0 : index
    %c0_283 = arith.constant 0 : index
    %367 = vector.load %arg7[%c0_281, %c0_282, %c0_283] : memref<9x4x4xf32, #tpu.memory_space<vmem>>, vector<1x4x4xf32>
    %368 = vector.shape_cast %367 : vector<1x4x4xf32> to vector<4x4xf32>
    %cst_284 = arith.constant dense<0.000000e+00> : vector<4x256xf32>
    %369 = tpu.matmul %368, %366, %cst_284 {dimension_numbers = #tpu.dot_dimension_numbers<[1], [0], [0], [1], [0, 0, 1, 1], [], []>} : vector<4x4xf32>, vector<4x256xf32>, vector<4x256xf32> -> vector<4x256xf32>
    %370 = arith.addf %361, %369 : vector<4x256xf32>
    %c0_285 = arith.constant 0 : index
    %c1_286 = arith.constant 1 : index
    %371 = vector.load %arg12[%c0_285, %c1_286] : memref<4x290xf32, #tpu.memory_space<vmem>>, vector<4x256xf32>
    %c1_287 = arith.constant 1 : index
    %c0_288 = arith.constant 0 : index
    %c0_289 = arith.constant 0 : index
    %372 = vector.load %arg2[%c1_287, %c0_288, %c0_289] : memref<9x1x256xf32, #tpu.memory_space<vmem>>, vector<1x1x256xf32>
    %373 = vector.shape_cast %372 : vector<1x1x256xf32> to vector<1x256xf32>
    %374 = vector.broadcast %373 : vector<1x256xf32> to vector<4x256xf32>
    %375 = arith.mulf %371, %374 : vector<4x256xf32>
    %c1_290 = arith.constant 1 : index
    %c0_291 = arith.constant 0 : index
    %c0_292 = arith.constant 0 : index
    %376 = vector.load %arg7[%c1_290, %c0_291, %c0_292] : memref<9x4x4xf32, #tpu.memory_space<vmem>>, vector<1x4x4xf32>
    %377 = vector.shape_cast %376 : vector<1x4x4xf32> to vector<4x4xf32>
    %cst_293 = arith.constant dense<0.000000e+00> : vector<4x256xf32>
    %378 = tpu.matmul %377, %375, %cst_293 {dimension_numbers = #tpu.dot_dimension_numbers<[1], [0], [0], [1], [0, 0, 1, 1], [], []>} : vector<4x4xf32>, vector<4x256xf32>, vector<4x256xf32> -> vector<4x256xf32>
    %379 = arith.addf %370, %378 : vector<4x256xf32>
    %c0_294 = arith.constant 0 : index
    %c2_295 = arith.constant 2 : index
    %380 = vector.load %arg12[%c0_294, %c2_295] : memref<4x290xf32, #tpu.memory_space<vmem>>, vector<4x256xf32>
    %c2_296 = arith.constant 2 : index
    %c0_297 = arith.constant 0 : index
    %c0_298 = arith.constant 0 : index
    %381 = vector.load %arg2[%c2_296, %c0_297, %c0_298] : memref<9x1x256xf32, #tpu.memory_space<vmem>>, vector<1x1x256xf32>
    %382 = vector.shape_cast %381 : vector<1x1x256xf32> to vector<1x256xf32>
    %383 = vector.broadcast %382 : vector<1x256xf32> to vector<4x256xf32>
    %384 = arith.mulf %380, %383 : vector<4x256xf32>
    %c2_299 = arith.constant 2 : index
    %c0_300 = arith.constant 0 : index
    %c0_301 = arith.constant 0 : index
    %385 = vector.load %arg7[%c2_299, %c0_300, %c0_301] : memref<9x4x4xf32, #tpu.memory_space<vmem>>, vector<1x4x4xf32>
    %386 = vector.shape_cast %385 : vector<1x4x4xf32> to vector<4x4xf32>
    %cst_302 = arith.constant dense<0.000000e+00> : vector<4x256xf32>
    %387 = tpu.matmul %386, %384, %cst_302 {dimension_numbers = #tpu.dot_dimension_numbers<[1], [0], [0], [1], [0, 0, 1, 1], [], []>} : vector<4x4xf32>, vector<4x256xf32>, vector<4x256xf32> -> vector<4x256xf32>
    %388 = arith.addf %379, %387 : vector<4x256xf32>
    %c0_303 = arith.constant 0 : index
    %c16_304 = arith.constant 16 : index
    %389 = vector.load %arg12[%c0_303, %c16_304] : memref<4x290xf32, #tpu.memory_space<vmem>>, vector<4x256xf32>
    %c3_305 = arith.constant 3 : index
    %c0_306 = arith.constant 0 : index
    %c0_307 = arith.constant 0 : index
    %390 = vector.load %arg2[%c3_305, %c0_306, %c0_307] : memref<9x1x256xf32, #tpu.memory_space<vmem>>, vector<1x1x256xf32>
    %391 = vector.shape_cast %390 : vector<1x1x256xf32> to vector<1x256xf32>
    %392 = vector.broadcast %391 : vector<1x256xf32> to vector<4x256xf32>
    %393 = arith.mulf %389, %392 : vector<4x256xf32>
    %c3_308 = arith.constant 3 : index
    %c0_309 = arith.constant 0 : index
    %c0_310 = arith.constant 0 : index
    %394 = vector.load %arg7[%c3_308, %c0_309, %c0_310] : memref<9x4x4xf32, #tpu.memory_space<vmem>>, vector<1x4x4xf32>
    %395 = vector.shape_cast %394 : vector<1x4x4xf32> to vector<4x4xf32>
    %cst_311 = arith.constant dense<0.000000e+00> : vector<4x256xf32>
    %396 = tpu.matmul %395, %393, %cst_311 {dimension_numbers = #tpu.dot_dimension_numbers<[1], [0], [0], [1], [0, 0, 1, 1], [], []>} : vector<4x4xf32>, vector<4x256xf32>, vector<4x256xf32> -> vector<4x256xf32>
    %397 = arith.addf %388, %396 : vector<4x256xf32>
    %c4_312 = arith.constant 4 : index
    %c0_313 = arith.constant 0 : index
    %c0_314 = arith.constant 0 : index
    %398 = vector.load %arg7[%c4_312, %c0_313, %c0_314] : memref<9x4x4xf32, #tpu.memory_space<vmem>>, vector<1x4x4xf32>
    %399 = vector.shape_cast %398 : vector<1x4x4xf32> to vector<4x4xf32>
    %cst_315 = arith.constant dense<0.000000e+00> : vector<4x256xf32>
    %400 = tpu.matmul %399, %359, %cst_315 {dimension_numbers = #tpu.dot_dimension_numbers<[1], [0], [0], [1], [0, 0, 1, 1], [], []>} : vector<4x4xf32>, vector<4x256xf32>, vector<4x256xf32> -> vector<4x256xf32>
    %401 = arith.addf %397, %400 : vector<4x256xf32>
    %c0_316 = arith.constant 0 : index
    %c18_317 = arith.constant 18 : index
    %402 = vector.load %arg12[%c0_316, %c18_317] : memref<4x290xf32, #tpu.memory_space<vmem>>, vector<4x256xf32>
    %c5_318 = arith.constant 5 : index
    %c0_319 = arith.constant 0 : index
    %c0_320 = arith.constant 0 : index
    %403 = vector.load %arg2[%c5_318, %c0_319, %c0_320] : memref<9x1x256xf32, #tpu.memory_space<vmem>>, vector<1x1x256xf32>
    %404 = vector.shape_cast %403 : vector<1x1x256xf32> to vector<1x256xf32>
    %405 = vector.broadcast %404 : vector<1x256xf32> to vector<4x256xf32>
    %406 = arith.mulf %402, %405 : vector<4x256xf32>
    %c5_321 = arith.constant 5 : index
    %c0_322 = arith.constant 0 : index
    %c0_323 = arith.constant 0 : index
    %407 = vector.load %arg7[%c5_321, %c0_322, %c0_323] : memref<9x4x4xf32, #tpu.memory_space<vmem>>, vector<1x4x4xf32>
    %408 = vector.shape_cast %407 : vector<1x4x4xf32> to vector<4x4xf32>
    %cst_324 = arith.constant dense<0.000000e+00> : vector<4x256xf32>
    %409 = tpu.matmul %408, %406, %cst_324 {dimension_numbers = #tpu.dot_dimension_numbers<[1], [0], [0], [1], [0, 0, 1, 1], [], []>} : vector<4x4xf32>, vector<4x256xf32>, vector<4x256xf32> -> vector<4x256xf32>
    %410 = arith.addf %401, %409 : vector<4x256xf32>
    %c0_325 = arith.constant 0 : index
    %c32_326 = arith.constant 32 : index
    %411 = vector.load %arg12[%c0_325, %c32_326] : memref<4x290xf32, #tpu.memory_space<vmem>>, vector<4x256xf32>
    %c6_327 = arith.constant 6 : index
    %c0_328 = arith.constant 0 : index
    %c0_329 = arith.constant 0 : index
    %412 = vector.load %arg2[%c6_327, %c0_328, %c0_329] : memref<9x1x256xf32, #tpu.memory_space<vmem>>, vector<1x1x256xf32>
    %413 = vector.shape_cast %412 : vector<1x1x256xf32> to vector<1x256xf32>
    %414 = vector.broadcast %413 : vector<1x256xf32> to vector<4x256xf32>
    %415 = arith.mulf %411, %414 : vector<4x256xf32>
    %c6_330 = arith.constant 6 : index
    %c0_331 = arith.constant 0 : index
    %c0_332 = arith.constant 0 : index
    %416 = vector.load %arg7[%c6_330, %c0_331, %c0_332] : memref<9x4x4xf32, #tpu.memory_space<vmem>>, vector<1x4x4xf32>
    %417 = vector.shape_cast %416 : vector<1x4x4xf32> to vector<4x4xf32>
    %cst_333 = arith.constant dense<0.000000e+00> : vector<4x256xf32>
    %418 = tpu.matmul %417, %415, %cst_333 {dimension_numbers = #tpu.dot_dimension_numbers<[1], [0], [0], [1], [0, 0, 1, 1], [], []>} : vector<4x4xf32>, vector<4x256xf32>, vector<4x256xf32> -> vector<4x256xf32>
    %419 = arith.addf %410, %418 : vector<4x256xf32>
    %c0_334 = arith.constant 0 : index
    %c33_335 = arith.constant 33 : index
    %420 = vector.load %arg12[%c0_334, %c33_335] : memref<4x290xf32, #tpu.memory_space<vmem>>, vector<4x256xf32>
    %c7_336 = arith.constant 7 : index
    %c0_337 = arith.constant 0 : index
    %c0_338 = arith.constant 0 : index
    %421 = vector.load %arg2[%c7_336, %c0_337, %c0_338] : memref<9x1x256xf32, #tpu.memory_space<vmem>>, vector<1x1x256xf32>
    %422 = vector.shape_cast %421 : vector<1x1x256xf32> to vector<1x256xf32>
    %423 = vector.broadcast %422 : vector<1x256xf32> to vector<4x256xf32>
    %424 = arith.mulf %420, %423 : vector<4x256xf32>
    %c7_339 = arith.constant 7 : index
    %c0_340 = arith.constant 0 : index
    %c0_341 = arith.constant 0 : index
    %425 = vector.load %arg7[%c7_339, %c0_340, %c0_341] : memref<9x4x4xf32, #tpu.memory_space<vmem>>, vector<1x4x4xf32>
    %426 = vector.shape_cast %425 : vector<1x4x4xf32> to vector<4x4xf32>
    %cst_342 = arith.constant dense<0.000000e+00> : vector<4x256xf32>
    %427 = tpu.matmul %426, %424, %cst_342 {dimension_numbers = #tpu.dot_dimension_numbers<[1], [0], [0], [1], [0, 0, 1, 1], [], []>} : vector<4x4xf32>, vector<4x256xf32>, vector<4x256xf32> -> vector<4x256xf32>
    %428 = arith.addf %419, %427 : vector<4x256xf32>
    %c0_343 = arith.constant 0 : index
    %c34_344 = arith.constant 34 : index
    %429 = vector.load %arg12[%c0_343, %c34_344] : memref<4x290xf32, #tpu.memory_space<vmem>>, vector<4x256xf32>
    %c8_345 = arith.constant 8 : index
    %c0_346 = arith.constant 0 : index
    %c0_347 = arith.constant 0 : index
    %430 = vector.load %arg2[%c8_345, %c0_346, %c0_347] : memref<9x1x256xf32, #tpu.memory_space<vmem>>, vector<1x1x256xf32>
    %431 = vector.shape_cast %430 : vector<1x1x256xf32> to vector<1x256xf32>
    %432 = vector.broadcast %431 : vector<1x256xf32> to vector<4x256xf32>
    %433 = arith.mulf %429, %432 : vector<4x256xf32>
    %c8_348 = arith.constant 8 : index
    %c0_349 = arith.constant 0 : index
    %c0_350 = arith.constant 0 : index
    %434 = vector.load %arg7[%c8_348, %c0_349, %c0_350] : memref<9x4x4xf32, #tpu.memory_space<vmem>>, vector<1x4x4xf32>
    %435 = vector.shape_cast %434 : vector<1x4x4xf32> to vector<4x4xf32>
    %cst_351 = arith.constant dense<0.000000e+00> : vector<4x256xf32>
    %436 = tpu.matmul %435, %433, %cst_351 {dimension_numbers = #tpu.dot_dimension_numbers<[1], [0], [0], [1], [0, 0, 1, 1], [], []>} : vector<4x4xf32>, vector<4x256xf32>, vector<4x256xf32> -> vector<4x256xf32>
    %437 = arith.addf %428, %436 : vector<4x256xf32>
    %438 = vector.broadcast %7 : vector<4x1xf32> to vector<4x256xf32>
    %439 = arith.addf %437, %438 : vector<4x256xf32>
    %440 = arith.addf %439, %227 : vector<4x256xf32>
    %c1_352 = arith.constant 1 : index
    %c0_353 = arith.constant 0 : index
    %c0_354 = arith.constant 0 : index
    %441 = vector.load %arg11[%c1_352, %c0_353, %c0_354] : memref<2x4x256xf32, #tpu.memory_space<vmem>>, vector<1x4x256xf32>
    %442 = vector.shape_cast %441 : vector<1x4x256xf32> to vector<4x256xf32>
    %443 = vector.shape_cast %440 : vector<4x256xf32> to vector<1x4x256xf32>
    tpu.vector_store %arg11[%c1_352, %c0_353, %c0_354], %443 {strides = array<i32>} : memref<2x4x256xf32, #tpu.memory_space<vmem>>, vector<1x4x256xf32>,
    return
  }
  func.func @transform_0(%arg0: i32) -> (i32, i32, i32) {
    %c0_i32 = arith.constant 0 : i32
    %c0_i32_0 = arith.constant 0 : i32
    %c0_i32_1 = arith.constant 0 : i32
    return %arg0, %c0_i32, %c0_i32_0 : i32, i32, i32
  }
  func.func @transform_1(%arg0: i32) -> (i32, i32, i32) {
    %c0_i32 = arith.constant 0 : i32
    %c0_i32_0 = arith.constant 0 : i32
    %c0_i32_1 = arith.constant 0 : i32
    %c0_i32_2 = arith.constant 0 : i32
    return %c0_i32, %c0_i32_0, %c0_i32_1 : i32, i32, i32
  }
  func.func @transform_2(%arg0: i32) -> (i32, i32, i32) {
    %c0_i32 = arith.constant 0 : i32
    %c0_i32_0 = arith.constant 0 : i32
    %c0_i32_1 = arith.constant 0 : i32
    %c0_i32_2 = arith.constant 0 : i32
    return %c0_i32, %c0_i32_0, %c0_i32_1 : i32, i32, i32
  }
  func.func @transform_3(%arg0: i32) -> (i32, i32) {
    %c0_i32 = arith.constant 0 : i32
    %c0_i32_0 = arith.constant 0 : i32
    %c0_i32_1 = arith.constant 0 : i32
    return %c0_i32, %c0_i32_0 : i32, i32
  }
  func.func @transform_4(%arg0: i32) -> (i32, i32) {
    %c0_i32 = arith.constant 0 : i32
    %c0_i32_0 = arith.constant 0 : i32
    %c0_i32_1 = arith.constant 0 : i32
    return %c0_i32, %c0_i32_0 : i32, i32
  }
  func.func @transform_5(%arg0: i32) -> (i32, i32) {
    %c0_i32 = arith.constant 0 : i32
    %c0_i32_0 = arith.constant 0 : i32
    %c0_i32_1 = arith.constant 0 : i32
    return %c0_i32, %c0_i32_0 : i32, i32
  }
  func.func @transform_6(%arg0: i32) -> (i32, i32, i32) {
    %c0_i32 = arith.constant 0 : i32
    %c0_i32_0 = arith.constant 0 : i32
    %c0_i32_1 = arith.constant 0 : i32
    %c0_i32_2 = arith.constant 0 : i32
    return %c0_i32, %c0_i32_0, %c0_i32_1 : i32, i32, i32
  }
  func.func @transform_7(%arg0: i32) -> (i32, i32) {
    %c0_i32 = arith.constant 0 : i32
    %c0_i32_0 = arith.constant 0 : i32
    %c0_i32_1 = arith.constant 0 : i32
    return %c0_i32, %c0_i32_0 : i32, i32
  }
  func.func @transform_8(%arg0: i32) -> (i32, i32) {
    %c0_i32 = arith.constant 0 : i32
    %c0_i32_0 = arith.constant 0 : i32
    %c0_i32_1 = arith.constant 0 : i32
    return %c0_i32, %c0_i32_0 : i32, i32
  }
  func.func @transform_9(%arg0: i32) -> (i32, i32) {
    %c0_i32 = arith.constant 0 : i32
    %c0_i32_0 = arith.constant 0 : i32
    %c0_i32_1 = arith.constant 0 : i32
    return %c0_i32, %c0_i32_0 : i32, i32
  }
  func.func @transform_10(%arg0: i32) -> (i32, i32, i32) {
    %c0_i32 = arith.constant 0 : i32
    %c0_i32_0 = arith.constant 0 : i32
    %c0_i32_1 = arith.constant 0 : i32
    return %arg0, %c0_i32, %c0_i32_0 : i32, i32, i32
  }
}

</mosaic_0001>

<bundles_post_ra>
// kernel: tpu_custom_call.1
= control target key start
LH: loop header
LB: loop body
LE: loop exit
PB: predicated region body
PF: predicated region fallthrough
CT: control target
= control target key end

     0   :  { %v3420_v2 = vmov 0   ;;  %s4407_s0 = inlined_call_operand.vmem [shape: f32[2,4,256], index: 0, kind: input, shape index: {}]   ;;  %s4408_s1 = inlined_call_operand.vmem [shape: f32[9,1,256], index: 1, kind: input, shape index: {}]   ;;  %s4409_s2 = inlined_call_operand.vmem [shape: f32[9,4,4], index: 2, kind: input, shape index: {}]   ;;  %s4410_s3 = inlined_call_operand.vmem [shape: f32[4,1], index: 3, kind: input, shape index: {}]   ;;  %s4411_s4 = inlined_call_operand.vmem [shape: f32[4,1], index: 4, kind: input, shape index: {}]   ;;  %s4412_s5 = inlined_call_operand.vmem [shape: f32[4,1], index: 5, kind: input, shape index: {}]   ;;  %s4413_s6 = inlined_call_operand.vmem [shape: f32[9,4,4], index: 6, kind: input, shape index: {}]   ;;  %s4414_s7 = inlined_call_operand.vmem [shape: f32[4,1], index: 7, kind: input, shape index: {}]   ;;  %s4415_s8 = inlined_call_operand.vmem [shape: f32[4,1], index: 8, kind: input, shape index: {}]   ;;  %s4416_s9 = inlined_call_operand.vmem [shape: f32[4,1], index: 9, kind: input, shape index: {}]   ;;  %s4417_s10 = inlined_call_operand.hbm [shape: f32[2,4,256], index: 10, kind: output, shape index: {}]  }
   0x1   :  { %v3500_v0 = vld [vmem:[%s4407_s0] sm:$0xff]  ;;  %3381 = vset.pattern.permute.xlu1 %v3420_v2  ;;  %3382 = vset.pattern.permute.xlu2 %v3420_v2 }
   0x2   :  { %v39_v1 = vld [vmem:[%s4411_s4] sm:$0xf]  ;;  %47 = vst [vmem:[#allocation1] ss:$2 sm:$0xff] %v3500_v0  ;;  %3383 = vset.pattern.permute.xlu0 %v3420_v2 }
   0x3   :  { %109 = vperm.xlu1 %3381, %v39_v1  }
   0x4   :  { %15 = vsyncpa [#allocation4], 0  ;;  %v66_v3 = vmul.f32 %v3500_v0, %v3500_v0  ;;  %vm52_vm0 = vcmask 1043456   ;;  %v40_v4 = vld [vmem:[%s4412_s5] sm:$0xf]  ;;  %v3421_v16 = vmov 256.0  }
   0x5   :  { %v3170_v15 = vld [vmem:[%s4408_s1 + $0x6] sm:$0x3]  ;;  %3384 = vrcp.f32 %v3421_v16  ;;  %s3422_s19 = smov 16   ;;  %v3187_v22 = vld [vmem:[%s4408_s1 + $0xc] sm:$0x3]  ;;  %s3423_s22 = smov 32  }
   0x6   :  { %v379_v17 = vperm.slane %v3170_v15, 1  ;;  %v378_v18 = vperm.slane %v3170_v15, 0  ;;  %v605_v23 = vperm.slane %v3187_v22, 1  ;;  %v604_v25 = vperm.slane %v3187_v22, 0  ;;  %v3164_v29 = vld [vmem:[%s4408_s1 + $0x4] sm:$0x3] }
   0x7   :  { %v3199_v30 = vld [vmem:[%s4408_s1 + $0x10] sm:$0x3]  ;;  %v293_v31 = vperm.slane %v3164_v29, 1  ;;  %v292_v34 = vperm.slane %v3164_v29, 0  ;;  %s3424_s27 = smov 2   ;;  %s3425_s28 = smov 34  }
   0x8   :  { %v380_v19 = vrot.slane %v379_v17, 4  ;;  %v606_v26 = vrot.slane %v605_v23, 4  ;;  %v777_v32 = vperm.slane %v3199_v30, 1  ;;  %v776_v36 = vperm.slane %v3199_v30, 0  ;;  %s3427_s11 = smov 17   ;;  %s3428_s14 = smov 1  }
   0x9   :  { %v48_v5 = vld.sshfl [vmem:[#allocation1] sm:$0xff pattern:$0x75316420]  ;;  %v49_v6 = vld.sshfl [vmem:[#allocation1 + $0x8] sm:$0xff pattern:$0x75316420] }
   0xa   :  { %v53_v7 = vsel %vm52_vm0, %v48_v5, 0.0  ;;  %v54_v8 = vsel %vm52_vm0, %v49_v6, 0.0  ;;  %68 = vst [vmem:[#allocation1] ss:$2 sm:$0xff] %v66_v3  ;;  %v381_v20 = vsel %vm52_vm0, %v378_v18, %v380_v19  ;;  %v607_v27 = vsel %vm52_vm0, %v604_v25, %v606_v26  ;;  %v3154_v6 = vld [vmem:[%s4408_s1 + $0x2] sm:$0x3] }
   0xb   :  { %v55_v9 = vadd.f32 %v54_v8, %v53_v7  ;;  %119 = vperm.xlu1 %3381, %v40_v4   ;;  %v3385_v21 = vpop.eup %3384  ;;  %v294_v35 = vrot.slane %v293_v31, 4  ;;  %v778_v37 = vrot.slane %v777_v32, 4  ;;  %v3426_v51 = vmov 839922192   ;;  %v3193_v17 = vld [vmem:[%s4408_s1 + $0xe] sm:$0x3] }
   0xc   :  { %v59_v24 = vmul.f32 256.0, %v3385_v21  ;;  %vm63_vm1 = vweird.f32 %v3385_v21  ;;  %v84_v52 = vunpack.c.l.s4 %v3426_v51  ;;  %v157_v8 = vperm.slane %v3154_v6, 1  ;;  %s3429_s17 = smov 18   ;;  %s3430_s18 = smov 33  }
   0xd   :  { %56 = vadd.xlane.f32.xlu0 %v55_v9  ;;  %v295_v38 = vsel %vm52_vm0, %v292_v34, %v294_v35  ;;  %v779_v39 = vsel %vm52_vm0, %v776_v36, %v778_v37  ;;  %v691_v19 = vperm.slane %v3193_v17, 1  ;;  %vm37_vm5 = vcmask 273408   ;;  %s3432_s20 = smov 127   ;;  %s3433_s21 = smov 126  }
   0xe   :  { %v60_v28 = vsub.f32 1.0, %v59_v24  ;;  %v3539_v56 = vunpack.c.0.s8 %v84_v52  ;;  %v3431_v23 = vmov 0.0   ;;  %vm136_vm6 = vcmask 1043592   ;;  %s3434_s23 = smov 112   ;;  %s3435_s24 = smov 110  }
   0xf   :  { %36 = vst [vmem:[#allocation2] sm:$0xff] %v3431_v23  ;;  %vm137_vm7 = vcmask 1047556   ;;  %vm132_vm8 = vcmask 138240   ;;  %vm140_vm9 = vcmask 134144   ;;  %vm4424_vm11 = vcmask 7168   ;;  %s3436_s25 = smov 96  }
  0x10   :  { %v61_v33 = vmul.f32 %v3385_v21, %v60_v28  ;;  %38 = vst.msk [vmem:[#allocation2 + $0x8] sm:$0xf] %vm37_vm5, %v3431_v23  ;;  %vm3573_vm10 = vmor %vm137_vm7, %vm136_vm6  ;;  %v143_v28 = vld [vmem:[%s4408_s1] sm:$0x3]  ;;  %vm299_vm12 = vcmask 15360   ;;  %vm385_vm13 = vcmask 130048  }
  0x11   :  { %v69_v10 = vld.sshfl [vmem:[#allocation1] sm:$0xff pattern:$0x75316420]  ;;  %v70_v11 = vld.sshfl [vmem:[#allocation1 + $0x8] sm:$0xff pattern:$0x75316420] }
  0x12   :  { %v73_v12 = vsel %vm52_vm0, %v69_v10, 0.0  ;;  %v74_v13 = vsel %vm52_vm0, %v70_v11, 0.0  ;;  %v62_v40 = vadd.f32 %v3385_v21, %v61_v33  ;;  %v156_v10 = vperm.slane %v3154_v6, 0  ;;  %s3437_s26 = smov 95   ;;  %s3438_s29 = smov 94  }
  0x13   :  { %v75_v14 = vadd.f32 %v74_v13, %v73_v12  ;;  %382 = vrot.lane.b32.xlu1 %v381_v20, %s3422_s19  ;;  %v158_v11 = vrot.slane %v157_v8, 4  ;;  %v3181_v12 = vld [vmem:[%s4408_s1 + $0xa] sm:$0x3]  ;;  %v690_v20 = vperm.slane %v3193_v17, 0  ;;  %v146_v31 = vperm.slane %v143_v28, 1  ;;  %s3440_s12 = smov 128  }
  0x14   :  { %v3535_v42 = vsel %vm63_vm1, %v3385_v21, %v62_v40  ;;  %v518_v15 = vperm.slane %v3181_v12, 0  ;;  %v692_v21 = vrot.slane %v691_v19, 4  ;;  %vm525_vm14 = vcmask 146432  }
  0x15   :  { %76 = vadd.xlane.f32.xlu0 %v75_v14  ;;  %v159_v13 = vsel %vm52_vm0, %v156_v10, %v158_v11  ;;  %v519_v14 = vperm.slane %v3181_v12, 1  ;;  %vm611_vm15 = vcmask 261120   ;;  %vm4426_vm1 = vcmask 269312  }
  0x16   :  { %v693_v22 = vsel %vm52_vm0, %v690_v20, %v692_v21  ;;  %vm4418_vm5 = vcmask 1031168   ;;  %vm407_vm6 = vcmask 916480   ;;  %vm4419_vm7 = vcmask 900096  }
  0x17   :  { %v520_v16 = vrot.slane %v519_v14, 4 }
  0x19   :  { %v521_v18 = vsel %vm52_vm0, %v518_v15, %v520_v16 }
  0x1b   :  { %608 = vrot.lane.b32.xlu1 %v607_v27, %s3423_s22 }
  0x23   :  { %780 = vrot.lane.b32.xlu1 %v779_v39, %s3425_s28  ;;  %v147_v39 = vrot.slane %v146_v31, 4 }
  0x29   :  { %296 = vrot.lane.b32.xlu0 %v295_v38, %s3424_s27  ;;  %v145_v38 = vperm.slane %v143_v28, 0 }
  0x75   :  { %v110_v55 = vpop.permute.xlu1 %109 }
  0x76   :  { %v3545_v3 = vperm.slane %v110_v55, %v3539_v56 }
  0x7d   :  { %v120_v1 = vpop.permute.xlu1 %119 }
  0x7e   :  { %v3549_v5 = vperm.slane %v120_v1, %v3539_v56 }
  0x80   :  { %v57_v41 = vpop.xlane.xlu0 %56 }
  0x81   :  { %v65_v43 = vmul.f32 %v3535_v42, %v57_v41 }
  0x83   :  { %v79_v45 = vmul.f32 %v65_v43, %v65_v43  ;;  %v86_v59 = vperm.slane %v65_v43, %v3539_v56  ;;  %v148_v43 = vsel %vm52_vm0, %v145_v38, %v147_v39 }
  0x85   :  { %v88_v62 = vsub.f32 %v3500_v0, %v86_v59 }
  0x88   :  { %v77_v44 = vpop.xlane.xlu0 %76 }
  0x89   :  { %v78_v46 = vmul.f32 %v77_v44, %v3535_v42 }
  0x8b   :  { %v80_v47 = vsub.f32 %v78_v46, %v79_v45 }
  0x8d   :  { %v81_v48 = vmax.f32 %v80_v47, 0.0  ;;  %v383_v47 = vpop.permute.xlu1 %382 }
  0x8f   :  { %v89_v49 = vadd.f32 1e-05, %v81_v48 }
  0x91   :  { %3386 = vrsqrt.f32 %v89_v49  ;;  %vm96_vm3 = vweird.f32 %v89_v49 }
  0x97   :  { %v3387_v50 = vpop.eup %3386 }
  0x98   :  { %v91_v53 = vmul.f32 %v3387_v50, %v89_v49  ;;  %vm97_vm2 = vweird.f32 %v3387_v50 }
  0x99   :  { %vm98_vm4 = vmor %vm96_vm3, %vm97_vm2  ;;  %vm4425_vm2 = vcmask 277504   ;;  %vm4423_vm3 = vcmask 31744  }
  0x9a   :  { %v92_v54 = vmul.f32 %v3387_v50, %v91_v53 }
  0x9b   :  { %v297_v36 = vpop.permute.xlu0 %296 }
  0x9c   :  { %v93_v57 = vmul.f32 0.5, %v92_v54  ;;  %v298_v40 = vrot.slane %v297_v36, 4 }
  0x9e   :  { %v94_v58 = vsub.f32 1.5, %v93_v57  ;;  %v300_v52 = vsel %vm299_vm12, %v298_v40, %v297_v36 }
  0xa0   :  { %v95_v60 = vmul.f32 %v3387_v50, %v94_v58 }
  0xa2   :  { %v99_v61 = vsel %vm98_vm4, %v3387_v50, %v95_v60  ;;  %v384_v50 = vrot.slane %v383_v47, 4  ;;  %vm185_vm4 = vcmask 1039360  }
  0xa3   :  { %v104_v63 = vperm.slane %v99_v61, %v3539_v56 }
  0xa4   :  { %v386_v61 = vsel %vm385_vm13, %v384_v50, %v383_v47 }
  0xa5   :  { %v106_v2 = vmul.f32 %v104_v63, %v88_v62 }
  0xa7   :  { %v116_v4 = vmul.f32 %v3545_v3, %v106_v2 }
  0xa9   :  { %v3555_v7 = vadd.f32 %v3549_v5, %v116_v4  ;;  %v609_v4 = vpop.permute.xlu1 %608 }
  0xaa   :  { %v610_v10 = vrot.slane %v609_v4, 4 }
  0xab   :  { %v127_v9 = vmax.f32 %v3555_v7, 0.0 }
  0xad   :  { %129 = vrot.lane.b32.xlu2 %v127_v9, %s3427_s11 }
  0xb1   :  { %v781_v21 = vpop.permute.xlu1 %780 }
  0xb5   :  { %160 = vrot.lane.b32.xlu2 %v159_v13, %s3428_s14 }
  0xbd   :  { %522 = vrot.lane.b32.xlu2 %v521_v18, %s3429_s17 }
  0xc5   :  { %694 = vrot.lane.b32.xlu2 %v693_v22, %s3430_s18 }
 0x107   :  { %v130_v24 = vpop.permute.xlu2 %129 }
 0x108   :  { %v131_v26 = vrot.slane %v130_v24, 4 }
 0x10a   :  { %v133_v27 = vsel %vm132_vm8, %v131_v26, %v130_v24  ;;  %141 = vst.msk [vmem:[#allocation2 + $0x8] sm:$0xf] %vm140_vm9, %v131_v26  ;;  %v782_v24 = vrot.slane %v781_v21, 4 }
 0x10b   :  { %139 = vst.msk [vmem:[#allocation2] sm:$0xff] %vm3573_vm10, %v133_v27  ;;  %v612_v27 = vsel %vm611_vm15, %v610_v10, %v609_v4 }
 0x10c   :  { %v784_v39 = vsel %vm4425_vm2, %v782_v24, %v781_v21  ;;  %v42_v21 = vld [vmem:[%s4416_s9] sm:$0xf] }
 0x10f   :  { %v161_v29 = vpop.permute.xlu2 %160 }
 0x110   :  { %v162_v30 = vrot.slane %v161_v29, 4 }
 0x111   :  { %v152_v32 = vld [vmem:[#allocation2 + $0x8] sm:$0xf] }
 0x112   :  { %v3584_v33 = vld [vmem:[#allocation2] sm:$0xff]  ;;  %v164_v34 = vsel %vm4424_vm11, %v162_v30, %v161_v29  ;;  %v168_v35 = vmul.f32 %v162_v30, %v152_v32  ;;  %v288_v41 = vld [vmem:[#allocation2 + $0x8] sm:$0xf] }
 0x113   :  { %v167_v37 = vmul.f32 %v3584_v33, %v164_v34  ;;  %v304_v44 = vmul.f32 %v298_v40, %v288_v41  ;;  %v150_v46 = vmul.f32 %v3584_v33, %v148_v43  ;;  %v374_v51 = vld [vmem:[#allocation2 + $0x8] sm:$0xf]  ;;  %v303_v57 = vmul.f32 %v3584_v33, %v300_v52 }
 0x114   :  { %175 = vst [vmem:[#allocation1 + $0x10] ss:$2 sm:$0xff] %v168_v35  ;;  %v390_v53 = vmul.f32 %v384_v50, %v374_v51  ;;  %v514_v62 = vld [vmem:[#allocation2 + $0x8] sm:$0xf]  ;;  %v389_v2 = vmul.f32 %v386_v61, %v3584_v33  ;;  %v615_v30 = vmul.f32 %v612_v27, %v3584_v33  ;;  %v787_v40 = vmul.f32 %v784_v39, %v3584_v33 }
 0x115   :  { %173 = vst [vmem:[#allocation1] ss:$2 sm:$0xff] %v167_v37  ;;  %v600_v11 = vld [vmem:[#allocation2 + $0x8] sm:$0xf] }
 0x116   :  { %v616_v12 = vmul.f32 %v610_v10, %v600_v11  ;;  %v686_v19 = vld [vmem:[#allocation2 + $0x8] sm:$0xf]  ;;  %v3182_v11 = vld [vmem:[%s4409_s2 + $0x14] sm:$0xf] }
 0x117   :  { %v523_v55 = vpop.permute.xlu2 %522  ;;  %v772_v26 = vld [vmem:[#allocation2 + $0x8] sm:$0xf] }
 0x118   :  { %v524_v60 = vrot.slane %v523_v55, 4  ;;  %v788_v28 = vmul.f32 %v782_v24, %v772_v26 }
 0x11a   :  { %v530_v63 = vmul.f32 %v524_v60, %v514_v62  ;;  %v526_v18 = vsel %vm525_vm14, %v524_v60, %v523_v55  ;;  %v3171_v62 = vld [vmem:[%s4409_s2 + $0xc] sm:$0xf] }
 0x11b   :  { %v178_v45 = vld.sshfl [vmem:[#allocation1 + $0x10] sm:$0xff pattern:$0x75316420]  ;;  %v529_v23 = vmul.f32 %v526_v18, %v3584_v33  ;;  %v3188_v18 = vld [vmem:[%s4409_s2 + $0x18] sm:$0xf] }
 0x11c   :  { %311 = vst [vmem:[#allocation1 + $0x10] ss:$2 sm:$0xff] %v304_v44  ;;  %183 = vrot.lane.b32.xlu1 %v178_v45, %s3432_s20  ;;  %v176_v48 = vld.sshfl [vmem:[#allocation1] sm:$0xff pattern:$0x75316420] }
 0x11d   :  { %v177_v49 = vld.sshfl [vmem:[#allocation1 + $0x8] sm:$0xff pattern:$0x75316420]  ;;  %179 = vrot.lane.b32.xlu2 %v176_v48, %s3432_s20 }
 0x11e   :  { %237 = vst [vmem:[#allocation1] ss:$2 sm:$0xff] %v150_v46  ;;  %181 = vrot.lane.b32.xlu0 %v177_v49, %s3432_s20  ;;  %v151_v46 = vld [vmem:[%s4409_s2] sm:$0xf]  ;;  %v3155_v49 = vld [vmem:[%s4409_s2 + $0x4] sm:$0xf] }
 0x11f   :  { %v695_v14 = vpop.permute.xlu2 %694 }
 0x120   :  { %v696_v17 = vrot.slane %v695_v14, 4 }
 0x122   :  { %v702_v20 = vmul.f32 %v696_v17, %v686_v19  ;;  %v698_v34 = vsel %vm4426_vm1, %v696_v17, %v695_v14  ;;  %v41_v14 = vld [vmem:[%s4415_s8] sm:$0xf] }
 0x123   :  { %v314_v54 = vld.sshfl [vmem:[#allocation1 + $0x10] sm:$0xff pattern:$0x75316420]  ;;  %v701_v36 = vmul.f32 %v698_v34, %v3584_v33 }
 0x124   :  { %397 = vst [vmem:[#allocation1 + $0x10] ss:$2 sm:$0xff] %v390_v53  ;;  %319 = vrot.lane.b32.xlu1 %v314_v54, %s3433_s21 }
 0x125   :  { %v238_v58 = vld.sshfl [vmem:[#allocation1] sm:$0xff pattern:$0x75316420]  ;;  %v239_v59 = vld.sshfl [vmem:[#allocation1 + $0x8] sm:$0xff pattern:$0x75316420] }
 0x126   :  { %309 = vst [vmem:[#allocation1] ss:$2 sm:$0xff] %v303_v57  ;;  %3160 = vmatpush.msk.msra.mxu2 %vm52_vm0, %v238_v58  ;;  %3162 = vmatpush.msk.msra.mxu3 %vm52_vm0, %v239_v59  ;;  %v3165_v58 = vld [vmem:[%s4409_s2 + $0x8] sm:$0xf] }
 0x127   :  { %3161 = vmatmul.msk.f32.vlgmr.msra.gmra.mxu2 %vm4423_vm3, %v151_v46  ;;  %3163 = vmatmul.msk.f32.vlgmr.msra.gmra.mxu3 %vm4423_vm3, %v151_v46 }
 0x12b   :  { %v400_v1 = vld.sshfl [vmem:[#allocation1 + $0x10] sm:$0xff pattern:$0x75316420] }
 0x12c   :  { %537 = vst [vmem:[#allocation1 + $0x10] ss:$2 sm:$0xff] %v530_v63  ;;  %405 = vrot.lane.b32.xlu1 %v400_v1, %s3434_s23 }
 0x12d   :  { %v312_v6 = vld.sshfl [vmem:[#allocation1] sm:$0xff pattern:$0x75316420]  ;;  %v313_v8 = vld.sshfl [vmem:[#allocation1 + $0x8] sm:$0xff pattern:$0x75316420] }
 0x12e   :  { %395 = vst [vmem:[#allocation1] ss:$2 sm:$0xff] %v389_v2  ;;  %317 = vrot.lane.b32.xlu0 %v313_v8, %s3433_s21  ;;  %315 = vrot.lane.b32.xlu2 %v312_v6, %s3433_s21  ;;  %v3176_v2 = vld [vmem:[%s4409_s2 + $0x10] sm:$0xf]  ;;  %v43_v8 = vld [vmem:[%s4410_s3] sm:$0xf] }
 0x133   :  { %v540_v13 = vld.sshfl [vmem:[#allocation1 + $0x10] sm:$0xff pattern:$0x75316420] }
 0x134   :  { %623 = vst [vmem:[#allocation1 + $0x10] ss:$2 sm:$0xff] %v616_v12  ;;  %545 = vrot.lane.b32.xlu1 %v540_v13, %s3435_s24 }
 0x135   :  { %v398_v15 = vld.sshfl [vmem:[#allocation1] sm:$0xff pattern:$0x75316420]  ;;  %v399_v16 = vld.sshfl [vmem:[#allocation1 + $0x8] sm:$0xff pattern:$0x75316420] }
 0x136   :  { %461 = vst [vmem:[#allocation1] ss:$2 sm:$0xff] %v127_v9  ;;  %403 = vrot.lane.b32.xlu0 %v399_v16, %s3434_s23  ;;  %401 = vrot.lane.b32.xlu2 %v398_v15, %s3434_s23 }
 0x13b   :  { %v626_v22 = vld.sshfl [vmem:[#allocation1 + $0x10] sm:$0xff pattern:$0x75316420] }
 0x13c   :  { %709 = vst [vmem:[#allocation1 + $0x10] ss:$2 sm:$0xff] %v702_v20  ;;  %631 = vrot.lane.b32.xlu1 %v626_v22, %s3436_s25 }
 0x13d   :  { %v3611_v7 = vld.sshfl [vmem:[#allocation1] sm:$0xff pattern:$0x75316420]  ;;  %v3613_v9 = vld.sshfl [vmem:[#allocation1 + $0x8] sm:$0xff pattern:$0x75316420] }
 0x13e   :  { %535 = vst [vmem:[#allocation1] ss:$2 sm:$0xff] %v529_v23 }
 0x143   :  { %v712_v29 = vld.sshfl [vmem:[#allocation1 + $0x10] sm:$0xff pattern:$0x75316420] }
 0x144   :  { %795 = vst [vmem:[#allocation1 + $0x10] ss:$2 sm:$0xff] %v788_v28  ;;  %717 = vrot.lane.b32.xlu1 %v712_v29, %s3437_s26 }
 0x145   :  { %v538_v31 = vld.sshfl [vmem:[#allocation1] sm:$0xff pattern:$0x75316420]  ;;  %v539_v32 = vld.sshfl [vmem:[#allocation1 + $0x8] sm:$0xff pattern:$0x75316420] }
 0x146   :  { %621 = vst [vmem:[#allocation1] ss:$2 sm:$0xff] %v615_v30  ;;  %543 = vrot.lane.b32.xlu0 %v539_v32, %s3435_s24  ;;  %541 = vrot.lane.b32.xlu2 %v538_v31, %s3435_s24  ;;  %v3200_v30 = vld [vmem:[%s4409_s2 + $0x20] sm:$0xf] }
 0x14b   :  { %v798_v35 = vld.sshfl [vmem:[#allocation1 + $0x10] sm:$0xff pattern:$0x75316420] }
 0x14c   :  { %803 = vrot.lane.b32.xlu1 %v798_v35, %s3438_s29 }
 0x14d   :  { %v624_v37 = vld.sshfl [vmem:[#allocation1] sm:$0xff pattern:$0x75316420]  ;;  %v625_v38 = vld.sshfl [vmem:[#allocation1 + $0x8] sm:$0xff pattern:$0x75316420] }
 0x14e   :  { %707 = vst [vmem:[#allocation1] ss:$2 sm:$0xff] %v701_v36  ;;  %629 = vrot.lane.b32.xlu0 %v625_v38, %s3436_s25  ;;  %627 = vrot.lane.b32.xlu2 %v624_v37, %s3436_s25 }
 0x155   :  { %v710_v41 = vld.sshfl [vmem:[#allocation1] sm:$0xff pattern:$0x75316420]  ;;  %v711_v43 = vld.sshfl [vmem:[#allocation1 + $0x8] sm:$0xff pattern:$0x75316420] }
 0x156   :  { %793 = vst [vmem:[#allocation1] ss:$2 sm:$0xff] %v787_v40  ;;  %715 = vrot.lane.b32.xlu0 %v711_v43, %s3437_s26  ;;  %713 = vrot.lane.b32.xlu2 %v710_v41, %s3437_s26 }
 0x15d   :  { %v797_v44 = vld.sshfl [vmem:[#allocation1 + $0x8] sm:$0xff pattern:$0x75316420]  ;;  %v796_v45 = vld.sshfl [vmem:[#allocation1] sm:$0xff pattern:$0x75316420] }
 0x15e   :  { %801 = vrot.lane.b32.xlu0 %v797_v44, %s3438_s29  ;;  %799 = vrot.lane.b32.xlu2 %v796_v45, %s3438_s29 }
 0x166   :  { %859 = vperm.xlu2 %3382, %v43_v8  }
 0x16e   :  { %898 = vperm.xlu2 %3382, %v41_v14  }
 0x176   :  { %905 = vperm.xlu2 %3382, %v42_v21   ;;  %v3238_v21 = vld [vmem:[%s4408_s1 + $0xc] sm:$0x3] }
 0x177   :  { %v180_v47 = vpop.permute.xlu2 %179 }
 0x188   :  { %v316_v52 = vpop.permute.xlu2 %315 }
 0x18e   :  { %v184_v33 = vpop.permute.xlu1 %183 }
 0x190   :  { %v182_v48 = vpop.permute.xlu0 %181  ;;  %v402_v59 = vpop.permute.xlu2 %401 }
 0x191   :  { %v186_v50 = vsel %vm185_vm4, %v180_v47, %v182_v48  ;;  %v187_v51 = vsel %vm185_vm4, %v182_v48, %v184_v33 }
 0x192   :  { %3156 = vmatpush.msk.msra.mxu0 %vm52_vm0, %v186_v50  ;;  %3158 = vmatpush.msk.msra.mxu1 %vm52_vm0, %v187_v51 }
 0x193   :  { %3157 = vmatmul.msk.f32.vlgmr.msra.gmra.mxu0 %vm4423_vm3, %v3155_v49  ;;  %3159 = vmatmul.msk.f32.vlgmr.msra.gmra.mxu1 %vm4423_vm3, %v3155_v49 }
 0x196   :  { %v320_v53 = vpop.permute.xlu1 %319 }
 0x19e   :  { %v406_v60 = vpop.permute.xlu1 %405 }
 0x1a0   :  { %v318_v54 = vpop.permute.xlu0 %317  ;;  %v542_v4 = vpop.permute.xlu2 %541 }
 0x1a1   :  { %v322_v55 = vsel %vm4418_vm5, %v316_v52, %v318_v54  ;;  %v323_v57 = vsel %vm4418_vm5, %v318_v54, %v320_v53  ;;  %vm4420_vm5 = vcmask 785408  }
 0x1a2   :  { %3166 = vmatpush.msk.msrb.mxu0 %vm52_vm0, %v322_v55  ;;  %3168 = vmatpush.msk.msrb.mxu1 %vm52_vm0, %v323_v57 }
 0x1a3   :  { %3167 = vmatmul.msk.f32.vlgmr.msrb.gmra.mxu0 %vm4423_vm3, %v3165_v58  ;;  %3169 = vmatmul.msk.f32.vlgmr.msrb.gmra.mxu1 %vm4423_vm3, %v3165_v58 }
 0x1a4   :  { %3177 = vmatpush.msk.msra.mxu0 %vm52_vm0, %v3611_v7  ;;  %3179 = vmatpush.msk.msra.mxu1 %vm52_vm0, %v3613_v9  ;;  %v3194_v9 = vld [vmem:[%s4409_s2 + $0x1c] sm:$0xf] }
 0x1a6   :  { %v546_v6 = vpop.permute.xlu1 %545 }
 0x1a8   :  { %v404_v61 = vpop.permute.xlu0 %403  ;;  %v628_v15 = vpop.permute.xlu2 %627 }
 0x1a9   :  { %v408_v63 = vsel %vm407_vm6, %v402_v59, %v404_v61  ;;  %v409_v1 = vsel %vm407_vm6, %v404_v61, %v406_v60 }
 0x1aa   :  { %3172 = vmatpush.msk.msrb.mxu2 %vm52_vm0, %v408_v63  ;;  %3174 = vmatpush.msk.msrb.mxu3 %vm52_vm0, %v409_v1  ;;  %v264_v36 = vpop.f32.mrf.mxu2  ;;  %v284_v37 = vpop.f32.mrf.mxu3 }
 0x1ab   :  { %3173 = vmatmul.msk.f32.vlgmr.msrb.gmra.mxu2 %vm4423_vm3, %v3171_v62  ;;  %3175 = vmatmul.msk.f32.vlgmr.msrb.gmra.mxu3 %vm4423_vm3, %v3171_v62 }
 0x1ac   :  { %3178 = vmatmul.msk.f32.vlgmr.msra.gmra.mxu0 %vm4423_vm3, %v3176_v2  ;;  %3180 = vmatmul.msk.f32.vlgmr.msra.gmra.mxu1 %vm4423_vm3, %v3176_v2 }
 0x1ae   :  { %v632_v16 = vpop.permute.xlu1 %631 }
 0x1b0   :  { %v714_v22 = vpop.permute.xlu2 %713 }
 0x1b6   :  { %v718_v23 = vpop.permute.xlu1 %717 }
 0x1b8   :  { %v544_v10 = vpop.permute.xlu0 %543  ;;  %v800_v27 = vpop.permute.xlu2 %799 }
 0x1b9   :  { %v548_v12 = vsel %vm4419_vm7, %v542_v4, %v544_v10  ;;  %v549_v13 = vsel %vm4419_vm7, %v544_v10, %v546_v6  ;;  %vm4421_vm7 = vcmask 777216  }
 0x1ba   :  { %3183 = vmatpush.msk.msra.mxu2 %vm52_vm0, %v548_v12  ;;  %3185 = vmatpush.msk.msra.mxu3 %vm52_vm0, %v549_v13 }
 0x1bb   :  { %3184 = vmatmul.msk.f32.vlgmr.msra.gmra.mxu2 %vm4423_vm3, %v3182_v11  ;;  %3186 = vmatmul.msk.f32.vlgmr.msra.gmra.mxu3 %vm4423_vm3, %v3182_v11 }
 0x1be   :  { %v804_v28 = vpop.permute.xlu1 %803 }
 0x1c0   :  { %v630_v17 = vpop.permute.xlu0 %629  ;;  %v3717_v10 = vpop.permute.xlu2 %859 }
 0x1c1   :  { %v634_v19 = vsel %vm4420_vm5, %v628_v15, %v630_v17  ;;  %v635_v20 = vsel %vm4420_vm5, %v630_v17, %v632_v16  ;;  %vm4422_vm5 = vcmask 769024  }
 0x1c2   :  { %3189 = vmatpush.msk.msrb.mxu0 %vm52_vm0, %v634_v19  ;;  %3191 = vmatpush.msk.msrb.mxu1 %vm52_vm0, %v635_v20 }
 0x1c3   :  { %3190 = vmatmul.msk.f32.vlgmr.msrb.gmra.mxu0 %vm4423_vm3, %v3188_v18  ;;  %3192 = vmatmul.msk.f32.vlgmr.msrb.gmra.mxu1 %vm4423_vm3, %v3188_v18 }
 0x1c8   :  { %v716_v7 = vpop.permute.xlu0 %715 }
 0x1c9   :  { %v720_v24 = vsel %vm4421_vm7, %v714_v22, %v716_v7  ;;  %v721_v26 = vsel %vm4421_vm7, %v716_v7, %v718_v23  ;;  %v3221_v22 = vld [vmem:[%s4408_s1 + $0x6] sm:$0x3]  ;;  %v1370_v23 = vperm.slane %v3238_v21, 1 }
 0x1ca   :  { %3195 = vmatpush.msk.msrb.mxu2 %vm52_vm0, %v720_v24  ;;  %3197 = vmatpush.msk.msrb.mxu3 %vm52_vm0, %v721_v26  ;;  %v1153_v7 = vperm.slane %v3221_v22, 1  ;;  %v1152_v26 = vperm.slane %v3221_v22, 0  ;;  %v3250_v22 = vld [vmem:[%s4408_s1 + $0x10] sm:$0x3] }
 0x1cb   :  { %3196 = vmatmul.msk.f32.vlgmr.msrb.gmra.mxu2 %vm4423_vm3, %v3194_v9  ;;  %3198 = vmatmul.msk.f32.vlgmr.msrb.gmra.mxu3 %vm4423_vm3, %v3194_v9  ;;  %v1369_v9 = vperm.slane %v3238_v21, 0  ;;  %v1371_v24 = vrot.slane %v1370_v23, 4 }
 0x1d0   :  { %v802_v29 = vpop.permute.xlu0 %801 }
 0x1d1   :  { %v806_v31 = vsel %vm4422_vm5, %v800_v27, %v802_v29  ;;  %v807_v32 = vsel %vm4422_vm5, %v802_v29, %v804_v28  ;;  %v1154_v27 = vrot.slane %v1153_v7, 4  ;;  %v1372_v28 = vsel %vm52_vm0, %v1369_v9, %v1371_v24 }
 0x1d2   :  { %3201 = vmatpush.msk.msra.mxu0 %vm52_vm0, %v806_v31  ;;  %3203 = vmatpush.msk.msra.mxu1 %vm52_vm0, %v807_v32  ;;  %v1536_v7 = vperm.slane %v3250_v22, 1  ;;  %v1535_v9 = vperm.slane %v3250_v22, 0 }
 0x1d3   :  { %3202 = vmatmul.msk.f32.vlgmr.msra.gmra.mxu0 %vm4423_vm3, %v3200_v30  ;;  %3204 = vmatmul.msk.f32.vlgmr.msra.gmra.mxu1 %vm4423_vm3, %v3200_v30  ;;  %v1155_v29 = vsel %vm52_vm0, %v1152_v26, %v1154_v27 }
 0x1d4   :  { %v1537_v24 = vrot.slane %v1536_v7, 4 }
 0x1d6   :  { %v1538_v26 = vsel %vm52_vm0, %v1535_v9, %v1537_v24 }
 0x210   :  { %v213_v34 = vpop.f32.mrf.mxu0  ;;  %v233_v35 = vpop.f32.mrf.mxu1 }
 0x211   :  { %v265_v40 = vadd.f32 %v264_v36, %v213_v34  ;;  %v285_v41 = vadd.f32 %v284_v37, %v233_v35 }
 0x220   :  { %v348_v38 = vpop.f32.mrf.mxu0  ;;  %v368_v39 = vpop.f32.mrf.mxu1 }
 0x221   :  { %v371_v45 = vadd.f32 %v348_v38, %v265_v40  ;;  %v372_v46 = vadd.f32 %v368_v39, %v285_v41 }
 0x229   :  { %v488_v33 = vpop.f32.mrf.mxu0  ;;  %v508_v47 = vpop.f32.mrf.mxu1 }
 0x22e   :  { %v434_v43 = vpop.f32.mrf.mxu2  ;;  %v454_v44 = vpop.f32.mrf.mxu3 }
 0x22f   :  { %v457_v48 = vadd.f32 %v434_v43, %v371_v45  ;;  %v458_v49 = vadd.f32 %v454_v44, %v372_v46  ;;  %v3737_v43 = vpop.permute.xlu2 %898 }
 0x231   :  { %v511_v52 = vadd.f32 %v488_v33, %v457_v48  ;;  %v512_v53 = vadd.f32 %v508_v47, %v458_v49 }
 0x23e   :  { %v574_v50 = vpop.f32.mrf.mxu2  ;;  %v594_v51 = vpop.f32.mrf.mxu3 }
 0x23f   :  { %v597_v57 = vadd.f32 %v574_v50, %v511_v52  ;;  %v598_v58 = vadd.f32 %v594_v51, %v512_v53  ;;  %v3741_v53 = vpop.permute.xlu2 %905 }
 0x240   :  { %v660_v54 = vpop.f32.mrf.mxu0  ;;  %v680_v55 = vpop.f32.mrf.mxu1 }
 0x241   :  { %v683_v59 = vadd.f32 %v660_v54, %v597_v57  ;;  %v684_v60 = vadd.f32 %v680_v55, %v598_v58  ;;  %v3205_v57 = vld [vmem:[%s4408_s1 + $0x2] sm:$0x3] }
 0x24e   :  { %v746_v61 = vpop.f32.mrf.mxu2  ;;  %v766_v62 = vpop.f32.mrf.mxu3 }
 0x24f   :  { %v769_v63 = vadd.f32 %v746_v61, %v683_v59  ;;  %v770_v1 = vadd.f32 %v766_v62, %v684_v60  ;;  %v938_v61 = vperm.slane %v3205_v57, 1 }
 0x250   :  { %v832_v2 = vpop.f32.mrf.mxu0  ;;  %v852_v4 = vpop.f32.mrf.mxu1 }
 0x251   :  { %v855_v6 = vadd.f32 %v832_v2, %v769_v63  ;;  %v856_v8 = vadd.f32 %v852_v4, %v770_v1  ;;  %v937_v63 = vperm.slane %v3205_v57, 0  ;;  %v939_v1 = vrot.slane %v938_v61, 4  ;;  %v3215_v2 = vld [vmem:[%s4408_s1 + $0x4] sm:$0x3] }
 0x253   :  { %v862_v11 = vadd.f32 %v3717_v10, %v855_v6  ;;  %v863_v12 = vadd.f32 %v3717_v10, %v856_v8  ;;  %v940_v4 = vsel %vm52_vm0, %v937_v63, %v939_v1  ;;  %v1070_v6 = vperm.slane %v3215_v2, 1 }
 0x254   :  { %v1069_v8 = vperm.slane %v3215_v2, 0 }
 0x255   :  { %v864_v13 = vsel %vm52_vm0, %v862_v11, 0.0  ;;  %v865_v14 = vsel %vm52_vm0, %v863_v12, 0.0  ;;  %v870_v15 = vmul.f32 %v862_v11, %v862_v11  ;;  %v871_v16 = vmul.f32 %v863_v12, %v863_v12 }
 0x256   :  { %v866_v17 = vadd.f32 %v865_v14, %v864_v13 }
 0x257   :  { %v872_v18 = vsel %vm52_vm0, %v870_v15, 0.0  ;;  %v873_v19 = vsel %vm52_vm0, %v871_v16, 0.0 }
 0x258   :  { %867 = vadd.xlane.f32.xlu0 %v866_v17  ;;  %v874_v20 = vadd.f32 %v873_v19, %v872_v18  ;;  %v3244_v17 = vld [vmem:[%s4408_s1 + $0xe] sm:$0x3] }
 0x259   :  { %v1453_v19 = vperm.slane %v3244_v17, 1 }
 0x25a   :  { %875 = vadd.xlane.f32.xlu1 %v874_v20  ;;  %v1452_v20 = vperm.slane %v3244_v17, 0 }
 0x25b   :  { %v1454_v21 = vrot.slane %v1453_v19, 4 }
 0x25d   :  { %v1455_v23 = vsel %vm52_vm0, %v1452_v20, %v1454_v21 }
 0x26c   :  { %1156 = vrot.lane.b32.xlu0 %v1155_v29, %s3422_s19 }
 0x273   :  { %1373 = vrot.lane.b32.xlu1 %v1372_v28, %s3423_s22 }
 0x2cb   :  { %v868_v30 = vpop.xlane.xlu0 %867 }
 0x2cc   :  { %v869_v31 = vmul.f32 %v868_v30, %v3535_v42  ;;  %v925_v30 = vld [vmem:[%s4408_s1] sm:$0x3] }
 0x2cd   :  { %v876_v32 = vpop.xlane.xlu1 %875 }
 0x2ce   :  { %v877_v34 = vmul.f32 %v876_v32, %v3535_v42  ;;  %v878_v35 = vmul.f32 %v869_v31, %v869_v31  ;;  %v881_v33 = vsub.f32 %v862_v11, %v869_v31  ;;  %v882_v47 = vsub.f32 %v863_v12, %v869_v31  ;;  %v3232_v12 = vld [vmem:[%s4408_s1 + $0xa] sm:$0x3] }
 0x2cf   :  { %v1071_v11 = vrot.slane %v1070_v6, 4  ;;  %v1287_v14 = vperm.slane %v3232_v12, 1  ;;  %v1286_v15 = vperm.slane %v3232_v12, 0  ;;  %v928_v32 = vperm.slane %v925_v30, 1 }
 0x2d0   :  { %v879_v36 = vsub.f32 %v877_v34, %v878_v35 }
 0x2d1   :  { %v1072_v13 = vsel %vm52_vm0, %v1069_v8, %v1071_v11  ;;  %v1288_v16 = vrot.slane %v1287_v14, 4 }
 0x2d2   :  { %v880_v37 = vmax.f32 %v879_v36, 0.0 }
 0x2d3   :  { %v1289_v18 = vsel %vm52_vm0, %v1286_v15, %v1288_v16 }
 0x2d4   :  { %v883_v38 = vadd.f32 1e-05, %v880_v37 }
 0x2d6   :  { %3388 = vrsqrt.f32 %v883_v38  ;;  %vm890_vm5 = vweird.f32 %v883_v38 }
 0x2dc   :  { %v3389_v39 = vpop.eup %3388 }
 0x2dd   :  { %v885_v40 = vmul.f32 %v3389_v39, %v883_v38  ;;  %vm891_vm7 = vweird.f32 %v3389_v39 }
 0x2de   :  { %vm892_vm3 = vmor %vm890_vm5, %vm891_vm7 }
 0x2df   :  { %v886_v41 = vmul.f32 %v3389_v39, %v885_v40  ;;  %v927_v40 = vperm.slane %v925_v30, 0 }
 0x2e1   :  { %v887_v44 = vmul.f32 0.5, %v886_v41  ;;  %v929_v41 = vrot.slane %v928_v32, 4 }
 0x2e3   :  { %v888_v45 = vsub.f32 1.5, %v887_v44 }
 0x2e5   :  { %v889_v46 = vmul.f32 %v3389_v39, %v888_v45  ;;  %v930_v45 = vsel %vm52_vm0, %v927_v40, %v929_v41  ;;  %v1374_v17 = vpop.permute.xlu1 %1373 }
 0x2e6   :  { %v1375_v19 = vrot.slane %v1374_v17, 4 }
 0x2e7   :  { %v893_v48 = vsel %vm892_vm3, %v3389_v39, %v889_v46 }
 0x2e8   :  { %v895_v49 = vmul.f32 %v893_v48, %v882_v47  ;;  %v894_v50 = vmul.f32 %v893_v48, %v881_v33 }
 0x2ea   :  { %v901_v51 = vmul.f32 %v3737_v43, %v894_v50  ;;  %v902_v52 = vmul.f32 %v3737_v43, %v895_v49 }
 0x2ec   :  { %v3744_v54 = vadd.f32 %v3741_v53, %v901_v51  ;;  %v3747_v55 = vadd.f32 %v3741_v53, %v902_v52  ;;  %v1157_v52 = vpop.permute.xlu0 %1156 }
 0x2ed   :  { %v1158_v57 = vrot.slane %v1157_v52, 4 }
 0x2ee   :  { %v911_v58 = vmax.f32 %v3747_v55, 0.0  ;;  %v910_v59 = vmax.f32 %v3744_v54, 0.0  ;;  %v3227_v54 = vld [vmem:[%s4413_s6 + $0x10] sm:$0xf] }
 0x2ef   :  { %v1159_v8 = vsel %vm385_vm13, %v1158_v57, %v1157_v52 }
 0x2f0   :  { %v914_v60 = vrot.slane %v911_v58, 4 }
 0x2f2   :  { %v915_v62 = vsel %vm52_vm0, %v910_v59, %v914_v60 }
 0x2f3   :  { %916 = vrot.lane.b32.xlu2 %v915_v62, %s3427_s11 }
 0x2fb   :  { %941 = vrot.lane.b32.xlu2 %v940_v4, %s3428_s14 }
 0x303   :  { %1073 = vrot.lane.b32.xlu2 %v1072_v13, %s3424_s27 }
 0x30b   :  { %1290 = vrot.lane.b32.xlu2 %v1289_v18, %s3429_s17 }
 0x313   :  { %1456 = vrot.lane.b32.xlu2 %v1455_v23, %s3430_s18 }
 0x31b   :  { %1539 = vrot.lane.b32.xlu2 %v1538_v26, %s3425_s28 }
 0x34d   :  { %v917_v27 = vpop.permute.xlu2 %916 }
 0x34e   :  { %v918_v28 = vrot.slane %v917_v27, 4 }
 0x350   :  { %v919_v29 = vsel %vm132_vm8, %v918_v28, %v917_v27  ;;  %923 = vst.msk [vmem:[#allocation2 + $0x8] sm:$0xf] %vm140_vm9, %v918_v28  ;;  %v1376_v27 = vsel %vm611_vm15, %v1375_v19, %v1374_v17 }
 0x351   :  { %922 = vst.msk [vmem:[#allocation2] sm:$0xff] %vm3573_vm10, %v919_v29 }
 0x355   :  { %v942_v31 = vpop.permute.xlu2 %941 }
 0x356   :  { %v943_v34 = vrot.slane %v942_v31, 4 }
 0x357   :  { %v934_v35 = vld [vmem:[#allocation2 + $0x8] sm:$0xf] }
 0x358   :  { %v3789_v36 = vld [vmem:[#allocation2] sm:$0xff]  ;;  %v944_v37 = vsel %vm4424_vm11, %v943_v34, %v942_v31  ;;  %v948_v38 = vmul.f32 %v943_v34, %v934_v35  ;;  %v1066_v33 = vld [vmem:[#allocation2 + $0x8] sm:$0xf] }
 0x359   :  { %v947_v39 = vmul.f32 %v3789_v36, %v944_v37  ;;  %v932_v48 = vmul.f32 %v3789_v36, %v930_v45  ;;  %v1149_v61 = vld [vmem:[#allocation2 + $0x8] sm:$0xf]  ;;  %v1162_v12 = vmul.f32 %v3789_v36, %v1159_v8  ;;  %v1379_v29 = vmul.f32 %v1376_v27, %v3789_v36 }
 0x35a   :  { %955 = vst [vmem:[#allocation1 + $0x10] ss:$2 sm:$0xff] %v948_v38  ;;  %v1163_v63 = vmul.f32 %v1158_v57, %v1149_v61  ;;  %v1283_v13 = vld [vmem:[#allocation2 + $0x8] sm:$0xf] }
 0x35b   :  { %953 = vst [vmem:[#allocation1] ss:$2 sm:$0xff] %v947_v39  ;;  %v1366_v21 = vld [vmem:[#allocation2 + $0x8] sm:$0xf] }
 0x35c   :  { %v1380_v7 = vmul.f32 %v1375_v19, %v1366_v21  ;;  %v1449_v30 = vld [vmem:[#allocation2 + $0x8] sm:$0xf] }
 0x35d   :  { %v1074_v44 = vpop.permute.xlu2 %1073  ;;  %v1532_v41 = vld [vmem:[#allocation2 + $0x8] sm:$0xf] }
 0x35e   :  { %v1075_v46 = vrot.slane %v1074_v44, 4 }
 0x360   :  { %v1080_v47 = vmul.f32 %v1075_v46, %v1066_v33  ;;  %v1076_v60 = vsel %vm299_vm12, %v1075_v46, %v1074_v44 }
 0x361   :  { %v3795_v49 = vld.sshfl [vmem:[#allocation1 + $0x10] sm:$0xff pattern:$0x75316420]  ;;  %v1079_v62 = vmul.f32 %v3789_v36, %v1076_v60 }
 0x362   :  { %v3797_v50 = vld.sshfl [vmem:[#allocation1] sm:$0xff pattern:$0x75316420]  ;;  %v3799_v51 = vld.sshfl [vmem:[#allocation1 + $0x8] sm:$0xff pattern:$0x75316420] }
 0x363   :  { %1015 = vst [vmem:[#allocation1] ss:$2 sm:$0xff] %v932_v48 }
 0x364   :  { %1087 = vst [vmem:[#allocation1 + $0x10] ss:$2 sm:$0xff] %v1080_v47 }
 0x365   :  { %v1291_v6 = vpop.permute.xlu2 %1290 }
 0x366   :  { %v1292_v11 = vrot.slane %v1291_v6, 4 }
 0x368   :  { %v1297_v14 = vmul.f32 %v1292_v11, %v1283_v13  ;;  %v1293_v20 = vsel %vm525_vm14, %v1292_v11, %v1291_v6 }
 0x369   :  { %v1296_v22 = vmul.f32 %v3789_v36, %v1293_v20  ;;  %v3296_v20 = vld [vmem:[%s4408_s1 + $0xe] sm:$0x3] }
 0x36a   :  { %v1016_v1 = vld.sshfl [vmem:[#allocation1] sm:$0xff pattern:$0x75316420]  ;;  %v1017_v2 = vld.sshfl [vmem:[#allocation1 + $0x8] sm:$0xff pattern:$0x75316420] }
 0x36b   :  { %v3803_v4 = vld.sshfl [vmem:[#allocation1 + $0x10] sm:$0xff pattern:$0x75316420]  ;;  %3211 = vmatpush.msk.msrb.mxu0 %vm52_vm0, %v1016_v1  ;;  %3213 = vmatpush.msk.msrb.mxu1 %vm52_vm0, %v1017_v2  ;;  %1085 = vst [vmem:[#allocation1] ss:$2 sm:$0xff] %v1079_v62  ;;  %v3835_v62 = vld [vmem:[%s4407_s0 + $0x8] sm:$0xff] }
 0x36c   :  { %1170 = vst [vmem:[#allocation1 + $0x10] ss:$2 sm:$0xff] %v1163_v63  ;;  %v2227_v21 = vperm.slane %v3296_v20, 1 }
 0x36d   :  { %v1457_v23 = vpop.permute.xlu2 %1456 }
 0x36e   :  { %v1458_v28 = vrot.slane %v1457_v23, 4 }
 0x370   :  { %v1463_v34 = vmul.f32 %v1458_v28, %v1449_v30  ;;  %v1459_v38 = vsel %vm4426_vm1, %v1458_v28, %v1457_v23  ;;  %v2228_v23 = vrot.slane %v2227_v21, 4 }
 0x371   :  { %v1462_v40 = vmul.f32 %v1459_v38, %v3789_v36 }
 0x372   :  { %v3809_v15 = vld.sshfl [vmem:[#allocation1] sm:$0xff pattern:$0x75316420]  ;;  %v3811_v16 = vld.sshfl [vmem:[#allocation1 + $0x8] sm:$0xff pattern:$0x75316420] }
 0x373   :  { %v3813_v18 = vld.sshfl [vmem:[#allocation1 + $0x10] sm:$0xff pattern:$0x75316420]  ;;  %1168 = vst [vmem:[#allocation1] ss:$2 sm:$0xff] %v1162_v12 }
 0x374   :  { %1304 = vst [vmem:[#allocation1 + $0x10] ss:$2 sm:$0xff] %v1297_v14 }
 0x375   :  { %v1540_v35 = vpop.permute.xlu2 %1539 }
 0x376   :  { %v1541_v39 = vrot.slane %v1540_v35, 4 }
 0x378   :  { %v1546_v46 = vmul.f32 %v1541_v39, %v1532_v41  ;;  %v1542_v47 = vsel %vm4425_vm2, %v1541_v39, %v1540_v35  ;;  %v3284_v39 = vld [vmem:[%s4408_s1 + $0xa] sm:$0x3] }
 0x379   :  { %v1545_v48 = vmul.f32 %v1542_v47, %v3789_v36  ;;  %v1648_v36 = vmul.f32 %v3835_v62, %v3835_v62  ;;  %v2063_v41 = vperm.slane %v3284_v39, 1 }
 0x37a   :  { %v3817_v9 = vld.sshfl [vmem:[#allocation1] sm:$0xff pattern:$0x75316420]  ;;  %v1172_v24 = vld.sshfl [vmem:[#allocation1 + $0x8] sm:$0xff pattern:$0x75316420] }
 0x37b   :  { %1302 = vst [vmem:[#allocation1] ss:$2 sm:$0xff] %v1296_v22  ;;  %v3819_v26 = vld.sshfl [vmem:[#allocation1 + $0x10] sm:$0xff pattern:$0x75316420]  ;;  %v2226_v22 = vperm.slane %v3296_v20, 0 }
 0x37c   :  { %1387 = vst [vmem:[#allocation1 + $0x10] ss:$2 sm:$0xff] %v1380_v7 }
 0x37d   :  { %v2229_v7 = vsel %vm52_vm0, %v2226_v22, %v2228_v23 }
 0x382   :  { %v1305_v31 = vld.sshfl [vmem:[#allocation1] sm:$0xff pattern:$0x75316420]  ;;  %v1306_v32 = vld.sshfl [vmem:[#allocation1 + $0x8] sm:$0xff pattern:$0x75316420] }
 0x383   :  { %1385 = vst [vmem:[#allocation1] ss:$2 sm:$0xff] %v1379_v29  ;;  %v3823_v37 = vld.sshfl [vmem:[#allocation1 + $0x10] sm:$0xff pattern:$0x75316420] }
 0x384   :  { %1470 = vst [vmem:[#allocation1 + $0x10] ss:$2 sm:$0xff] %v1463_v34 }
 0x38a   :  { %v1388_v44 = vld.sshfl [vmem:[#allocation1] sm:$0xff pattern:$0x75316420]  ;;  %v1389_v45 = vld.sshfl [vmem:[#allocation1 + $0x8] sm:$0xff pattern:$0x75316420] }
 0x38b   :  { %1468 = vst [vmem:[#allocation1] ss:$2 sm:$0xff] %v1462_v40  ;;  %v3827_v33 = vld.sshfl [vmem:[#allocation1 + $0x10] sm:$0xff pattern:$0x75316420] }
 0x38c   :  { %1553 = vst [vmem:[#allocation1 + $0x10] ss:$2 sm:$0xff] %v1546_v46 }
 0x392   :  { %v1471_v52 = vld.sshfl [vmem:[#allocation1] sm:$0xff pattern:$0x75316420]  ;;  %v1472_v57 = vld.sshfl [vmem:[#allocation1 + $0x8] sm:$0xff pattern:$0x75316420] }
 0x393   :  { %1551 = vst [vmem:[#allocation1] ss:$2 sm:$0xff] %v1545_v48 }
 0x39a   :  { %v1554_v60 = vld.sshfl [vmem:[#allocation1] sm:$0xff pattern:$0x75316420]  ;;  %v1555_v61 = vld.sshfl [vmem:[#allocation1 + $0x8] sm:$0xff pattern:$0x75316420] }
 0x39b   :  { %1621 = vst [vmem:[#allocation1] ss:$2 sm:$0xff] %v3500_v0 }
 0x3a2   :  { %v3837_v63 = vld.sshfl [vmem:[#allocation1] sm:$0xff pattern:$0x75316420]  ;;  %v3839_v1 = vld.sshfl [vmem:[#allocation1 + $0x8] sm:$0xff pattern:$0x75316420] }
 0x3a3   :  { %1637 = vst [vmem:[#allocation1] ss:$2 sm:$0xff] %v3835_v62 }
 0x3aa   :  { %v1638_v2 = vld.sshfl [vmem:[#allocation1] sm:$0xff pattern:$0x75316420]  ;;  %v1639_v6 = vld.sshfl [vmem:[#allocation1 + $0x8] sm:$0xff pattern:$0x75316420] }
 0x3ab   :  { %v1642_v8 = vsel %vm52_vm0, %v1638_v2, 0.0  ;;  %v1643_v0 = vsel %vm52_vm0, %v1639_v6, 0.0  ;;  %1650 = vst [vmem:[#allocation1] ss:$2 sm:$0xff] %v1648_v36 }
 0x3ac   :  { %v1644_v11 = vadd.f32 %v1643_v0, %v1642_v8 }
 0x3ae   :  { %1645 = vadd.xlane.f32.xlu0 %v1644_v11 }
 0x3b2   :  { %v1651_v12 = vld.sshfl [vmem:[#allocation1] sm:$0xff pattern:$0x75316420]  ;;  %v1652_v13 = vld.sshfl [vmem:[#allocation1 + $0x8] sm:$0xff pattern:$0x75316420] }
 0x3b3   :  { %v1655_v14 = vsel %vm52_vm0, %v1651_v12, 0.0  ;;  %v1656_v17 = vsel %vm52_vm0, %v1652_v13, 0.0 }
 0x3b4   :  { %v1657_v19 = vadd.f32 %v1656_v17, %v1655_v14 }
 0x3b6   :  { %1658 = vadd.xlane.f32.xlu2 %v1657_v19 }
 0x3c2   :  { %959 = vrot.lane.b32.xlu0 %v3797_v50, %s3432_s20  ;;  %v3257_v50 = vld [vmem:[%s4408_s1 + $0x2] sm:$0x3] }
 0x3ca   :  { %1091 = vrot.lane.b32.xlu0 %v3809_v15, %s3433_s21 }
 0x3ce   :  { %961 = vrot.lane.b32.xlu2 %v3799_v51, %s3432_s20  ;;  %v1715_v51 = vperm.slane %v3257_v50, 1 }
 0x3d0   :  { %v1716_v15 = vrot.slane %v1715_v51, 4 }
 0x3d2   :  { %1095 = vrot.lane.b32.xlu0 %v3803_v4, %s3433_s21  ;;  %v1714_v4 = vperm.slane %v3257_v50, 0 }
 0x3d6   :  { %2230 = vrot.lane.b32.xlu2 %v2229_v7, %s3430_s18 }
 0x3da   :  { %1176 = vrot.lane.b32.xlu0 %v1172_v24, %s3434_s23  ;;  %v3267_v24 = vld [vmem:[%s4408_s1 + $0x4] sm:$0x3] }
 0x3db   :  { %v1846_v27 = vperm.slane %v3267_v24, 1  ;;  %v1845_v28 = vperm.slane %v3267_v24, 0 }
 0x3dd   :  { %v1847_v29 = vrot.slane %v1846_v27, 4 }
 0x3de   :  { %1178 = vrot.lane.b32.xlu2 %v3813_v18, %s3434_s23  ;;  %v1717_v18 = vsel %vm52_vm0, %v1714_v4, %v1716_v15 }
 0x3df   :  { %1718 = vrot.lane.b32.xlu1 %v1717_v18, %s3428_s14  ;;  %v1848_v30 = vsel %vm52_vm0, %v1845_v28, %v1847_v29 }
 0x3e2   :  { %1308 = vrot.lane.b32.xlu0 %v1305_v31, %s3435_s24  ;;  %v3273_v31 = vld [vmem:[%s4408_s1 + $0x6] sm:$0x3] }
 0x3e3   :  { %v1927_v34 = vperm.slane %v3273_v31, 0 }
 0x3e6   :  { %1310 = vrot.lane.b32.xlu2 %v1306_v32, %s3435_s24  ;;  %v1928_v32 = vperm.slane %v3273_v31, 1  ;;  %v3302_v31 = vld [vmem:[%s4408_s1 + $0x10] sm:$0x3] }
 0x3e7   :  { %1849 = vrot.lane.b32.xlu1 %v1848_v30, %s3424_s27 }
 0x3e8   :  { %v1929_v35 = vrot.slane %v1928_v32, 4  ;;  %v2309_v32 = vperm.slane %v3302_v31, 1 }
 0x3ea   :  { %1391 = vrot.lane.b32.xlu0 %v1388_v44, %s3436_s25  ;;  %v1930_v38 = vsel %vm52_vm0, %v1927_v34, %v1929_v35  ;;  %v2062_v44 = vperm.slane %v3284_v39, 0  ;;  %v2308_v34 = vperm.slane %v3302_v31, 0  ;;  %v2310_v35 = vrot.slane %v2309_v32, 4 }
 0x3ee   :  { %1393 = vrot.lane.b32.xlu2 %v1389_v45, %s3436_s25  ;;  %v2064_v45 = vrot.slane %v2063_v41, 4 }
 0x3ef   :  { %1931 = vrot.lane.b32.xlu1 %v1930_v38, %s3422_s19 }
 0x3f0   :  { %v2065_v47 = vsel %vm52_vm0, %v2062_v44, %v2064_v45 }
 0x3f2   :  { %1474 = vrot.lane.b32.xlu0 %v1471_v52, %s3437_s26 }
 0x3f6   :  { %1476 = vrot.lane.b32.xlu2 %v1472_v57, %s3437_s26 }
 0x3f7   :  { %2066 = vrot.lane.b32.xlu1 %v2065_v47, %s3429_s17  ;;  %v3970_v47 = vld [vmem:[%s4413_s6 + $0xc] sm:$0xf] }
 0x3fa   :  { %1557 = vrot.lane.b32.xlu0 %v1554_v60, %s3438_s29 }
 0x3fe   :  { %1559 = vrot.lane.b32.xlu2 %v1555_v61, %s3438_s29 }
 0x421   :  { %v1646_v40 = vpop.xlane.xlu0 %1645 }
 0x422   :  { %v1647_v46 = vmul.f32 %v1646_v40, %v3535_v42  ;;  %v3206_v40 = vld [vmem:[%s4413_s6 + $0x4] sm:$0xf] }
 0x424   :  { %v1661_v48 = vmul.f32 %v1647_v46, %v1647_v46  ;;  %v1668_v19 = vperm.slane %v1647_v46, %v3539_v56 }
 0x426   :  { %v1670_v23 = vsub.f32 %v3835_v62, %v1668_v19 }
 0x429   :  { %v1659_v52 = vpop.xlane.xlu2 %1658 }
 0x42a   :  { %v1660_v57 = vmul.f32 %v1659_v52, %v3535_v42  ;;  %v1702_v52 = vld [vmem:[%s4408_s1] sm:$0x3] }
 0x42c   :  { %v1662_v60 = vsub.f32 %v1660_v57, %v1661_v48 }
 0x42e   :  { %v1663_v61 = vmax.f32 %v1662_v60, 0.0 }
 0x430   :  { %v1671_v36 = vadd.f32 1e-05, %v1663_v61  ;;  %v1705_v61 = vperm.slane %v1702_v52, 1 }
 0x431   :  { %v3894_v2 = vpop.permute.xlu2 %961 }
 0x432   :  { %3390 = vrsqrt.f32 %v1671_v36  ;;  %vm1678_vm5 = vweird.f32 %v1671_v36  ;;  %v1706_v19 = vrot.slane %v1705_v61, 4 }
 0x434   :  { %v960_v6 = vpop.permute.xlu0 %959 }
 0x435   :  { %v965_v8 = vsel %vm185_vm4, %v960_v6, %v3894_v2 }
 0x436   :  { %3207 = vmatpush.msk.msra.mxu2 %vm52_vm0, %v965_v8 }
 0x438   :  { %v3391_v0 = vpop.eup %3390 }
 0x439   :  { %v1673_v11 = vmul.f32 %v3391_v0, %v1671_v36  ;;  %vm1679_vm3 = vweird.f32 %v3391_v0  ;;  %v3902_v21 = vpop.permute.xlu2 %2230 }
 0x43a   :  { %vm1680_vm7 = vmor %vm1678_vm5, %vm1679_vm3  ;;  %vm4429_vm3 = vcmask 31744  }
 0x43b   :  { %v1674_v12 = vmul.f32 %v3391_v0, %v1673_v11  ;;  %3208 = vmatmul.msk.f32.vlgmr.msra.gmra.mxu2 %vm4429_vm3, %v3206_v40  ;;  %vm4430_vm5 = vmmov %vm4429_vm3 }
 0x43c   :  { %v3899_v13 = vpop.permute.xlu0 %1091 }
 0x43d   :  { %v1675_v14 = vmul.f32 0.5, %v1674_v12 }
 0x43f   :  { %v1676_v17 = vsub.f32 1.5, %v1675_v14 }
 0x441   :  { %v1677_v20 = vmul.f32 %v3391_v0, %v1676_v17  ;;  %v1179_v18 = vpop.permute.xlu2 %1178  ;;  %v1704_v17 = vperm.slane %v1702_v52, 0 }
 0x443   :  { %v1681_v22 = vsel %vm1680_vm7, %v3391_v0, %v1677_v20  ;;  %vm4431_vm7 = vmmov %vm4429_vm3 }
 0x444   :  { %v3905_v7 = vpop.permute.xlu0 %1095  ;;  %v1686_v50 = vperm.slane %v1681_v22, %v3539_v56  ;;  %v3290_v56 = vld [vmem:[%s4408_s1 + $0xc] sm:$0x3] }
 0x446   :  { %v1688_v51 = vmul.f32 %v1686_v50, %v1670_v23  ;;  %v1707_v23 = vsel %vm52_vm0, %v1704_v17, %v1706_v19  ;;  %v2232_v19 = vrot.slane %v3902_v21, 4 }
 0x448   :  { %v1689_v4 = vmul.f32 %v1688_v51, %v3545_v3  ;;  %v2145_v3 = vperm.slane %v3290_v56, 1 }
 0x449   :  { %v3963_v46 = vpop.permute.xlu2 %1310 }
 0x44a   :  { %v3910_v15 = vadd.f32 %v1689_v4, %v3549_v5  ;;  %v2144_v5 = vperm.slane %v3290_v56, 0  ;;  %v2146_v29 = vrot.slane %v2145_v3, 4 }
 0x44c   :  { %v3912_v24 = vpop.permute.xlu0 %1176  ;;  %v1691_v27 = vmax.f32 %v3910_v15, 0.0  ;;  %v2147_v30 = vsel %vm52_vm0, %v2144_v5, %v2146_v29 }
 0x44d   :  { %v1181_v28 = vsel %vm407_vm6, %v3912_v24, %v1179_v18 }
 0x44e   :  { %1693 = vrot.lane.b32.xlu1 %v1691_v27, %s3427_s11  ;;  %3225 = vmatpush.msk.msra.mxu1 %vm52_vm0, %v1181_v28 }
 0x451   :  { %v1719_v38 = vpop.permute.xlu1 %1718  ;;  %v3985_v14 = vpop.permute.xlu2 %1393 }
 0x452   :  { %v1720_v48 = vrot.slane %v1719_v38, 4 }
 0x454   :  { %v3959_v44 = vpop.permute.xlu0 %1308  ;;  %v1721_v6 = vsel %vm4424_vm11, %v1720_v48, %v1719_v38  ;;  %vm4435_vm11 = vcmask 785408  }
 0x456   :  { %963 = vrot.lane.b32.xlu1 %v3795_v49, %s3432_s20  ;;  %v2311_v49 = vsel %vm52_vm0, %v2308_v34, %v2310_v35 }
 0x459   :  { %v3995_v3 = vpop.permute.xlu2 %1476 }
 0x45c   :  { %v1392_v11 = vpop.permute.xlu0 %1391 }
 0x45e   :  { %2148 = vrot.lane.b32.xlu1 %v2147_v30, %s3423_s22  ;;  %v3216_v30 = vld [vmem:[%s4413_s6 + $0x8] sm:$0xf] }
 0x464   :  { %v1475_v28 = vpop.permute.xlu0 %1474 }
 0x466   :  { %1093 = vrot.lane.b32.xlu1 %v3811_v16, %s3433_s21  ;;  %v1556_v16 = vld.sshfl [vmem:[#allocation1 + $0x10] sm:$0xff pattern:$0x75316420] }
 0x46c   :  { %v1558_v38 = vpop.permute.xlu0 %1557 }
 0x46e   :  { %1174 = vrot.lane.b32.xlu1 %v3817_v9, %s3434_s23  ;;  %v3944_v9 = vpop.permute.xlu1 %1849 }
 0x46f   :  { %v1851_v22 = vrot.slane %v3944_v9, 4 }
 0x476   :  { %2312 = vrot.lane.b32.xlu1 %v2311_v49, %s3425_s28  ;;  %v3946_v39 = vpop.permute.xlu1 %1931  ;;  %v1397_v49 = vsel %vm4435_vm11, %v1392_v11, %v3985_v14  ;;  %vm4437_vm11 = vcmask 900096  }
 0x477   :  { %v1933_v31 = vrot.slane %v3946_v39, 4 }
 0x47e   :  { %1312 = vrot.lane.b32.xlu1 %v3819_v26, %s3435_s24  ;;  %v3952_v26 = vpop.permute.xlu1 %2066 }
 0x486   :  { %1395 = vrot.lane.b32.xlu1 %v3823_v37, %s3436_s25  ;;  %v933_v37 = vld [vmem:[%s4413_s6] sm:$0xf] }
 0x487   :  { %3212 = vmatmul.msk.f32.vlgmr.msrb.gmra.mxu0 %vm4430_vm5, %v933_v37  ;;  %3214 = vmatmul.msk.f32.vlgmr.msrb.gmra.mxu1 %vm4431_vm7, %v933_v37  ;;  %vm4432_vm5 = vmmov %vm4429_vm3  ;;  %vm4433_vm7 = vcmask 1031168  }
 0x48e   :  { %1478 = vrot.lane.b32.xlu1 %v3827_v33, %s3437_s26 }
 0x48f   :  { %3226 = vmatmul.msk.f32.vlgmr.msra.gmra.mxu1 %vm4429_vm3, %v3970_v47  ;;  %vm4434_vm3 = vmmov %vm4433_vm7 }
 0x496   :  { %1561 = vrot.lane.b32.xlu1 %v1556_v16, %s3438_s29 }
 0x4c0   :  { %v1694_v33 = vpop.permute.xlu1 %1693 }
 0x4c1   :  { %v1695_v41 = vrot.slane %v1694_v33, 4 }
 0x4c3   :  { %v1696_v45 = vsel %vm132_vm8, %v1695_v41, %v1694_v33  ;;  %1700 = vst.msk [vmem:[#allocation2 + $0x8] sm:$0xf] %vm140_vm9, %v1695_v41  ;;  %v1314_v33 = vsel %vm4437_vm11, %v3959_v44, %v3963_v46  ;;  %v4033_v41 = vpop.permute.xlu2 %1559  ;;  %vm4440_vm11 = vmmov %vm4432_vm5 }
 0x4c4   :  { %1699 = vst.msk [vmem:[#allocation2] sm:$0xff] %vm3573_vm10, %v1696_v45 }
 0x4c8   :  { %v964_v57 = vpop.permute.xlu1 %963 }
 0x4c9   :  { %v966_v60 = vsel %vm185_vm4, %v3894_v2, %v964_v57 }
 0x4ca   :  { %v1711_v36 = vld [vmem:[#allocation2 + $0x8] sm:$0xf]  ;;  %3209 = vmatpush.msk.msra.mxu3 %vm52_vm0, %v966_v60 }
 0x4cb   :  { %v3981_v8 = vld [vmem:[#allocation2] sm:$0xff]  ;;  %v1725_v0 = vmul.f32 %v1720_v48, %v1711_v36  ;;  %3210 = vmatmul.msk.f32.vlgmr.msra.gmra.mxu3 %vm4432_vm5, %v3206_v40  ;;  %v1842_v2 = vld [vmem:[#allocation2 + $0x8] sm:$0xf] }
 0x4cc   :  { %v1724_v12 = vmul.f32 %v1721_v6, %v3981_v8  ;;  %v1856_v50 = vmul.f32 %v1851_v22, %v1842_v2  ;;  %v1709_v4 = vmul.f32 %v1707_v23, %v3981_v8  ;;  %v1924_v5 = vld [vmem:[#allocation2 + $0x8] sm:$0xf] }
 0x4cd   :  { %1731 = vst [vmem:[#allocation1 + $0x10] ss:$2 sm:$0xff] %v1725_v0  ;;  %v1938_v35 = vmul.f32 %v1933_v31, %v1924_v5  ;;  %v2141_v6 = vld [vmem:[#allocation2 + $0x8] sm:$0xf] }
 0x4ce   :  { %1729 = vst [vmem:[#allocation1] ss:$2 sm:$0xff] %v1724_v12  ;;  %v2223_v2 = vld [vmem:[#allocation2 + $0x8] sm:$0xf] }
 0x4d0   :  { %v3987_v20 = vpop.permute.xlu1 %2148 }
 0x4d1   :  { %v2150_v36 = vrot.slane %v3987_v20, 4 }
 0x4d3   :  { %v2155_v0 = vmul.f32 %v2150_v36, %v2141_v6  ;;  %v2151_v5 = vsel %vm611_vm15, %v2150_v36, %v3987_v20  ;;  %v3268_v36 = vld [vmem:[%s4409_s2 + $0x8] sm:$0xf]  ;;  %v3274_v6 = vld [vmem:[%s4409_s2 + $0xc] sm:$0xf] }
 0x4d4   :  { %v1734_v51 = vld.sshfl [vmem:[#allocation1 + $0x10] sm:$0xff pattern:$0x75316420] }
 0x4d5   :  { %1739 = vrot.lane.b32.xlu1 %v1734_v51, %s3432_s20  ;;  %1862 = vst [vmem:[#allocation1 + $0x10] ss:$2 sm:$0xff] %v1856_v50  ;;  %v1733_v18 = vld.sshfl [vmem:[#allocation1 + $0x8] sm:$0xff pattern:$0x75316420]  ;;  %v2237_v50 = vmul.f32 %v2232_v19, %v2223_v2 }
 0x4d6   :  { %1737 = vrot.lane.b32.xlu2 %v1733_v18, %s3432_s20  ;;  %v1732_v56 = vld.sshfl [vmem:[#allocation1] sm:$0xff pattern:$0x75316420] }
 0x4d7   :  { %1735 = vrot.lane.b32.xlu0 %v1732_v56, %s3432_s20  ;;  %1791 = vst [vmem:[#allocation1] ss:$2 sm:$0xff] %v1709_v4 }
 0x4d8   :  { %v1094_v29 = vpop.permute.xlu1 %1093 }
 0x4d9   :  { %v1097_v32 = vsel %vm4433_vm7, %v3899_v13, %v1094_v29  ;;  %v1098_v34 = vsel %vm4434_vm3, %v1094_v29, %v3905_v7  ;;  %v1852_v13 = vsel %vm299_vm12, %v1851_v22, %v3944_v9  ;;  %vm4436_vm7 = vmmov %vm4432_vm5  ;;  %v2059_v9 = vld [vmem:[#allocation2 + $0x8] sm:$0xf]  ;;  %vm4438_vm3 = vcmask 769024  }
 0x4da   :  { %3217 = vmatpush.msk.msrb.mxu2 %vm52_vm0, %v1097_v32  ;;  %3219 = vmatpush.msk.msrb.mxu3 %vm52_vm0, %v1098_v34  ;;  %v1855_v16 = vmul.f32 %v1852_v13, %v3981_v8  ;;  %v1563_v45 = vsel %vm4438_vm3, %v1558_v38, %v4033_v41  ;;  %vm4441_vm3 = vmmov %vm4432_vm5 }
 0x4db   :  { %3218 = vmatmul.msk.f32.vlgmr.msrb.gmra.mxu2 %vm4432_vm5, %v3216_v30  ;;  %3220 = vmatmul.msk.f32.vlgmr.msrb.gmra.mxu3 %vm4436_vm7, %v3216_v30  ;;  %vm4439_vm7 = vcmask 777216  }
 0x4dc   :  { %3230 = vmatpush.msk.msra.mxu3 %vm52_vm0, %v911_v58  ;;  %3228 = vmatpush.msk.msra.mxu2 %vm52_vm0, %v910_v59  ;;  %v1865_v7 = vld.sshfl [vmem:[#allocation1 + $0x10] sm:$0xff pattern:$0x75316420]  ;;  %v2068_v59 = vrot.slane %v3952_v26, 4  ;;  %v1480_v52 = vsel %vm4439_vm7, %v1475_v28, %v3995_v3  ;;  %vm4443_vm7 = vcmask 900096  }
 0x4dd   :  { %1870 = vrot.lane.b32.xlu1 %v1865_v7, %s3433_s21  ;;  %1944 = vst [vmem:[#allocation1 + $0x10] ss:$2 sm:$0xff] %v1938_v35  ;;  %v2233_v35 = vsel %vm4426_vm1, %v2232_v19, %v3902_v21 }
 0x4de   :  { %3240 = vmatpush.msk.msrb.mxu2 %vm52_vm0, %v1397_v49  ;;  %v1792_v55 = vld.sshfl [vmem:[#allocation1] sm:$0xff pattern:$0x75316420]  ;;  %v4022_v58 = vld.sshfl [vmem:[#allocation1 + $0x8] sm:$0xff pattern:$0x75316420]  ;;  %v2073_v48 = vmul.f32 %v2068_v59, %v2059_v9  ;;  %v2069_v51 = vsel %vm525_vm14, %v2068_v59, %v3952_v26  ;;  %v2236_v13 = vmul.f32 %v2233_v35, %v3981_v8 }
 0x4df   :  { %1860 = vst [vmem:[#allocation1] ss:$2 sm:$0xff] %v1855_v16  ;;  %v2072_v18 = vmul.f32 %v2069_v51, %v3981_v8  ;;  %v2305_v26 = vld [vmem:[#allocation2 + $0x8] sm:$0xf] }
 0x4e0   :  { %v1175_v40 = vpop.permute.xlu1 %1174 }
 0x4e1   :  { %v1180_v37 = vsel %vm407_vm6, %v1175_v40, %v3912_v24  ;;  %v1934_v24 = vsel %vm385_vm13, %v1933_v31, %v3946_v39  ;;  %v2154_v31 = vmul.f32 %v2151_v5, %v3981_v8 }
 0x4e2   :  { %3223 = vmatpush.msk.msra.mxu0 %vm52_vm0, %v1180_v37  ;;  %v1937_v57 = vmul.f32 %v1934_v24, %v3981_v8  ;;  %v3233_v37 = vld [vmem:[%s4413_s6 + $0x14] sm:$0xf] }
 0x4e3   :  { %3229 = vmatmul.msk.f32.vlgmr.msra.gmra.mxu2 %vm4432_vm5, %v3227_v54  ;;  %3224 = vmatmul.msk.f32.vlgmr.msra.gmra.mxu0 %vm4440_vm11, %v3970_v47  ;;  %v3239_v47 = vld [vmem:[%s4413_s6 + $0x18] sm:$0xf]  ;;  %vm4442_vm5 = vmmov %vm4441_vm3  ;;  %vm4444_vm11 = vcmask 785408  }
 0x4e4   :  { %3234 = vmatpush.msk.msrb.mxu0 %vm52_vm0, %v1314_v33  ;;  %3252 = vmatpush.msk.msra.mxu2 %vm52_vm0, %v1563_v45  ;;  %v1947_v44 = vld.sshfl [vmem:[#allocation1 + $0x10] sm:$0xff pattern:$0x75316420]  ;;  %v1710_v33 = vld [vmem:[%s4409_s2] sm:$0xf] }
 0x4e5   :  { %1952 = vrot.lane.b32.xlu1 %v1947_v44, %s3434_s23  ;;  %2079 = vst [vmem:[#allocation1 + $0x10] ss:$2 sm:$0xff] %v2073_v48  ;;  %3231 = vmatmul.msk.f32.vlgmr.msra.gmra.mxu3 %vm4441_vm3, %v3227_v54 }
 0x4e6   :  { %3246 = vmatpush.msk.msra.mxu0 %vm52_vm0, %v1480_v52  ;;  %v1864_v60 = vld.sshfl [vmem:[#allocation1 + $0x8] sm:$0xff pattern:$0x75316420]  ;;  %v1863_v61 = vld.sshfl [vmem:[#allocation1] sm:$0xff pattern:$0x75316420] }
 0x4e7   :  { %1868 = vrot.lane.b32.xlu2 %v1864_v60, %s3433_s21  ;;  %1866 = vrot.lane.b32.xlu0 %v1863_v61, %s3433_s21  ;;  %1942 = vst [vmem:[#allocation1] ss:$2 sm:$0xff] %v1937_v57  ;;  %v3258_v52 = vld [vmem:[%s4409_s2 + $0x4] sm:$0xf] }
 0x4e8   :  { %v2313_v39 = vpop.permute.xlu1 %2312 }
 0x4eb   :  { %3241 = vmatmul.msk.f32.vlgmr.msrb.gmra.mxu2 %vm4442_vm5, %v3239_v47  ;;  %vm4445_vm5 = vcmask 777216   ;;  %3235 = vmatmul.msk.f32.vlgmr.msrb.gmra.mxu0 %vm4441_vm3, %v3233_v37 }
 0x4ec   :  { %3263 = vmatpush.msk.msrb.mxu2 %vm52_vm0, %v1792_v55  ;;  %v2082_v11 = vld.sshfl [vmem:[#allocation1 + $0x10] sm:$0xff pattern:$0x75316420] }
 0x4ed   :  { %2087 = vrot.lane.b32.xlu1 %v2082_v11, %s3435_s24  ;;  %2161 = vst [vmem:[#allocation1 + $0x10] ss:$2 sm:$0xff] %v2155_v0  ;;  %v3279_v11 = vld [vmem:[%s4409_s2 + $0x10] sm:$0xf] }
 0x4ee   :  { %v1946_v12 = vld.sshfl [vmem:[#allocation1 + $0x8] sm:$0xff pattern:$0x75316420]  ;;  %v1945_v17 = vld.sshfl [vmem:[#allocation1] sm:$0xff pattern:$0x75316420] }
 0x4ef   :  { %1950 = vrot.lane.b32.xlu2 %v1946_v12, %s3434_s23  ;;  %1948 = vrot.lane.b32.xlu0 %v1945_v17, %s3434_s23  ;;  %2006 = vst [vmem:[#allocation1] ss:$2 sm:$0xff] %v1691_v27  ;;  %v2314_v27 = vrot.slane %v2313_v39, 4 }
 0x4f0   :  { %v1313_v22 = vpop.permute.xlu1 %1312 }
 0x4f1   :  { %v1315_v23 = vsel %vm4443_vm7, %v3963_v46, %v1313_v22  ;;  %v2319_v29 = vmul.f32 %v2314_v27, %v2305_v26  ;;  %vm4446_vm7 = vcmask 769024   ;;  %v2315_v21 = vsel %vm4425_vm2, %v2314_v27, %v2313_v39  ;;  %vm4450_vm2 = vmmov %vm4441_vm3  ;;  %v3285_v22 = vld [vmem:[%s4409_s2 + $0x14] sm:$0xf] }
 0x4f2   :  { %3236 = vmatpush.msk.msrb.mxu1 %vm52_vm0, %v1315_v23  ;;  %v2318_v38 = vmul.f32 %v2315_v21, %v3981_v8  ;;  %v3245_v8 = vld [vmem:[%s4413_s6 + $0x1c] sm:$0xf]  ;;  %vm4451_vm1 = vmmov %vm4450_vm2 }
 0x4f4   :  { %v2164_v4 = vld.sshfl [vmem:[#allocation1 + $0x10] sm:$0xff pattern:$0x75316420] }
 0x4f5   :  { %2169 = vrot.lane.b32.xlu1 %v2164_v4, %s3436_s25  ;;  %2243 = vst [vmem:[#allocation1 + $0x10] ss:$2 sm:$0xff] %v2237_v50 }
 0x4f6   :  { %v4072_v28 = vld.sshfl [vmem:[#allocation1] sm:$0xff pattern:$0x75316420]  ;;  %v4074_v15 = vld.sshfl [vmem:[#allocation1 + $0x8] sm:$0xff pattern:$0x75316420] }
 0x4f7   :  { %2077 = vst [vmem:[#allocation1] ss:$2 sm:$0xff] %v2072_v18 }
 0x4f8   :  { %v1396_v56 = vpop.permute.xlu1 %1395 }
 0x4f9   :  { %v1398_v46 = vsel %vm4444_vm11, %v3985_v14, %v1396_v56  ;;  %vm4447_vm11 = vmmov %vm4441_vm3  ;;  %v991_v56 = vpop.f32.mrf.mxu2 }
 0x4fa   :  { %3242 = vmatpush.msk.msrb.mxu3 %vm52_vm0, %v1398_v46  ;;  %3237 = vmatmul.msk.f32.vlgmr.msrb.gmra.mxu1 %vm4447_vm11, %v3233_v37  ;;  %vm4452_vm11 = vmmov %vm4451_vm1 }
 0x4fb   :  { %3243 = vmatmul.msk.f32.vlgmr.msrb.gmra.mxu3 %vm4441_vm3, %v3239_v47 }
 0x4fc   :  { %v2246_v30 = vld.sshfl [vmem:[#allocation1 + $0x10] sm:$0xff pattern:$0x75316420] }
 0x4fd   :  { %2251 = vrot.lane.b32.xlu1 %v2246_v30, %s3437_s26  ;;  %2325 = vst [vmem:[#allocation1 + $0x10] ss:$2 sm:$0xff] %v2319_v29 }
 0x4fe   :  { %v2081_v32 = vld.sshfl [vmem:[#allocation1 + $0x8] sm:$0xff pattern:$0x75316420]  ;;  %v2080_v34 = vld.sshfl [vmem:[#allocation1] sm:$0xff pattern:$0x75316420] }
 0x4ff   :  { %2085 = vrot.lane.b32.xlu2 %v2081_v32, %s3435_s24  ;;  %2083 = vrot.lane.b32.xlu0 %v2080_v34, %s3435_s24  ;;  %2159 = vst [vmem:[#allocation1] ss:$2 sm:$0xff] %v2154_v31  ;;  %v3297_v32 = vld [vmem:[%s4409_s2 + $0x1c] sm:$0xf] }
 0x500   :  { %v1479_v14 = vpop.permute.xlu1 %1478 }
 0x501   :  { %v1481_v20 = vsel %vm4445_vm5, %v3995_v3, %v1479_v14  ;;  %vm4448_vm5 = vmmov %vm4441_vm3 }
 0x502   :  { %3248 = vmatpush.msk.msra.mxu1 %vm52_vm0, %v1481_v20 }
 0x503   :  { %3249 = vmatmul.msk.f32.vlgmr.msra.gmra.mxu1 %vm4448_vm5, %v3245_v8  ;;  %vm4455_vm5 = vcmask 1031168  }
 0x504   :  { %v2328_v49 = vld.sshfl [vmem:[#allocation1 + $0x10] sm:$0xff pattern:$0x75316420]  ;;  %v1062_v5 = vpop.f32.mrf.mxu1  ;;  %v1042_v26 = vpop.f32.mrf.mxu0 }
 0x505   :  { %2333 = vrot.lane.b32.xlu1 %v2328_v49, %s3438_s29  ;;  %v1043_v30 = vadd.f32 %v1042_v26, %v991_v56 }
 0x506   :  { %v2163_v7 = vld.sshfl [vmem:[#allocation1 + $0x8] sm:$0xff pattern:$0x75316420]  ;;  %v2162_v16 = vld.sshfl [vmem:[#allocation1] sm:$0xff pattern:$0x75316420] }
 0x507   :  { %2167 = vrot.lane.b32.xlu2 %v2163_v7, %s3436_s25  ;;  %2165 = vrot.lane.b32.xlu0 %v2162_v16, %s3436_s25  ;;  %2241 = vst [vmem:[#allocation1] ss:$2 sm:$0xff] %v2236_v13 }
 0x508   :  { %v1562_v55 = vpop.permute.xlu1 %1561 }
 0x509   :  { %v1564_v3 = vsel %vm4446_vm7, %v4033_v41, %v1562_v55  ;;  %vm4449_vm7 = vmmov %vm4441_vm3 }
 0x50a   :  { %3254 = vmatpush.msk.msra.mxu3 %vm52_vm0, %v1564_v3  ;;  %3247 = vmatmul.msk.f32.vlgmr.msra.gmra.mxu0 %vm4449_vm7, %v3245_v8  ;;  %vm4453_vm3 = vmmov %vm4451_vm1 }
 0x50b   :  { %vm4456_vm7 = vmmov %vm4451_vm1 }
 0x50c   :  { %3265 = vmatpush.msk.msrb.mxu3 %vm52_vm0, %v4022_v58  ;;  %v3251_v58 = vld [vmem:[%s4413_s6 + $0x20] sm:$0xf]  ;;  %v1226_v16 = vpop.f32.mrf.mxu1 }
 0x50d   :  { %3253 = vmatmul.msk.f32.vlgmr.msra.gmra.mxu2 %vm4450_vm2, %v3251_v58  ;;  %3255 = vmatmul.msk.f32.vlgmr.msra.gmra.mxu3 %vm4451_vm1, %v3251_v58  ;;  %vm4454_vm2 = vmmov %vm4451_vm1 }
 0x50e   :  { %v2245_v9 = vld.sshfl [vmem:[#allocation1 + $0x8] sm:$0xff pattern:$0x75316420]  ;;  %v2244_v40 = vld.sshfl [vmem:[#allocation1] sm:$0xff pattern:$0x75316420] }
 0x50f   :  { %2249 = vrot.lane.b32.xlu2 %v2245_v9, %s3437_s26  ;;  %2247 = vrot.lane.b32.xlu0 %v2244_v40, %s3437_s26  ;;  %2323 = vst [vmem:[#allocation1] ss:$2 sm:$0xff] %v2318_v38  ;;  %v3303_v38 = vld [vmem:[%s4409_s2 + $0x20] sm:$0xf] }
 0x515   :  { %3266 = vmatmul.msk.f32.vlgmr.msrb.gmra.mxu3 %vm4452_vm11, %v1710_v33  ;;  %3264 = vmatmul.msk.f32.vlgmr.msrb.gmra.mxu2 %vm4453_vm3, %v1710_v33  ;;  %vm4457_vm11 = vmmov %vm4455_vm5 }
 0x516   :  { %v2327_v54 = vld.sshfl [vmem:[#allocation1 + $0x8] sm:$0xff pattern:$0x75316420]  ;;  %v2326_v59 = vld.sshfl [vmem:[#allocation1] sm:$0xff pattern:$0x75316420]  ;;  %vm4458_vm3 = vmmov %vm4451_vm1 }
 0x517   :  { %2331 = vrot.lane.b32.xlu2 %v2327_v54, %s3438_s29  ;;  %2329 = vrot.lane.b32.xlu0 %v2326_v59, %s3438_s29 }
 0x530   :  { %v1738_v41 = vpop.permute.xlu2 %1737 }
 0x541   :  { %v1869_v45 = vpop.permute.xlu2 %1868 }
 0x547   :  { %v1740_v48 = vpop.permute.xlu1 %1739 }
 0x548   :  { %v1742_v24 = vsel %vm185_vm4, %v1738_v41, %v1740_v48 }
 0x549   :  { %v1736_v44 = vpop.permute.xlu0 %1735  ;;  %3261 = vmatpush.msk.msrb.mxu1 %vm52_vm0, %v1742_v24  ;;  %v1951_v39 = vpop.permute.xlu2 %1950 }
 0x54a   :  { %v1741_v57 = vsel %vm185_vm4, %v1736_v44, %v1738_v41  ;;  %3262 = vmatmul.msk.f32.vlgmr.msrb.gmra.mxu1 %vm4451_vm1, %v3258_v52 }
 0x54b   :  { %3259 = vmatpush.msk.msrb.mxu0 %vm52_vm0, %v1741_v57 }
 0x54c   :  { %3260 = vmatmul.msk.f32.vlgmr.msrb.gmra.mxu0 %vm4454_vm2, %v3258_v52  ;;  %vm4459_vm2 = vmmov %vm4451_vm1 }
 0x54e   :  { %v1011_v46 = vpop.f32.mrf.mxu3 }
 0x54f   :  { %v1871_v60 = vpop.permute.xlu1 %1870  ;;  %v1063_v29 = vadd.f32 %v1062_v5, %v1011_v46 }
 0x550   :  { %v1873_v61 = vsel %vm4455_vm5, %v1869_v45, %v1871_v60  ;;  %vm4460_vm5 = vcmask 900096  }
 0x551   :  { %3271 = vmatpush.msk.msra.mxu1 %vm52_vm0, %v1873_v61 }
 0x552   :  { %3272 = vmatmul.msk.f32.vlgmr.msra.gmra.mxu1 %vm4456_vm7, %v3268_v36  ;;  %vm4461_vm7 = vmmov %vm4451_vm1 }
 0x553   :  { %3282 = vmatpush.msk.msrb.mxu1 %vm52_vm0, %v4074_v15 }
 0x557   :  { %v1953_v47 = vpop.permute.xlu1 %1952 }
 0x558   :  { %v1955_v0 = vsel %vm407_vm6, %v1951_v39, %v1953_v47 }
 0x559   :  { %v2086_v12 = vpop.permute.xlu2 %2085  ;;  %v1867_v17 = vpop.permute.xlu0 %1866  ;;  %3277 = vmatpush.msk.msra.mxu3 %vm52_vm0, %v1955_v0 }
 0x55a   :  { %v1872_v19 = vsel %vm4457_vm11, %v1867_v17, %v1869_v45  ;;  %3278 = vmatmul.msk.f32.vlgmr.msra.gmra.mxu3 %vm4458_vm3, %v3274_v6  ;;  %3283 = vmatmul.msk.f32.vlgmr.msrb.gmra.mxu1 %vm4451_vm1, %v3279_v11  ;;  %vm4462_vm11 = vmmov %vm4451_vm1 }
 0x55b   :  { %3269 = vmatpush.msk.msra.mxu0 %vm52_vm0, %v1872_v19  ;;  %vm4463_vm3 = vmmov %vm4451_vm1  ;;  %vm4464_vm1 = vcmask 785408  }
 0x55c   :  { %3270 = vmatmul.msk.f32.vlgmr.msra.gmra.mxu0 %vm4459_vm2, %v3268_v36 }
 0x55d   :  { %3280 = vmatpush.msk.msrb.mxu0 %vm52_vm0, %v4072_v28  ;;  %v3291_v28 = vld [vmem:[%s4409_s2 + $0x18] sm:$0xf] }
 0x55e   :  { %v1123_v35 = vpop.f32.mrf.mxu2  ;;  %v1143_v49 = vpop.f32.mrf.mxu3 }
 0x55f   :  { %v2088_v2 = vpop.permute.xlu1 %2087  ;;  %v1146_v13 = vadd.f32 %v1123_v35, %v1043_v30  ;;  %v1147_v7 = vadd.f32 %v1143_v49, %v1063_v29 }
 0x560   :  { %v2090_v23 = vsel %vm4460_vm5, %v2086_v12, %v2088_v2  ;;  %vm4465_vm5 = vcmask 777216   ;;  %v1206_v55 = vpop.f32.mrf.mxu0 }
 0x561   :  { %v2168_v50 = vpop.permute.xlu2 %2167  ;;  %v1949_v51 = vpop.permute.xlu0 %1948  ;;  %3288 = vmatpush.msk.msrb.mxu3 %vm52_vm0, %v2090_v23  ;;  %v1230_v9 = vadd.f32 %v1226_v16, %v1147_v7  ;;  %v1229_v40 = vadd.f32 %v1206_v55, %v1146_v13 }
 0x562   :  { %v1954_v4 = vsel %vm407_vm6, %v1949_v51, %v1951_v39  ;;  %3289 = vmatmul.msk.f32.vlgmr.msrb.gmra.mxu3 %vm4461_vm7, %v3285_v22  ;;  %vm4466_vm7 = vcmask 900096  }
 0x563   :  { %3275 = vmatpush.msk.msra.mxu2 %vm52_vm0, %v1954_v4 }
 0x564   :  { %3276 = vmatmul.msk.f32.vlgmr.msra.gmra.mxu2 %vm4462_vm11, %v3274_v6  ;;  %3281 = vmatmul.msk.f32.vlgmr.msrb.gmra.mxu0 %vm4463_vm3, %v3279_v11  ;;  %vm4467_vm11 = vmmov %vm4459_vm2 }
 0x565   :  { %vm4468_vm3 = vmmov %vm4459_vm2 }
 0x566   :  { %v1257_v8 = vpop.f32.mrf.mxu2 }
 0x567   :  { %v2170_v18 = vpop.permute.xlu1 %2169  ;;  %v1280_v33 = vadd.f32 %v1257_v8, %v1229_v40 }
 0x568   :  { %v2172_v15 = vsel %vm4464_vm1, %v2168_v50, %v2170_v18  ;;  %vm4469_vm1 = vcmask 769024   ;;  %v1277_v58 = vpop.f32.mrf.mxu3  ;;  %v1340_v57 = vpop.f32.mrf.mxu0 }
 0x569   :  { %3294 = vmatpush.msk.msra.mxu1 %vm52_vm0, %v2172_v15  ;;  %v2250_v27 = vpop.permute.xlu2 %2249  ;;  %v1281_v41 = vadd.f32 %v1277_v58, %v1230_v9  ;;  %v1363_v61 = vadd.f32 %v1340_v57, %v1280_v33 }
 0x56a   :  { %3295 = vmatmul.msk.f32.vlgmr.msra.gmra.mxu1 %vm4459_vm2, %v3291_v28  ;;  %vm4470_vm2 = vcmask 785408  }
 0x56e   :  { %v1423_v36 = vpop.f32.mrf.mxu2 }
 0x56f   :  { %v2252_v31 = vpop.permute.xlu1 %2251  ;;  %v1446_v47 = vadd.f32 %v1423_v36, %v1363_v61 }
 0x570   :  { %v2254_v34 = vsel %vm4465_vm5, %v2250_v27, %v2252_v31  ;;  %vm4471_vm5 = vmmov %vm4468_vm3 }
 0x571   :  { %v2084_v14 = vpop.permute.xlu0 %2083  ;;  %3300 = vmatpush.msk.msra.mxu3 %vm52_vm0, %v2254_v34  ;;  %v2332_v3 = vpop.permute.xlu2 %2331 }
 0x572   :  { %v2089_v20 = vsel %vm4466_vm7, %v2084_v14, %v2086_v12  ;;  %3301 = vmatmul.msk.f32.vlgmr.msra.gmra.mxu3 %vm4467_vm11, %v3297_v32  ;;  %vm4472_vm7 = vmmov %vm4468_vm3  ;;  %vm4473_vm11 = vcmask 777216  }
 0x573   :  { %3286 = vmatpush.msk.msrb.mxu2 %vm52_vm0, %v2089_v20 }
 0x574   :  { %3287 = vmatmul.msk.f32.vlgmr.msrb.gmra.mxu2 %vm4468_vm3, %v3285_v22 }
 0x577   :  { %v2334_v21 = vpop.permute.xlu1 %2333  ;;  %v1360_v44 = vpop.f32.mrf.mxu1 }
 0x578   :  { %v2336_v54 = vsel %vm4469_vm1, %v2332_v3, %v2334_v21  ;;  %v1364_v60 = vadd.f32 %v1360_v44, %v1281_v41 }
 0x579   :  { %v2166_v59 = vpop.permute.xlu0 %2165  ;;  %3306 = vmatpush.msk.msrb.mxu1 %vm52_vm0, %v2336_v54 }
 0x57a   :  { %v2171_v37 = vsel %vm4470_vm2, %v2166_v59, %v2168_v50  ;;  %3307 = vmatmul.msk.f32.vlgmr.msrb.gmra.mxu1 %vm4471_vm5, %v3303_v38  ;;  %vm4474_vm2 = vmmov %vm4468_vm3 }
 0x57b   :  { %3292 = vmatpush.msk.msra.mxu0 %vm52_vm0, %v2171_v37 }
 0x57c   :  { %3293 = vmatmul.msk.f32.vlgmr.msra.gmra.mxu0 %vm4472_vm7, %v3291_v28 }
 0x57e   :  { %v1443_v39 = vpop.f32.mrf.mxu3 }
 0x57f   :  { %v1447_v6 = vadd.f32 %v1443_v39, %v1364_v60 }
 0x580   :  { %v1526_v0 = vpop.f32.mrf.mxu1 }
 0x581   :  { %v2248_v45 = vpop.permute.xlu0 %2247  ;;  %v1530_v12 = vadd.f32 %v1526_v0, %v1447_v6 }
 0x582   :  { %v2253_v48 = vsel %vm4473_vm11, %v2248_v45, %v2250_v27 }
 0x583   :  { %3298 = vmatpush.msk.msra.mxu2 %vm52_vm0, %v2253_v48 }
 0x584   :  { %3299 = vmatmul.msk.f32.vlgmr.msra.gmra.mxu2 %vm4468_vm3, %v3297_v32  ;;  %vm4475_vm3 = vcmask 7168  }
 0x587   :  { %v1506_v11 = vpop.f32.mrf.mxu0 }
 0x588   :  { %v1529_v17 = vadd.f32 %v1506_v11, %v1446_v47 }
 0x589   :  { %v2330_v52 = vpop.permute.xlu0 %2329 }
 0x58a   :  { %v2335_v24 = vsel %vm4469_vm1, %v2330_v52, %v2332_v3  ;;  %vm4484_vm1 = vmmov %vm4474_vm2 }
 0x58b   :  { %3304 = vmatpush.msk.msrb.mxu0 %vm52_vm0, %v2335_v24 }
 0x58c   :  { %3305 = vmatmul.msk.f32.vlgmr.msrb.gmra.mxu0 %vm4474_vm2, %v3303_v38 }
 0x590   :  { %v1589_v19 = vpop.f32.mrf.mxu2  ;;  %v1609_v2 = vpop.f32.mrf.mxu3 }
 0x591   :  { %v4198_v22 = vadd.f32 %v1589_v19, %v1529_v17  ;;  %v4200_v23 = vadd.f32 %v1609_v2, %v1530_v12  ;;  %v3341_v12 = vld [vmem:[%s4408_s1 + $0xc] sm:$0x3] }
 0x592   :  { %v2878_v19 = vperm.slane %v3341_v12, 0  ;;  %v2879_v2 = vperm.slane %v3341_v12, 1  ;;  %v2439_v12 = vld [vmem:[%s4408_s1] sm:$0x3] }
 0x598   :  { %v1838_v51 = vpop.f32.mrf.mxu3  ;;  %v1818_v56 = vpop.f32.mrf.mxu2 }
 0x5c7   :  { %v1787_v50 = vpop.f32.mrf.mxu1 }
 0x5c8   :  { %v1839_v28 = vadd.f32 %v1838_v51, %v1787_v50  ;;  %v2880_v50 = vrot.slane %v2879_v2, 4  ;;  %v2442_v2 = vperm.slane %v2439_v12, 1 }
 0x5c9   :  { %v1767_v18 = vpop.f32.mrf.mxu0 }
 0x5ca   :  { %v1819_v30 = vadd.f32 %v1818_v56, %v1767_v18  ;;  %v2881_v51 = vsel %vm52_vm0, %v2878_v19, %v2880_v50 }
 0x5cf   :  { %v1918_v4 = vpop.f32.mrf.mxu1 }
 0x5d0   :  { %v1922_v27 = vadd.f32 %v1918_v4, %v1839_v28 }
 0x5d7   :  { %v2053_v46 = vpop.f32.mrf.mxu1 }
 0x5d9   :  { %v1898_v5 = vpop.f32.mrf.mxu0 }
 0x5da   :  { %v1921_v14 = vadd.f32 %v1898_v5, %v1819_v30 }
 0x5dd   :  { %v2000_v15 = vpop.f32.mrf.mxu3 }
 0x5de   :  { %v2004_v26 = vadd.f32 %v2000_v15, %v1922_v27 }
 0x5e0   :  { %v2057_v31 = vadd.f32 %v2053_v46, %v2004_v26 }
 0x5e1   :  { %v2033_v35 = vpop.f32.mrf.mxu0 }
 0x5e5   :  { %v2135_v29 = vpop.f32.mrf.mxu3 }
 0x5e6   :  { %v2139_v20 = vadd.f32 %v2135_v29, %v2057_v31 }
 0x5e7   :  { %v1980_v32 = vpop.f32.mrf.mxu2  ;;  %v2217_v34 = vpop.f32.mrf.mxu1 }
 0x5e8   :  { %v2003_v49 = vadd.f32 %v1980_v32, %v1921_v14  ;;  %v2221_v13 = vadd.f32 %v2217_v34, %v2139_v20  ;;  %v3347_v32 = vld [vmem:[%s4408_s1 + $0xe] sm:$0x3] }
 0x5e9   :  { %v2960_v20 = vperm.slane %v3347_v32, 0 }
 0x5ea   :  { %v2056_v55 = vadd.f32 %v2033_v35, %v2003_v49  ;;  %v2961_v35 = vperm.slane %v3347_v32, 1  ;;  %v3308_v49 = vld [vmem:[%s4408_s1 + $0x2] sm:$0x3] }
 0x5f5   :  { %v2299_v7 = vpop.f32.mrf.mxu3 }
 0x5f6   :  { %v2303_v3 = vadd.f32 %v2299_v7, %v2221_v13  ;;  %v2962_v7 = vrot.slane %v2961_v35, 4 }
 0x5f7   :  { %v2115_v16 = vpop.f32.mrf.mxu2  ;;  %v2381_v21 = vpop.f32.mrf.mxu1 }
 0x5f8   :  { %v2138_v9 = vadd.f32 %v2115_v16, %v2056_v55  ;;  %v2385_v40 = vadd.f32 %v2381_v21, %v2303_v3  ;;  %v2452_v55 = vperm.slane %v3308_v49, 1  ;;  %v2963_v3 = vsel %vm52_vm0, %v2960_v20, %v2962_v7 }
 0x5f9   :  { %v2197_v38 = vpop.f32.mrf.mxu0  ;;  %v2451_v21 = vperm.slane %v3308_v49, 0 }
 0x5fa   :  { %v2220_v54 = vadd.f32 %v2197_v38, %v2138_v9  ;;  %v2387_v37 = vadd.f32 %v2385_v40, %v3717_v10  ;;  %v2453_v38 = vrot.slane %v2452_v55, 4  ;;  %v3318_v9 = vld [vmem:[%s4408_s1 + $0x4] sm:$0x3] }
 0x5fc   :  { %v2395_v45 = vmul.f32 %v2387_v37, %v2387_v37  ;;  %v2389_v52 = vsel %vm52_vm0, %v2387_v37, 0.0  ;;  %v2454_v40 = vsel %vm52_vm0, %v2451_v21, %v2453_v38 }
 0x5fe   :  { %v2397_v60 = vsel %vm52_vm0, %v2395_v45, 0.0 }
 0x607   :  { %v2279_v59 = vpop.f32.mrf.mxu2 }
 0x608   :  { %v2302_v8 = vadd.f32 %v2279_v59, %v2220_v54  ;;  %v2583_v54 = vperm.slane %v3318_v9, 1  ;;  %v2582_v59 = vperm.slane %v3318_v9, 0 }
 0x609   :  { %v2361_v58 = vpop.f32.mrf.mxu0 }
 0x60a   :  { %v2384_v33 = vadd.f32 %v2361_v58, %v2302_v8  ;;  %v3324_v8 = vld [vmem:[%s4408_s1 + $0x6] sm:$0x3] }
 0x60c   :  { %v2386_v41 = vadd.f32 %v2384_v33, %v3717_v10  ;;  %v2665_v33 = vperm.slane %v3324_v8, 1 }
 0x60e   :  { %v2388_v48 = vsel %vm52_vm0, %v2386_v41, 0.0  ;;  %v2394_v24 = vmul.f32 %v2386_v41, %v2386_v41  ;;  %v2666_v45 = vrot.slane %v2665_v33, 4 }
 0x60f   :  { %v2390_v44 = vadd.f32 %v2389_v52, %v2388_v48  ;;  %v3335_v48 = vld [vmem:[%s4408_s1 + $0xa] sm:$0x3] }
 0x610   :  { %v2396_v57 = vsel %vm52_vm0, %v2394_v24, 0.0  ;;  %v2797_v24 = vperm.slane %v3335_v48, 1 }
 0x611   :  { %2391 = vadd.xlane.f32.xlu0 %v2390_v44  ;;  %v2398_v61 = vadd.f32 %v2397_v60, %v2396_v57  ;;  %v2796_v44 = vperm.slane %v3335_v48, 0  ;;  %v3353_v60 = vld [vmem:[%s4408_s1 + $0x10] sm:$0x3] }
 0x612   :  { %v2798_v57 = vrot.slane %v2797_v24, 4 }
 0x613   :  { %2399 = vadd.xlane.f32.xlu2 %v2398_v61 }
 0x614   :  { %v2799_v61 = vsel %vm52_vm0, %v2796_v44, %v2798_v57 }
 0x625   :  { %2882 = vrot.lane.b32.xlu0 %v2881_v51, %s3423_s22 }
 0x62b   :  { %2964 = vrot.lane.b32.xlu2 %v2963_v3, %s3430_s18 }
 0x684   :  { %v2392_v36 = vpop.xlane.xlu0 %2391 }
 0x685   :  { %v2393_v39 = vmul.f32 %v2392_v36, %v3535_v42  ;;  %v3043_v36 = vperm.slane %v3353_v60, 1 }
 0x686   :  { %v2400_v47 = vpop.xlane.xlu2 %2399 }
 0x687   :  { %v2401_v10 = vmul.f32 %v2400_v47, %v3535_v42  ;;  %v2402_v6 = vmul.f32 %v2393_v39, %v2393_v39  ;;  %v2405_v56 = vsub.f32 %v2386_v41, %v2393_v39  ;;  %v2406_v46 = vsub.f32 %v2387_v37, %v2393_v39 }
 0x688   :  { %v2584_v37 = vrot.slane %v2583_v54, 4  ;;  %v2664_v41 = vperm.slane %v3324_v8, 0  ;;  %v3042_v39 = vperm.slane %v3353_v60, 0  ;;  %v3044_v47 = vrot.slane %v3043_v36, 4 }
 0x689   :  { %v2403_v0 = vsub.f32 %v2401_v10, %v2402_v6 }
 0x68a   :  { %v2585_v58 = vsel %vm52_vm0, %v2582_v59, %v2584_v37  ;;  %v2667_v52 = vsel %vm52_vm0, %v2664_v41, %v2666_v45  ;;  %v3045_v10 = vsel %vm52_vm0, %v3042_v39, %v3044_v47 }
 0x68b   :  { %v2404_v11 = vmax.f32 %v2403_v0, 0.0 }
 0x68d   :  { %v2407_v17 = vadd.f32 1e-05, %v2404_v11 }
 0x68e   :  { %v2965_v24 = vpop.permute.xlu2 %2964 }
 0x68f   :  { %3392 = vrsqrt.f32 %v2407_v17  ;;  %vm2414_vm7 = vweird.f32 %v2407_v17  ;;  %v2966_v36 = vrot.slane %v2965_v24, 4 }
 0x695   :  { %v3393_v4 = vpop.eup %3392 }
 0x696   :  { %v2409_v18 = vmul.f32 %v3393_v4, %v2407_v17  ;;  %vm2415_vm5 = vweird.f32 %v3393_v4 }
 0x697   :  { %vm2416_vm11 = vmor %vm2414_vm7, %vm2415_vm5  ;;  %v2883_v59 = vpop.permute.xlu0 %2882 }
 0x698   :  { %v2410_v28 = vmul.f32 %v3393_v4, %v2409_v18  ;;  %v2884_v41 = vrot.slane %v2883_v59, 4  ;;  %vm4486_vm5 = vmmov %vm4484_vm1 }
 0x699   :  { %vm4487_vm7 = vmmov %vm4484_vm1 }
 0x69a   :  { %v2411_v42 = vmul.f32 0.5, %v2410_v28  ;;  %v2885_v47 = vsel %vm611_vm15, %v2884_v41, %v2883_v59  ;;  %vm4482_vm15 = vcmask 1031168  }
 0x69c   :  { %v2412_v15 = vsub.f32 1.5, %v2411_v42  ;;  %v2441_v42 = vperm.slane %v2439_v12, 0 }
 0x69e   :  { %v2413_v27 = vmul.f32 %v3393_v4, %v2412_v15  ;;  %v2443_v15 = vrot.slane %v2442_v2, 4 }
 0x6a0   :  { %v2417_v5 = vsel %vm2416_vm11, %v3393_v4, %v2413_v27  ;;  %vm4488_vm11 = vmmov %vm4484_vm1 }
 0x6a1   :  { %v2419_v26 = vmul.f32 %v2417_v5, %v2406_v46  ;;  %v2418_v29 = vmul.f32 %v2417_v5, %v2405_v56  ;;  %v2444_v56 = vsel %vm52_vm0, %v2441_v42, %v2443_v15 }
 0x6a3   :  { %v2420_v30 = vmul.f32 %v2418_v29, %v3737_v43  ;;  %v2421_v31 = vmul.f32 %v2419_v26, %v3737_v43 }
 0x6a5   :  { %v4221_v34 = vadd.f32 %v2420_v30, %v3741_v53  ;;  %v4224_v14 = vadd.f32 %v2421_v31, %v3741_v53 }
 0x6a7   :  { %v2425_v13 = vmax.f32 %v4224_v14, 0.0  ;;  %v2424_v43 = vmax.f32 %v4221_v34, 0.0  ;;  %v3330_v14 = vld [vmem:[%s4413_s6 + $0x10] sm:$0xf] }
 0x6a9   :  { %v2428_v16 = vrot.slane %v2425_v13, 4 }
 0x6ab   :  { %v2429_v53 = vsel %vm52_vm0, %v2424_v43, %v2428_v16 }
 0x6ac   :  { %2430 = vrot.lane.b32.xlu1 %v2429_v53, %s3427_s11  ;;  %s3142_s11 = sshll.u32 %s4417_s10, 4  ;;  %s3143_s11 = int_to_ptr.hbm [resolvable:$true] %s3142_s11 }
 0x6b4   :  { %2455 = vrot.lane.b32.xlu1 %v2454_v40, %s3428_s14  ;;  %s3441_s14 = smov 8  }
 0x6bc   :  { %2586 = vrot.lane.b32.xlu1 %v2585_v58, %s3424_s27 }
 0x6c4   :  { %2668 = vrot.lane.b32.xlu1 %v2667_v52, %s3422_s19 }
 0x6cc   :  { %2800 = vrot.lane.b32.xlu1 %v2799_v61, %s3429_s17 }
 0x6d4   :  { %3046 = vrot.lane.b32.xlu1 %v3045_v10, %s3425_s28 }
 0x71e   :  { %v2431_v6 = vpop.permute.xlu1 %2430 }
 0x71f   :  { %v2432_v0 = vrot.slane %v2431_v6, 4 }
 0x721   :  { %v2433_v11 = vsel %vm132_vm8, %v2432_v0, %v2431_v6  ;;  %2437 = vst.msk [vmem:[#allocation2 + $0x8] sm:$0xf] %vm140_vm9, %v2432_v0  ;;  %vm4476_vm8 = vcmask 269312   ;;  %vm4477_vm9 = vcmask 277504  }
 0x722   :  { %2436 = vst.msk [vmem:[#allocation2] sm:$0xff] %vm3573_vm10, %v2433_v11  ;;  %v2967_v2 = vsel %vm4476_vm8, %v2966_v36, %v2965_v24  ;;  %vm4478_vm10 = vmmov %vm4474_vm2  ;;  %vm4490_vm8 = vcmask 900096  }
 0x726   :  { %v2456_v17 = vpop.permute.xlu1 %2455 }
 0x727   :  { %v2457_v19 = vrot.slane %v2456_v17, 4 }
 0x728   :  { %v2448_v50 = vld [vmem:[#allocation2 + $0x8] sm:$0xf] }
 0x729   :  { %v4268_v51 = vld [vmem:[#allocation2] sm:$0xff]  ;;  %v2458_v4 = vsel %vm4475_vm3, %v2457_v19, %v2456_v17  ;;  %v2462_v18 = vmul.f32 %v2457_v19, %v2448_v50  ;;  %v2579_v46 = vld [vmem:[#allocation2 + $0x8] sm:$0xf]  ;;  %vm4489_vm3 = vmmov %vm4484_vm1 }
 0x72a   :  { %v2461_v28 = vmul.f32 %v4268_v51, %v2458_v4  ;;  %v2446_v29 = vmul.f32 %v4268_v51, %v2444_v56  ;;  %v2661_v49 = vld [vmem:[#allocation2 + $0x8] sm:$0xf]  ;;  %v2888_v11 = vmul.f32 %v4268_v51, %v2885_v47 }
 0x72b   :  { %2468 = vst [vmem:[#allocation1 + $0x10] ss:$2 sm:$0xff] %v2462_v18  ;;  %v2793_v40 = vld [vmem:[#allocation2 + $0x8] sm:$0xf] }
 0x72c   :  { %2466 = vst [vmem:[#allocation1] ss:$2 sm:$0xff] %v2461_v28  ;;  %v2875_v45 = vld [vmem:[#allocation2 + $0x8] sm:$0xf]  ;;  %v2970_v28 = vmul.f32 %v2967_v2, %v4268_v51 }
 0x72d   :  { %v2889_v52 = vmul.f32 %v2884_v41, %v2875_v45  ;;  %v2957_v39 = vld [vmem:[#allocation2 + $0x8] sm:$0xf] }
 0x72e   :  { %v2587_v25 = vpop.permute.xlu1 %2586  ;;  %v2971_v10 = vmul.f32 %v2966_v36, %v2957_v39  ;;  %v3039_v50 = vld [vmem:[#allocation2 + $0x8] sm:$0xf]  ;;  %v3354_v36 = vld [vmem:[%s4413_s6 + $0x20] sm:$0xf] }
 0x72f   :  { %v2588_v27 = vrot.slane %v2587_v25, 4 }
 0x731   :  { %v2593_v5 = vmul.f32 %v2588_v27, %v2579_v46  ;;  %v2589_v35 = vsel %vm299_vm12, %v2588_v27, %v2587_v25  ;;  %vm4479_vm12 = vmmov %vm4474_vm2 }
 0x732   :  { %v2471_v26 = vld.sshfl [vmem:[#allocation1 + $0x10] sm:$0xff pattern:$0x75316420]  ;;  %v2592_v55 = vmul.f32 %v4268_v51, %v2589_v35 }
 0x733   :  { %2476 = vrot.lane.b32.xlu1 %v2471_v26, %s3432_s20  ;;  %2599 = vst [vmem:[#allocation1 + $0x10] ss:$2 sm:$0xff] %v2593_v5  ;;  %v2469_v30 = vld.sshfl [vmem:[#allocation1] sm:$0xff pattern:$0x75316420] }
 0x734   :  { %2472 = vrot.lane.b32.xlu0 %v2469_v30, %s3432_s20  ;;  %v2470_v31 = vld.sshfl [vmem:[#allocation1 + $0x8] sm:$0xff pattern:$0x75316420] }
 0x735   :  { %2528 = vst [vmem:[#allocation1] ss:$2 sm:$0xff] %v2446_v29 }
 0x736   :  { %v2669_v32 = vpop.permute.xlu1 %2668 }
 0x737   :  { %v2670_v20 = vrot.slane %v2669_v32, 4 }
 0x739   :  { %v2675_v7 = vmul.f32 %v2670_v20, %v2661_v49  ;;  %v2671_v9 = vsel %vm385_vm13, %v2670_v20, %v2669_v32  ;;  %v3309_v49 = vld [vmem:[%s4413_s6 + $0x4] sm:$0xf]  ;;  %vm4480_vm13 = vmmov %vm4474_vm2 }
 0x73a   :  { %v2602_v16 = vld.sshfl [vmem:[#allocation1 + $0x10] sm:$0xff pattern:$0x75316420]  ;;  %v2674_v8 = vmul.f32 %v4268_v51, %v2671_v9 }
 0x73b   :  { %2474 = vrot.lane.b32.xlu1 %v2470_v31, %s3432_s20  ;;  %2681 = vst [vmem:[#allocation1 + $0x10] ss:$2 sm:$0xff] %v2675_v7  ;;  %v2447_v31 = vld [vmem:[%s4413_s6] sm:$0xf] }
 0x73c   :  { %v2529_v3 = vld.sshfl [vmem:[#allocation1] sm:$0xff pattern:$0x75316420]  ;;  %v2530_v53 = vld.sshfl [vmem:[#allocation1 + $0x8] sm:$0xff pattern:$0x75316420] }
 0x73d   :  { %3314 = vmatpush.msk.msra.mxu0 %vm52_vm0, %v2529_v3  ;;  %3316 = vmatpush.msk.msra.mxu1 %vm52_vm0, %v2530_v53  ;;  %2597 = vst [vmem:[#allocation1] ss:$2 sm:$0xff] %v2592_v55 }
 0x73e   :  { %v2801_v21 = vpop.permute.xlu1 %2800  ;;  %3317 = vmatmul.msk.f32.vlgmr.msra.gmra.mxu1 %vm4478_vm10, %v2447_v31  ;;  %3315 = vmatmul.msk.f32.vlgmr.msra.gmra.mxu0 %vm4479_vm12, %v2447_v31  ;;  %vm4493_vm10 = vmmov %vm4484_vm1  ;;  %vm4494_vm12 = vcmask 785408  }
 0x73f   :  { %v2802_v38 = vrot.slane %v2801_v21, 4 }
 0x741   :  { %v2807_v54 = vmul.f32 %v2802_v38, %v2793_v40  ;;  %v2803_v48 = vsel %vm525_vm14, %v2802_v38, %v2801_v21  ;;  %vm4481_vm14 = vmmov %vm4474_vm2  ;;  %v3319_v21 = vld [vmem:[%s4413_s6 + $0x8] sm:$0xf] }
 0x742   :  { %v2684_v37 = vld.sshfl [vmem:[#allocation1 + $0x10] sm:$0xff pattern:$0x75316420]  ;;  %v2806_v57 = vmul.f32 %v4268_v51, %v2803_v48  ;;  %vm4485_vm2 = vmmov %vm4484_vm1 }
 0x743   :  { %2607 = vrot.lane.b32.xlu1 %v2602_v16, %s3433_s21  ;;  %2813 = vst [vmem:[#allocation1 + $0x10] ss:$2 sm:$0xff] %v2807_v54  ;;  %v3325_v54 = vld [vmem:[%s4413_s6 + $0xc] sm:$0xf] }
 0x744   :  { %v2601_v58 = vld.sshfl [vmem:[#allocation1 + $0x8] sm:$0xff pattern:$0x75316420]  ;;  %v2600_v33 = vld.sshfl [vmem:[#allocation1] sm:$0xff pattern:$0x75316420] }
 0x745   :  { %2605 = vrot.lane.b32.xlu2 %v2601_v58, %s3433_s21  ;;  %2603 = vrot.lane.b32.xlu0 %v2600_v33, %s3433_s21  ;;  %2679 = vst [vmem:[#allocation1] ss:$2 sm:$0xff] %v2674_v8  ;;  %v3336_v8 = vld [vmem:[%s4413_s6 + $0x14] sm:$0xf] }
 0x746   :  { %v3047_v6 = vpop.permute.xlu1 %3046 }
 0x747   :  { %v3048_v19 = vrot.slane %v3047_v6, 4 }
 0x749   :  { %v3053_v4 = vmul.f32 %v3048_v19, %v3039_v50  ;;  %v3049_v25 = vsel %vm4477_vm9, %v3048_v19, %v3047_v6  ;;  %vm4492_vm9 = vmmov %vm4484_vm1  ;;  %v3348_v19 = vld [vmem:[%s4413_s6 + $0x1c] sm:$0xf] }
 0x74a   :  { %v2816_v44 = vld.sshfl [vmem:[#allocation1 + $0x10] sm:$0xff pattern:$0x75316420]  ;;  %v3052_v56 = vmul.f32 %v3049_v25, %v4268_v51  ;;  %v44_v51 = vld [vmem:[%s4414_s7] sm:$0xf] }
 0x74b   :  { %2689 = vrot.lane.b32.xlu1 %v2684_v37, %s3434_s23  ;;  %2895 = vst [vmem:[#allocation1 + $0x10] ss:$2 sm:$0xff] %v2889_v52  ;;  %v3342_v52 = vld [vmem:[%s4413_s6 + $0x18] sm:$0xf]  ;;  %s3439_s6 = smov [#allocation3]  }
 0x74c   :  { %v2683_v60 = vld.sshfl [vmem:[#allocation1 + $0x8] sm:$0xff pattern:$0x75316420]  ;;  %v2682_v61 = vld.sshfl [vmem:[#allocation1] sm:$0xff pattern:$0x75316420] }
 0x74d   :  { %2687 = vrot.lane.b32.xlu2 %v2683_v60, %s3434_s23  ;;  %2685 = vrot.lane.b32.xlu0 %v2682_v61, %s3434_s23  ;;  %2811 = vst [vmem:[#allocation1] ss:$2 sm:$0xff] %v2806_v57  ;;  %s3140_s5 = sshll.u32 %s3439_s6, 4  ;;  %s3141_s5 = int_to_ptr.vmem [resolvable:$true] %s3140_s5 }
 0x752   :  { %v2898_v0 = vld.sshfl [vmem:[#allocation1 + $0x10] sm:$0xff pattern:$0x75316420] }
 0x753   :  { %2821 = vrot.lane.b32.xlu1 %v2816_v44, %s3435_s24  ;;  %2977 = vst [vmem:[#allocation1 + $0x10] ss:$2 sm:$0xff] %v2971_v10 }
 0x754   :  { %v2815_v12 = vld.sshfl [vmem:[#allocation1 + $0x8] sm:$0xff pattern:$0x75316420]  ;;  %v2814_v17 = vld.sshfl [vmem:[#allocation1] sm:$0xff pattern:$0x75316420] }
 0x755   :  { %2819 = vrot.lane.b32.xlu2 %v2815_v12, %s3435_s24  ;;  %2817 = vrot.lane.b32.xlu0 %v2814_v17, %s3435_s24  ;;  %2893 = vst [vmem:[#allocation1] ss:$2 sm:$0xff] %v2888_v11 }
 0x75a   :  { %v2980_v18 = vld.sshfl [vmem:[#allocation1 + $0x10] sm:$0xff pattern:$0x75316420] }
 0x75b   :  { %2903 = vrot.lane.b32.xlu1 %v2898_v0, %s3436_s25  ;;  %3059 = vst [vmem:[#allocation1 + $0x10] ss:$2 sm:$0xff] %v3053_v4 }
 0x75c   :  { %v2897_v42 = vld.sshfl [vmem:[#allocation1 + $0x8] sm:$0xff pattern:$0x75316420]  ;;  %v2896_v15 = vld.sshfl [vmem:[#allocation1] sm:$0xff pattern:$0x75316420] }
 0x75d   :  { %2901 = vrot.lane.b32.xlu2 %v2897_v42, %s3436_s25  ;;  %2899 = vrot.lane.b32.xlu0 %v2896_v15, %s3436_s25  ;;  %2975 = vst [vmem:[#allocation1] ss:$2 sm:$0xff] %v2970_v28 }
 0x762   :  { %v3062_v27 = vld.sshfl [vmem:[#allocation1 + $0x10] sm:$0xff pattern:$0x75316420] }
 0x763   :  { %3067 = vrot.lane.b32.xlu1 %v3062_v27, %s3438_s29 }
 0x764   :  { %v2978_v46 = vld.sshfl [vmem:[#allocation1] sm:$0xff pattern:$0x75316420]  ;;  %v2979_v5 = vld.sshfl [vmem:[#allocation1 + $0x8] sm:$0xff pattern:$0x75316420] }
 0x765   :  { %3057 = vst [vmem:[#allocation1] ss:$2 sm:$0xff] %v3052_v56 }
 0x76b   :  { %2985 = vrot.lane.b32.xlu1 %v2980_v18, %s3437_s26 }
 0x76c   :  { %v3061_v26 = vld.sshfl [vmem:[#allocation1 + $0x8] sm:$0xff pattern:$0x75316420]  ;;  %v3060_v29 = vld.sshfl [vmem:[#allocation1] sm:$0xff pattern:$0x75316420] }
 0x76d   :  { %3065 = vrot.lane.b32.xlu2 %v3061_v26, %s3438_s29  ;;  %3063 = vrot.lane.b32.xlu0 %v3060_v29, %s3438_s29  ;;  %3122 = vst [vmem:[#allocation1] ss:$2 sm:$0xff] %v3835_v62 }
 0x775   :  { %2983 = vrot.lane.b32.xlu2 %v2979_v5, %s3437_s26  ;;  %2981 = vrot.lane.b32.xlu0 %v2978_v46, %s3437_s26 }
 0x77d   :  { %1616 = vperm.xlu2 %3382, %v44_v51  }
 0x79f   :  { %v2606_v30 = vpop.permute.xlu2 %2605 }
 0x7a5   :  { %v2477_v32 = vpop.permute.xlu1 %2476 }
 0x7a6   :  { %v2473_v20 = vpop.permute.xlu0 %2472 }
 0x7a7   :  { %v2688_v62 = vpop.permute.xlu2 %2687 }
 0x7ad   :  { %v2475_v35 = vpop.permute.xlu1 %2474 }
 0x7ae   :  { %v2478_v7 = vsel %vm185_vm4, %v2473_v20, %v2475_v35  ;;  %v2479_v16 = vsel %vm185_vm4, %v2475_v35, %v2477_v32  ;;  %vm4483_vm4 = vmmov %vm4482_vm15 }
 0x7af   :  { %3310 = vmatpush.msk.msrb.mxu2 %vm52_vm0, %v2478_v7  ;;  %3312 = vmatpush.msk.msrb.mxu3 %vm52_vm0, %v2479_v16  ;;  %v2820_v55 = vpop.permute.xlu2 %2819 }
 0x7b0   :  { %3313 = vmatmul.msk.f32.vlgmr.msrb.gmra.mxu3 %vm4480_vm13, %v3309_v49  ;;  %3311 = vmatmul.msk.f32.vlgmr.msrb.gmra.mxu2 %vm4481_vm14, %v3309_v49  ;;  %vm4495_vm13 = vmmov %vm4494_vm12 }
 0x7b1   :  { %vm4496_vm14 = vmmov %vm4484_vm1 }
 0x7b5   :  { %v2608_v3 = vpop.permute.xlu1 %2607 }
 0x7b6   :  { %v2610_v53 = vsel %vm4482_vm15, %v2606_v30, %v2608_v3  ;;  %vm4497_vm15 = vmmov %vm4484_vm1 }
 0x7b7   :  { %v2604_v38 = vpop.permute.xlu0 %2603  ;;  %3322 = vmatpush.msk.msra.mxu3 %vm52_vm0, %v2610_v53 }
 0x7b8   :  { %v2609_v9 = vsel %vm4483_vm4, %v2604_v38, %v2606_v30  ;;  %3323 = vmatmul.msk.f32.vlgmr.msra.gmra.mxu3 %vm4484_vm1, %v3319_v21  ;;  %vm4498_vm4 = vcmask 769024  }
 0x7b9   :  { %3333 = vmatpush.msk.msrb.mxu3 %vm52_vm0, %v2425_v13  ;;  %3320 = vmatpush.msk.msra.mxu2 %vm52_vm0, %v2609_v9  ;;  %v2902_v13 = vpop.permute.xlu2 %2901 }
 0x7ba   :  { %3321 = vmatmul.msk.f32.vlgmr.msra.gmra.mxu2 %vm4485_vm2, %v3319_v21  ;;  %vm4499_vm2 = vcmask 777216  }
 0x7bb   :  { %3331 = vmatpush.msk.msrb.mxu2 %vm52_vm0, %v2424_v43  ;;  %v2575_v28 = vpop.f32.mrf.mxu1  ;;  %v2555_v25 = vpop.f32.mrf.mxu0 }
 0x7bd   :  { %v2690_v40 = vpop.permute.xlu1 %2689 }
 0x7be   :  { %v2692_v59 = vsel %vm407_vm6, %v2688_v62, %v2690_v40 }
 0x7bf   :  { %v2686_v37 = vpop.permute.xlu0 %2685  ;;  %3328 = vmatpush.msk.msrb.mxu1 %vm52_vm0, %v2692_v59 }
 0x7c0   :  { %v2691_v34 = vsel %vm407_vm6, %v2686_v37, %v2688_v62  ;;  %3329 = vmatmul.msk.f32.vlgmr.msrb.gmra.mxu1 %vm4486_vm5, %v3325_v54  ;;  %3334 = vmatmul.msk.f32.vlgmr.msrb.gmra.mxu3 %vm4487_vm7, %v3330_v14  ;;  %vm4491_vm6 = vmmov %vm4490_vm8 }
 0x7c1   :  { %3326 = vmatpush.msk.msrb.mxu0 %vm52_vm0, %v2691_v34  ;;  %vm4500_vm5 = vmmov %vm4498_vm4 }
 0x7c2   :  { %3327 = vmatmul.msk.f32.vlgmr.msrb.gmra.mxu0 %vm4488_vm11, %v3325_v54  ;;  %3332 = vmatmul.msk.f32.vlgmr.msrb.gmra.mxu2 %vm4489_vm3, %v3330_v14  ;;  %vm4501_vm7 = vmmov %vm4484_vm1  ;;  %v3124_v14 = vld.sshfl [vmem:[#allocation1 + $0x8] sm:$0xff pattern:$0x75316420] }
 0x7c3   :  { %vm4502_vm11 = vmmov %vm4484_vm1 }
 0x7c4   :  { %vm4503_vm3 = vmmov %vm4499_vm2 }
 0x7c5   :  { %v2822_v43 = vpop.permute.xlu1 %2821 }
 0x7c6   :  { %v2824_v58 = vsel %vm4490_vm8, %v2820_v55, %v2822_v43  ;;  %vm4504_vm8 = vmmov %vm4484_vm1 }
 0x7c7   :  { %v3066_v33 = vpop.permute.xlu2 %3065  ;;  %v2818_v41 = vpop.permute.xlu0 %2817  ;;  %3339 = vmatpush.msk.msra.mxu1 %vm52_vm0, %v2824_v58  ;;  %v3123_v58 = vld.sshfl [vmem:[#allocation1] sm:$0xff pattern:$0x75316420] }
 0x7c8   :  { %v2823_v45 = vsel %vm4491_vm6, %v2818_v41, %v2820_v55  ;;  %3340 = vmatmul.msk.f32.vlgmr.msra.gmra.mxu1 %vm4492_vm9, %v3336_v8 }
 0x7c9   :  { %3337 = vmatpush.msk.msra.mxu0 %vm52_vm0, %v2823_v45 }
 0x7ca   :  { %3338 = vmatmul.msk.f32.vlgmr.msra.gmra.mxu0 %vm4493_vm10, %v3336_v8 }
 0x7cd   :  { %v2904_v48 = vpop.permute.xlu1 %2903 }
 0x7ce   :  { %v2906_v24 = vsel %vm4494_vm12, %v2902_v13, %v2904_v48 }
 0x7cf   :  { %v2984_v44 = vpop.permute.xlu2 %2983  ;;  %v2900_v57 = vpop.permute.xlu0 %2899  ;;  %3345 = vmatpush.msk.msra.mxu3 %vm52_vm0, %v2906_v24 }
 0x7d0   :  { %v2905_v60 = vsel %vm4495_vm13, %v2900_v57, %v2902_v13  ;;  %3346 = vmatmul.msk.f32.vlgmr.msra.gmra.mxu3 %vm4496_vm14, %v3342_v52 }
 0x7d1   :  { %3343 = vmatpush.msk.msra.mxu2 %vm52_vm0, %v2905_v60 }
 0x7d2   :  { %3344 = vmatmul.msk.f32.vlgmr.msra.gmra.mxu2 %vm4497_vm15, %v3342_v52 }
 0x7d5   :  { %v3068_v61 = vpop.permute.xlu1 %3067 }
 0x7d6   :  { %v3070_v39 = vsel %vm4498_vm4, %v3066_v33, %v3068_v61 }
 0x7d7   :  { %v4378_v47 = vpop.permute.xlu2 %1616  ;;  %3357 = vmatpush.msk.msrb.mxu3 %vm52_vm0, %v3070_v39 }
 0x7d8   :  { %v1619_v10 = vadd.f32 %v4378_v47, %v4198_v22  ;;  %v1620_v6 = vadd.f32 %v4378_v47, %v4200_v23  ;;  %3358 = vmatmul.msk.f32.vlgmr.msrb.gmra.mxu3 %vm4484_vm1, %v3354_v36 }
 0x7da   :  { %v1627_v0 = vadd.f32 %v3839_v1, %v1620_v6  ;;  %v1626_v11 = vadd.f32 %v3837_v63, %v1619_v10 }
 0x7dc   :  { %v1630_v12 = vrot.slane %v1627_v0, 4 }
 0x7dd   :  { %v2986_v17 = vpop.permute.xlu1 %2985 }
 0x7de   :  { %v1631_v2 = vsel %vm52_vm0, %v1626_v11, %v1630_v12  ;;  %v2988_v50 = vsel %vm4499_vm2, %v2984_v44, %v2986_v17 }
 0x7df   :  { %1633 = vst [vmem:[#allocation3] sm:$0xff] %v1631_v2  ;;  %v3064_v22 = vpop.permute.xlu0 %3063  ;;  %3351 = vmatpush.msk.msrb.mxu1 %vm52_vm0, %v2988_v50 }
 0x7e0   :  { %v3069_v23 = vsel %vm4500_vm5, %v3064_v22, %v3066_v33  ;;  %3352 = vmatmul.msk.f32.vlgmr.msrb.gmra.mxu1 %vm4501_vm7, %v3348_v19 }
 0x7e1   :  { %3355 = vmatpush.msk.msrb.mxu2 %vm52_vm0, %v3069_v23 }
 0x7e2   :  { %3356 = vmatmul.msk.f32.vlgmr.msrb.gmra.mxu2 %vm4502_vm11, %v3354_v36 }
 0x7e7   :  { %v2982_v63 = vpop.permute.xlu0 %2981 }
 0x7e8   :  { %v2987_v1 = vsel %vm4503_vm3, %v2982_v63, %v2984_v44 }
 0x7e9   :  { %3349 = vmatpush.msk.msrb.mxu0 %vm52_vm0, %v2987_v1 }
 0x7ea   :  { %3350 = vmatmul.msk.f32.vlgmr.msrb.gmra.mxu0 %vm4504_vm8, %v3348_v19 }
 0x833   :  { %v2524_v4 = vpop.f32.mrf.mxu3  ;;  %v2504_v18 = vpop.f32.mrf.mxu2 }
 0x834   :  { %v2576_v15 = vadd.f32 %v2575_v28, %v2524_v4  ;;  %v2556_v29 = vadd.f32 %v2555_v25, %v2504_v18 }
 0x83b   :  { %v2655_v42 = vpop.f32.mrf.mxu3 }
 0x83c   :  { %v2659_v5 = vadd.f32 %v2655_v42, %v2576_v15 }
 0x83d   :  { %v2635_v27 = vpop.f32.mrf.mxu2  ;;  %v2737_v56 = vpop.f32.mrf.mxu1 }
 0x83e   :  { %v2741_v26 = vadd.f32 %v2737_v56, %v2659_v5  ;;  %v2658_v20 = vadd.f32 %v2635_v27, %v2556_v29 }
 0x83f   :  { %v2717_v51 = vpop.f32.mrf.mxu0 }
 0x840   :  { %v2740_v49 = vadd.f32 %v2717_v51, %v2658_v20 }
 0x843   :  { %v2787_v46 = vpop.f32.mrf.mxu3 }
 0x844   :  { %v2791_v32 = vadd.f32 %v2787_v46, %v2741_v26 }
 0x845   :  { %v2767_v30 = vpop.f32.mrf.mxu2  ;;  %v2869_v31 = vpop.f32.mrf.mxu1 }
 0x846   :  { %v2873_v35 = vadd.f32 %v2869_v31, %v2791_v32  ;;  %v2790_v38 = vadd.f32 %v2767_v30, %v2740_v49 }
 0x847   :  { %v2849_v55 = vpop.f32.mrf.mxu0 }
 0x848   :  { %v2872_v40 = vadd.f32 %v2849_v55, %v2790_v38 }
 0x853   :  { %v2951_v62 = vpop.f32.mrf.mxu3 }
 0x854   :  { %v2955_v7 = vadd.f32 %v2951_v62, %v2873_v35 }
 0x855   :  { %v2931_v53 = vpop.f32.mrf.mxu2 }
 0x856   :  { %v2954_v54 = vadd.f32 %v2931_v53, %v2872_v40 }
 0x85b   :  { %v3115_v21 = vpop.f32.mrf.mxu3 }
 0x85d   :  { %v3033_v16 = vpop.f32.mrf.mxu1 }
 0x85e   :  { %v3037_v3 = vadd.f32 %v3033_v16, %v2955_v7 }
 0x860   :  { %v3119_v9 = vadd.f32 %v3115_v21, %v3037_v3 }
 0x862   :  { %v3121_v59 = vadd.f32 %v3119_v9, %v4378_v47 }
 0x864   :  { %v3128_v43 = vadd.f32 %v3124_v14, %v3121_v59 }
 0x865   :  { %v3095_v37 = vpop.f32.mrf.mxu2 }
 0x866   :  { %v3131_v41 = vrot.slane %v3128_v43, 4 }
 0x867   :  { %v3013_v13 = vpop.f32.mrf.mxu0 }
 0x868   :  { %v3036_v34 = vadd.f32 %v3013_v13, %v2954_v54 }
 0x86a   :  { %v3118_v8 = vadd.f32 %v3095_v37, %v3036_v34 }
 0x86c   :  { %v3120_v33 = vadd.f32 %v3118_v8, %v4378_v47 }
 0x86e   :  { %v3127_v45 = vadd.f32 %v3123_v58, %v3120_v33 }
 0x870   :  { %v3132_v48 = vsel %vm52_vm0, %v3127_v45, %v3131_v41 }
 0x871   :  { %3135 = vst [vmem:[#allocation3 + $0x8] sm:$0xff] %v3132_v48 }
 0x872   :  { %3148 = dma.vmem_to_hbm [thread:$0]  %s3141_s5, 256, %s3143_s11, [#allocation4], %s3440_s12, %s3440_s12, %s3441_s14  }
 0x873   :  { %3418 = dma.done.wait [#allocation4], 256  }
 0x874   :  { %3419 = vsyncadd [#allocation4], 4294967040 }
 0x875   :  { %3153 = vsyncpa [#allocation4], 1 }

</bundles_post_ra>
